<compile_context>
chip_gen: v6e
topology: v6e:2x2x1
jax: 0.10.0
libtpu: 0.0.40
codegen_flags: <defaults>
</compile_context>

<pallas_src>
import numpy as np
import jax
import jax.numpy as jnp
from jax.experimental import pallas as pl
from jax.experimental.pallas import tpu as pltpu

B = 2          # batch size baked into the merged-batch constant packing
C = 128        # lane-padded channel width used for every layer
K1 = 256       # padded im2col depth of conv1 (7*7*3 = 147 -> 256)

# merged-batch (B=2) padded row counts of each activation (rows = b*pad + h*W + w)
RC1 = B * 64   # conv1 out   : 8*8
RMP = B * 16   # maxpool out : 4*4
RC2 = B * 16   # conv2 out   : 3*3 -> 16
RCT = B * 64   # convT out   : 8*8
RC3 = B * 64   # conv3 out   : 7*7 -> 64
RC4 = B * 48   # conv4 out   : 6*6 -> 48
ROUT = B * 16  # conv5 + avgpool out : 4*4


# ----------------------------------------------------------------------------
# Fused Pallas kernel: whole forward pass, activations stay in VMEM / vregs.
# ----------------------------------------------------------------------------
def _fused_net_kernel(p1_ref, w1_ref, pmax_ref, w2_ref, p2_ref, wt_ref, pt_ref,
                      w3_ref, p3_ref, w4_ref, p4_ref, w5_ref, p5_ref, aff_ref,
                      o_ref, stk_ref):
    f32, bf16 = jnp.float32, jnp.bfloat16
    aff = aff_ref[...]                     # (8, C) f32: rows 0..5 shifts, row 6 BN2 scale

    def shift_relu(y, k):
        return jnp.maximum(y + aff[k:k + 1, :], 0.0)

    def conv_wf(a, wc_ref, pc_ref, ntaps, rows_in, taps_per_chunk):
        # Weight-first conv:
        #   b_t = a @ W_t  computed N-packed (>=256 lanes per dot, chunked to keep
        #   the f32 result small), tap results row-stacked into the shared VMEM
        #   scratch, then ONE stacked selection matmul  P_cat @ stacked.
        for c in range(0, ntaps, taps_per_chunk):
            b = jnp.dot(a, wc_ref[:, c * C:(c + taps_per_chunk) * C],
                        preferred_element_type=f32)
            for t in range(taps_per_chunk):
                stk_ref[(c + t) * rows_in:(c + t + 1) * rows_in, :] = (
                    b[:, t * C:(t + 1) * C].astype(bf16))
        return jnp.dot(pc_ref[...], stk_ref[0:ntaps * rows_in, :],
                       preferred_element_type=f32)

    # Conv2d(3,32,k7,s2,p3) + BN1 + ReLU   (BN1 scale folded into w1)   -> (128, C)
    a = shift_relu(jnp.dot(p1_ref[...], w1_ref[...],
                           preferred_element_type=f32), 0).astype(bf16)

    # MaxPool2d(k3,s2,p1) + BatchNorm2d(32) + ReLU                      -> (32, C)
    # (0-padding is equivalent to PyTorch's -inf padding here: the pooled input is
    #  post-ReLU >= 0 and no window is entirely padding.)
    g = jnp.dot(pmax_ref[...], a, preferred_element_type=f32)           # (9*RMP, C)
    parts = [g[t * RMP:(t + 1) * RMP, :] for t in range(9)]
    while len(parts) > 1:                                               # balanced tree
        nxt = [jnp.maximum(parts[i], parts[i + 1])
               for i in range(0, len(parts) - 1, 2)]
        if len(parts) % 2:
            nxt.append(parts[-1])
        parts = nxt
    a = jnp.maximum(parts[0] * aff[6:7, :] + aff[1:2, :], 0.0).astype(bf16)

    # Conv2d(32,bc,k2,s2,p1) + BN3 + ReLU                               -> (32, C)
    a = shift_relu(conv_wf(a, w2_ref, p2_ref, 4, RMP, 4), 2).astype(bf16)
    # ConvTranspose2d(bc,128,k4,s2) + BN4 + ReLU                        -> (128, C)
    a = shift_relu(conv_wf(a, wt_ref, pt_ref, 16, RC2, 4), 3).astype(bf16)
    # Conv2d(128,64,k2) + BN5 + ReLU                                    -> (128, C)
    a = shift_relu(conv_wf(a, w3_ref, p3_ref, 4, RCT, 2), 4).astype(bf16)
    # Conv2d(64,64,k2) + BN6 + ReLU                                     -> (96, C)
    a = shift_relu(conv_wf(a, w4_ref, p4_ref, 4, RC3, 2), 5).astype(bf16)
    # Conv2d(64,32,k2) + AvgPool2d(k2,s1) (avg folded into selection)   -> (32, C)
    o_ref[...] = conv_wf(a, w5_ref, p5_ref, 4, RC4, 2)


# ----------------------------------------------------------------------------
# Constant-matrix builders (geometry baked into 0/1 selection matmuls).
# ----------------------------------------------------------------------------
def _tap_sel(H, W, kh, kw, s, p, dil):
    """Per-tap (Ho*Wo, H*W) 0/1 selection matrices for one batch element."""
    Hd, Wd = (H - 1) * dil + 1, (W - 1) * dil + 1
    Ho = (Hd + 2 * p - kh) // s + 1
    Wo = (Wd + 2 * p - kw) // s + 1
    taps = []
    for i in range(kh):
        for j in range(kw):
            P = np.zeros((Ho * Wo, H * W), np.float32)
            for ho in range(Ho):
                for wo in range(Wo):
                    hi = s * ho + i - p
                    wi = s * wo + j - p
                    if (0 <= hi < Hd and 0 <= wi < Wd
                            and hi % dil == 0 and wi % dil == 0):
                        P[ho * Wo + wo, (hi // dil) * W + (wi // dil)] = 1.0
            taps.append(P)
    return taps, Ho, Wo


def _blockdiag(P, out_pad, in_pad):
    """Per-batch tap (mo, mi) -> batch-block-diagonal (B*out_pad, B*in_pad)."""
    mo, mi = P.shape
    out = np.zeros((B * out_pad, B * in_pad), np.float32)
    for b in range(B):
        out[b * out_pad:b * out_pad + mo, b * in_pad:b * in_pad + mi] = P
    return out


def _stack_rows(taps, out_pad, in_pad):       # selection-first (maxpool)
    return np.concatenate([_blockdiag(P, out_pad, in_pad) for P in taps], axis=0)


def _cat_cols(taps, out_pad, in_pad):         # weight-first selection P_cat
    return np.concatenate([_blockdiag(P, out_pad, in_pad) for P in taps], axis=1)


def _conv_tap_cat(w, scale):
    """Conv2d weight (Cout,Cin,kh,kw) -> (C, kh*kw*C) bf16, taps N-concat,
    BatchNorm scale folded into the output-channel columns."""
    w = np.asarray(w, np.float32)
    cout, cin, kh, kw = w.shape
    s = np.ones((cout,), np.float32) if scale is None else np.asarray(scale, np.float32)
    blocks = []
    for i in range(kh):
        for j in range(kw):
            blk = np.zeros((C, C), np.float32)
            blk[:cin, :cout] = w[:, :, i, j].T * s[None, :]
            blocks.append(blk)
    return jnp.asarray(np.concatenate(blocks, axis=1), jnp.bfloat16)


def _convT_tap_cat(w, scale):
    """ConvTranspose2d weight (Cin,Cout,kh,kw) -> flipped-kernel taps N-concat."""
    w = np.asarray(w, np.float32)
    cin, cout, kh, kw = w.shape
    s = np.asarray(scale, np.float32)
    blocks = []
    for i in range(kh):
        for j in range(kw):
            blk = np.zeros((C, C), np.float32)
            blk[:cin, :cout] = w[:, :, kh - 1 - i, kw - 1 - j] * s[None, :]
            blocks.append(blk)
    return jnp.asarray(np.concatenate(blocks, axis=1), jnp.bfloat16)


def _conv1_mat(w, scale):
    """Conv2d(3,32,k7) weight -> dense im2col matrix (K1, C) bf16, BN1 scale folded."""
    w = np.asarray(w, np.float32)
    cout, cin, kh, kw = w.shape
    m = np.transpose(w, (2, 3, 1, 0)).reshape(kh * kw * cin, cout)
    m = m * np.asarray(scale, np.float32)[None, :]
    out = np.zeros((K1, C), np.float32)
    out[:m.shape[0], :cout] = m
    return jnp.asarray(out, jnp.bfloat16)


def fold_bn(gamma, beta, mean, var, eps=1e-5):
    scale = gamma / jnp.sqrt(var + eps)
    shift = beta - mean * scale
    return scale, shift


def make_bn_params(key, c):
    k1, k2, k3, k4 = jax.random.split(key, 4)
    gamma = 1.0 + 0.1 * jax.random.normal(k1, (c,), jnp.float32)
    beta = 0.05 * jax.random.normal(k2, (c,), jnp.float32)
    mean = 0.1 * jax.random.normal(k3, (c,), jnp.float32)
    var = 1.0 + 0.1 * jax.random.uniform(k4, (c,), jnp.float32)
    return fold_bn(gamma, beta, mean, var)


def init_params(key, bc):
    ks = jax.random.split(key, 12)
    p = {}
    p["w1"] = 0.1 * jax.random.normal(ks[0], (32, 3, 7, 7), jnp.float32)
    p["bn1"] = make_bn_params(ks[1], 32)        # extractor BN
    p["bn2"] = make_bn_params(ks[2], 32)        # bn[0]
    p["w2"] = 0.1 * jax.random.normal(ks[3], (bc, 32, 2, 2), jnp.float32)
    p["bn3"] = make_bn_params(ks[4], bc)
    p["wt"] = 0.1 * jax.random.normal(ks[5], (bc, 128, 4, 4), jnp.float32)
    p["bn4"] = make_bn_params(ks[6], 128)
    p["w3"] = 0.1 * jax.random.normal(ks[7], (64, 128, 2, 2), jnp.float32)
    p["bn5"] = make_bn_params(ks[8], 64)
    p["w4"] = 0.1 * jax.random.normal(ks[9], (64, 64, 2, 2), jnp.float32)
    p["bn6"] = make_bn_params(ks[10], 64)
    p["w5"] = 0.1 * jax.random.normal(ks[11], (32, 64, 2, 2), jnp.float32)
    return p
    # TODO(synk): BatchNorm is implemented in inference mode (running stats folded);
    # PyTorch training-mode batch statistics are not modeled.


def prepare(params):
    """One-time packing of weights / BN / selection constants (kernel inputs)."""
    # per-batch tap selections (0/1 matrices)
    t_mp, _, _ = _tap_sel(8, 8, 3, 3, 2, 1, 1)       # 9  taps (16, 64)
    t_c2, _, _ = _tap_sel(4, 4, 2, 2, 2, 1, 1)       # 4  taps (9, 16)
    t_ct, _, _ = _tap_sel(3, 3, 4, 4, 1, 3, 2)       # 16 taps (64, 9)  (dilated-input equiv.)
    t_c3, _, _ = _tap_sel(8, 8, 2, 2, 1, 0, 1)       # 4  taps (49, 64)
    t_c4, _, _ = _tap_sel(7, 7, 2, 2, 1, 0, 1)       # 4  taps (36, 49)
    t_c5, _, _ = _tap_sel(6, 6, 2, 2, 1, 0, 1)       # 4  taps (25, 36)
    t_av, _, _ = _tap_sel(5, 5, 2, 2, 1, 0, 1)       # 4  taps (16, 25)
    avg = sum(t_av) / 4.0                            # AvgPool2d(k2,s1) as one matrix
    t_c5a = [avg @ P for P in t_c5]                  # fold avgpool into conv5 selection

    p_max = _stack_rows(t_mp, 16, 64)                # (288, 128)
    p_c2 = _cat_cols(t_c2, 16, 16)                   # (32, 128)
    p_ct = _cat_cols(t_ct, 64, 16)                   # (128, 512)
    p_c3 = _cat_cols(t_c3, 64, 64)                   # (128, 512)
    p_c4 = _cat_cols(t_c4, 48, 64)                   # (96, 512)
    p_c5 = _cat_cols(t_c5a, 16, 48)                  # (32, 384)

    s1, b1 = params["bn1"]
    s2, b2 = params["bn2"]
    s3, b3 = params["bn3"]
    s4, b4 = params["bn4"]
    s5, b5 = params["bn5"]
    s6, b6 = params["bn6"]

    aff = np.zeros((8, C), np.float32)               # rows 0..5: shifts, row 6: BN2 scale
    for k, v in enumerate([b1, b2, b3, b4, b5, b6]):
        v = np.asarray(v, np.float32)
        aff[k, :v.shape[0]] = v
    s2np = np.asarray(s2, np.float32)
    aff[6, :s2np.shape[0]] = s2np

    return {
        "w1": _conv1_mat(params["w1"], s1),
        "w2": _conv_tap_cat(params["w2"], s3),
        "wt": _convT_tap_cat(params["wt"], s4),
        "w3": _conv_tap_cat(params["w3"], s5),
        "w4": _conv_tap_cat(params["w4"], s6),
        "w5": _conv_tap_cat(params["w5"], None),     # conv5 has no BN after it
        "p_max": jnp.asarray(p_max, jnp.bfloat16),
        "p_c2": jnp.asarray(p_c2, jnp.bfloat16),
        "p_ct": jnp.asarray(p_ct, jnp.bfloat16),
        "p_c3": jnp.asarray(p_c3, jnp.bfloat16),
        "p_c4": jnp.asarray(p_c4, jnp.bfloat16),
        "p_c5": jnp.asarray(p_c5, jnp.bfloat16),
        "aff": jnp.asarray(aff, jnp.float32),
    }


# ----------------------------------------------------------------------------
# im2col for the FIRST conv only (one-time reshuffle of the tiny network input)
# ----------------------------------------------------------------------------
def _extract_patches(x, kh, kw, sh_, sw_, ph, pw):
    Bn, H, W, Cin = x.shape
    Ho = (H + 2 * ph - kh) // sh_ + 1
    Wo = (W + 2 * pw - kw) // sw_ + 1
    xp = jnp.pad(x, ((0, 0), (ph, ph), (pw, pw), (0, 0)))
    cols = [xp[:, i:i + (Ho - 1) * sh_ + 1:sh_, j:j + (Wo - 1) * sw_ + 1:sw_, :]
            for i in range(kh) for j in range(kw)]
    return jnp.stack(cols, axis=3), Ho, Wo


# ----------------------------------------------------------------------------
# Forward pass (NCHW in / NCHW out, matching the PyTorch module)
# ----------------------------------------------------------------------------
def forward(x_nchw, prep):
    assert x_nchw.shape[0] == B
    x = jnp.transpose(x_nchw, (0, 2, 3, 1)).astype(jnp.float32)          # NHWC
    patches, ho, wo = _extract_patches(x, 7, 7, 2, 2, 3, 3)              # (B,8,8,49,3)
    p1 = patches.reshape(B * ho * wo, 7 * 7 * x.shape[-1])
    p1 = jnp.pad(p1, ((0, 0), (0, K1 - p1.shape[1]))).astype(jnp.bfloat16)

    # Whole network in ONE pallas_call (no grid: batch is merged into the rows,
    # which is the preferred mapping for single-TC v5e/v6e).
    # TODO(synk): on v7x a core-parallel batch split (pl.core_map over the 2 TCs)
    # could halve latency for B>=2; not done here to keep the kernel portable.
    out = pl.pallas_call(
        _fused_net_kernel,
        out_shape=jax.ShapeDtypeStruct((ROUT, C), jnp.float32),
        scratch_shapes=[pltpu.VMEM((512, C), jnp.bfloat16)],
    )(p1, prep["w1"], prep["p_max"], prep["w2"], prep["p_c2"], prep["wt"],
      prep["p_ct"], prep["w3"], prep["p_c3"], prep["w4"], prep["p_c4"],
      prep["w5"], prep["p_c5"], prep["aff"])

    y = out[:, :32].reshape(B, 4, 4, 32)       # rows = (b, h, w); drop lane padding
    return jnp.transpose(y, (0, 3, 1, 2))      # -> NCHW


# ----------------------------------------------------------------------------
if __name__ == "__main__":
    key = jax.random.PRNGKey(0)
    kx, kp = jax.random.split(key)
    bottleneck_channel = 16

    # Input: NCHW with 3 channels (the first conv requires Cin=3), 16x16 spatial.
    x = jax.random.normal(kx, (B, 3, 16, 16), jnp.float32)
    params = init_params(kp, bottleneck_channel)
    prep = prepare(params)

    out = jax.jit(forward)(x, prep)
    out = jax.block_until_ready(out)

    # 16 -> conv s2 -> 8 -> maxpool s2 -> 4 -> conv s2 p1 -> 3 -> convT s2 -> 8
    # -> 7 -> 6 -> 5 -> avgpool -> 4 ; final channels = 32.
    assert out.shape == (B, 32, 4, 4), out.shape
    assert bool(jnp.all(jnp.isfinite(out)))
    print("KERNEL_OK")
</pallas_src>

<mosaic_0001>
module attributes {stable_mosaic.version = 11 : i64} {
  func.func @_fused_net_kernel(%arg0: memref<128x256xbf16, #tpu.memory_space<vmem>>, %arg1: memref<256x128xbf16, #tpu.memory_space<vmem>>, %arg2: memref<288x128xbf16, #tpu.memory_space<vmem>>, %arg3: memref<128x512xbf16, #tpu.memory_space<vmem>>, %arg4: memref<32x128xbf16, #tpu.memory_space<vmem>>, %arg5: memref<128x2048xbf16, #tpu.memory_space<vmem>>, %arg6: memref<128x512xbf16, #tpu.memory_space<vmem>>, %arg7: memref<128x512xbf16, #tpu.memory_space<vmem>>, %arg8: memref<128x512xbf16, #tpu.memory_space<vmem>>, %arg9: memref<128x512xbf16, #tpu.memory_space<vmem>>, %arg10: memref<96x512xbf16, #tpu.memory_space<vmem>>, %arg11: memref<128x512xbf16, #tpu.memory_space<vmem>>, %arg12: memref<32x384xbf16, #tpu.memory_space<vmem>>, %arg13: memref<8x128xf32, #tpu.memory_space<vmem>>, %arg14: memref<32x128xf32, #tpu.memory_space<vmem>>, %arg15: memref<512x128xbf16, #tpu.memory_space<vmem>>) attributes {dimension_semantics = [], scalar_prefetch = 0 : i64, scratch_operands = 1 : i64, tpu.core_type = #tpu.core_type<tc>} {
    %c0 = arith.constant 0 : index
    %c0_0 = arith.constant 0 : index
    %0 = vector.load %arg13[%c0, %c0_0] : memref<8x128xf32, #tpu.memory_space<vmem>>, vector<8x128xf32>
    %c0_1 = arith.constant 0 : index
    %c0_2 = arith.constant 0 : index
    %1 = vector.load %arg0[%c0_1, %c0_2] : memref<128x256xbf16, #tpu.memory_space<vmem>>, vector<128x256xbf16>
    %c0_3 = arith.constant 0 : index
    %c0_4 = arith.constant 0 : index
    %2 = vector.load %arg1[%c0_3, %c0_4] : memref<256x128xbf16, #tpu.memory_space<vmem>>, vector<256x128xbf16>
    %cst = arith.constant dense<0.000000e+00> : vector<128x128xf32>
    %3 = tpu.matmul %1, %2, %cst {dimension_numbers = #tpu.dot_dimension_numbers<[1], [0], [0], [1], [0, 0, 1, 1], [], []>} : vector<128x256xbf16>, vector<256x128xbf16>, vector<128x128xf32> -> vector<128x128xf32>
    %4 = vector.extract_strided_slice %0 {offsets = [0, 0], sizes = [1, 128], strides = [1, 1]} : vector<8x128xf32> to vector<1x128xf32>
    %5 = vector.broadcast %4 : vector<1x128xf32> to vector<128x128xf32>
    %6 = arith.addf %3, %5 : vector<128x128xf32>
    %cst_5 = arith.constant 0.000000e+00 : f32
    %7 = vector.broadcast %cst_5 : f32 to vector<128x128xf32>
    %8 = arith.maximumf %6, %7 : vector<128x128xf32>
    %9 = arith.truncf %8 : vector<128x128xf32> to vector<128x128xbf16>
    %c0_6 = arith.constant 0 : index
    %c0_7 = arith.constant 0 : index
    %10 = vector.load %arg2[%c0_6, %c0_7] : memref<288x128xbf16, #tpu.memory_space<vmem>>, vector<288x128xbf16>
    %cst_8 = arith.constant dense<0.000000e+00> : vector<288x128xf32>
    %11 = tpu.matmul %10, %9, %cst_8 {dimension_numbers = #tpu.dot_dimension_numbers<[1], [0], [0], [1], [0, 0, 1, 1], [], []>} : vector<288x128xbf16>, vector<128x128xbf16>, vector<288x128xf32> -> vector<288x128xf32>
    %12 = vector.extract_strided_slice %11 {offsets = [0, 0], sizes = [32, 128], strides = [1, 1]} : vector<288x128xf32> to vector<32x128xf32>
    %13 = vector.extract_strided_slice %11 {offsets = [32, 0], sizes = [32, 128], strides = [1, 1]} : vector<288x128xf32> to vector<32x128xf32>
    %14 = vector.extract_strided_slice %11 {offsets = [64, 0], sizes = [32, 128], strides = [1, 1]} : vector<288x128xf32> to vector<32x128xf32>
    %15 = vector.extract_strided_slice %11 {offsets = [96, 0], sizes = [32, 128], strides = [1, 1]} : vector<288x128xf32> to vector<32x128xf32>
    %16 = vector.extract_strided_slice %11 {offsets = [128, 0], sizes = [32, 128], strides = [1, 1]} : vector<288x128xf32> to vector<32x128xf32>
    %17 = vector.extract_strided_slice %11 {offsets = [160, 0], sizes = [32, 128], strides = [1, 1]} : vector<288x128xf32> to vector<32x128xf32>
    %18 = vector.extract_strided_slice %11 {offsets = [192, 0], sizes = [32, 128], strides = [1, 1]} : vector<288x128xf32> to vector<32x128xf32>
    %19 = vector.extract_strided_slice %11 {offsets = [224, 0], sizes = [32, 128], strides = [1, 1]} : vector<288x128xf32> to vector<32x128xf32>
    %20 = vector.extract_strided_slice %11 {offsets = [256, 0], sizes = [32, 128], strides = [1, 1]} : vector<288x128xf32> to vector<32x128xf32>
    %21 = arith.maximumf %12, %13 : vector<32x128xf32>
    %22 = arith.maximumf %14, %15 : vector<32x128xf32>
    %23 = arith.maximumf %16, %17 : vector<32x128xf32>
    %24 = arith.maximumf %18, %19 : vector<32x128xf32>
    %25 = arith.maximumf %21, %22 : vector<32x128xf32>
    %26 = arith.maximumf %23, %24 : vector<32x128xf32>
    %27 = arith.maximumf %25, %26 : vector<32x128xf32>
    %28 = arith.maximumf %27, %20 : vector<32x128xf32>
    %29 = vector.extract_strided_slice %0 {offsets = [6, 0], sizes = [1, 128], strides = [1, 1]} : vector<8x128xf32> to vector<1x128xf32>
    %30 = vector.broadcast %29 : vector<1x128xf32> to vector<32x128xf32>
    %31 = arith.mulf %28, %30 : vector<32x128xf32>
    %32 = vector.extract_strided_slice %0 {offsets = [1, 0], sizes = [1, 128], strides = [1, 1]} : vector<8x128xf32> to vector<1x128xf32>
    %33 = vector.broadcast %32 : vector<1x128xf32> to vector<32x128xf32>
    %34 = arith.addf %31, %33 : vector<32x128xf32>
    %cst_9 = arith.constant 0.000000e+00 : f32
    %35 = vector.broadcast %cst_9 : f32 to vector<32x128xf32>
    %36 = arith.maximumf %34, %35 : vector<32x128xf32>
    %37 = arith.truncf %36 : vector<32x128xf32> to vector<32x128xbf16>
    %c0_10 = arith.constant 0 : index
    %c0_11 = arith.constant 0 : index
    %38 = vector.load %arg3[%c0_10, %c0_11] : memref<128x512xbf16, #tpu.memory_space<vmem>>, vector<128x512xbf16>
    %cst_12 = arith.constant dense<0.000000e+00> : vector<32x512xf32>
    %39 = tpu.matmul %37, %38, %cst_12 {dimension_numbers = #tpu.dot_dimension_numbers<[1], [0], [0], [1], [0, 0, 1, 1], [], []>} : vector<32x128xbf16>, vector<128x512xbf16>, vector<32x512xf32> -> vector<32x512xf32>
    %40 = vector.extract_strided_slice %39 {offsets = [0, 0], sizes = [32, 128], strides = [1, 1]} : vector<32x512xf32> to vector<32x128xf32>
    %41 = arith.truncf %40 : vector<32x128xf32> to vector<32x128xbf16>
    %c0_13 = arith.constant 0 : index
    %c0_14 = arith.constant 0 : index
    %42 = vector.load %arg15[%c0_13, %c0_14] : memref<512x128xbf16, #tpu.memory_space<vmem>>, vector<32x128xbf16>
    tpu.vector_store %arg15[%c0_13, %c0_14], %41 {strides = array<i32>} : memref<512x128xbf16, #tpu.memory_space<vmem>>, vector<32x128xbf16>,
    %43 = vector.extract_strided_slice %39 {offsets = [0, 128], sizes = [32, 128], strides = [1, 1]} : vector<32x512xf32> to vector<32x128xf32>
    %44 = arith.truncf %43 : vector<32x128xf32> to vector<32x128xbf16>
    %c32 = arith.constant 32 : index
    %c0_15 = arith.constant 0 : index
    %45 = vector.load %arg15[%c32, %c0_15] : memref<512x128xbf16, #tpu.memory_space<vmem>>, vector<32x128xbf16>
    tpu.vector_store %arg15[%c32, %c0_15], %44 {strides = array<i32>} : memref<512x128xbf16, #tpu.memory_space<vmem>>, vector<32x128xbf16>,
    %46 = vector.extract_strided_slice %39 {offsets = [0, 256], sizes = [32, 128], strides = [1, 1]} : vector<32x512xf32> to vector<32x128xf32>
    %47 = arith.truncf %46 : vector<32x128xf32> to vector<32x128xbf16>
    %c64 = arith.constant 64 : index
    %c0_16 = arith.constant 0 : index
    %48 = vector.load %arg15[%c64, %c0_16] : memref<512x128xbf16, #tpu.memory_space<vmem>>, vector<32x128xbf16>
    tpu.vector_store %arg15[%c64, %c0_16], %47 {strides = array<i32>} : memref<512x128xbf16, #tpu.memory_space<vmem>>, vector<32x128xbf16>,
    %49 = vector.extract_strided_slice %39 {offsets = [0, 384], sizes = [32, 128], strides = [1, 1]} : vector<32x512xf32> to vector<32x128xf32>
    %50 = arith.truncf %49 : vector<32x128xf32> to vector<32x128xbf16>
    %c96 = arith.constant 96 : index
    %c0_17 = arith.constant 0 : index
    %51 = vector.load %arg15[%c96, %c0_17] : memref<512x128xbf16, #tpu.memory_space<vmem>>, vector<32x128xbf16>
    tpu.vector_store %arg15[%c96, %c0_17], %50 {strides = array<i32>} : memref<512x128xbf16, #tpu.memory_space<vmem>>, vector<32x128xbf16>,
    %c0_18 = arith.constant 0 : index
    %c0_19 = arith.constant 0 : index
    %52 = vector.load %arg4[%c0_18, %c0_19] : memref<32x128xbf16, #tpu.memory_space<vmem>>, vector<32x128xbf16>
    %c0_20 = arith.constant 0 : index
    %c0_21 = arith.constant 0 : index
    %53 = vector.load %arg15[%c0_20, %c0_21] : memref<512x128xbf16, #tpu.memory_space<vmem>>, vector<128x128xbf16>
    %cst_22 = arith.constant dense<0.000000e+00> : vector<32x128xf32>
    %54 = tpu.matmul %52, %53, %cst_22 {dimension_numbers = #tpu.dot_dimension_numbers<[1], [0], [0], [1], [0, 0, 1, 1], [], []>} : vector<32x128xbf16>, vector<128x128xbf16>, vector<32x128xf32> -> vector<32x128xf32>
    %55 = vector.extract_strided_slice %0 {offsets = [2, 0], sizes = [1, 128], strides = [1, 1]} : vector<8x128xf32> to vector<1x128xf32>
    %56 = vector.broadcast %55 : vector<1x128xf32> to vector<32x128xf32>
    %57 = arith.addf %54, %56 : vector<32x128xf32>
    %cst_23 = arith.constant 0.000000e+00 : f32
    %58 = vector.broadcast %cst_23 : f32 to vector<32x128xf32>
    %59 = arith.maximumf %57, %58 : vector<32x128xf32>
    %60 = arith.truncf %59 : vector<32x128xf32> to vector<32x128xbf16>
    %c0_24 = arith.constant 0 : index
    %c0_25 = arith.constant 0 : index
    %61 = vector.load %arg5[%c0_24, %c0_25] : memref<128x2048xbf16, #tpu.memory_space<vmem>>, vector<128x512xbf16>
    %cst_26 = arith.constant dense<0.000000e+00> : vector<32x512xf32>
    %62 = tpu.matmul %60, %61, %cst_26 {dimension_numbers = #tpu.dot_dimension_numbers<[1], [0], [0], [1], [0, 0, 1, 1], [], []>} : vector<32x128xbf16>, vector<128x512xbf16>, vector<32x512xf32> -> vector<32x512xf32>
    %63 = vector.extract_strided_slice %62 {offsets = [0, 0], sizes = [32, 128], strides = [1, 1]} : vector<32x512xf32> to vector<32x128xf32>
    %64 = arith.truncf %63 : vector<32x128xf32> to vector<32x128xbf16>
    %c0_27 = arith.constant 0 : index
    %c0_28 = arith.constant 0 : index
    %65 = vector.load %arg15[%c0_27, %c0_28] : memref<512x128xbf16, #tpu.memory_space<vmem>>, vector<32x128xbf16>
    tpu.vector_store %arg15[%c0_27, %c0_28], %64 {strides = array<i32>} : memref<512x128xbf16, #tpu.memory_space<vmem>>, vector<32x128xbf16>,
    %66 = vector.extract_strided_slice %62 {offsets = [0, 128], sizes = [32, 128], strides = [1, 1]} : vector<32x512xf32> to vector<32x128xf32>
    %67 = arith.truncf %66 : vector<32x128xf32> to vector<32x128xbf16>
    %c32_29 = arith.constant 32 : index
    %c0_30 = arith.constant 0 : index
    %68 = vector.load %arg15[%c32_29, %c0_30] : memref<512x128xbf16, #tpu.memory_space<vmem>>, vector<32x128xbf16>
    tpu.vector_store %arg15[%c32_29, %c0_30], %67 {strides = array<i32>} : memref<512x128xbf16, #tpu.memory_space<vmem>>, vector<32x128xbf16>,
    %69 = vector.extract_strided_slice %62 {offsets = [0, 256], sizes = [32, 128], strides = [1, 1]} : vector<32x512xf32> to vector<32x128xf32>
    %70 = arith.truncf %69 : vector<32x128xf32> to vector<32x128xbf16>
    %c64_31 = arith.constant 64 : index
    %c0_32 = arith.constant 0 : index
    %71 = vector.load %arg15[%c64_31, %c0_32] : memref<512x128xbf16, #tpu.memory_space<vmem>>, vector<32x128xbf16>
    tpu.vector_store %arg15[%c64_31, %c0_32], %70 {strides = array<i32>} : memref<512x128xbf16, #tpu.memory_space<vmem>>, vector<32x128xbf16>,
    %72 = vector.extract_strided_slice %62 {offsets = [0, 384], sizes = [32, 128], strides = [1, 1]} : vector<32x512xf32> to vector<32x128xf32>
    %73 = arith.truncf %72 : vector<32x128xf32> to vector<32x128xbf16>
    %c96_33 = arith.constant 96 : index
    %c0_34 = arith.constant 0 : index
    %74 = vector.load %arg15[%c96_33, %c0_34] : memref<512x128xbf16, #tpu.memory_space<vmem>>, vector<32x128xbf16>
    tpu.vector_store %arg15[%c96_33, %c0_34], %73 {strides = array<i32>} : memref<512x128xbf16, #tpu.memory_space<vmem>>, vector<32x128xbf16>,
    %c0_35 = arith.constant 0 : index
    %c512 = arith.constant 512 : index
    %75 = vector.load %arg5[%c0_35, %c512] : memref<128x2048xbf16, #tpu.memory_space<vmem>>, vector<128x512xbf16>
    %cst_36 = arith.constant dense<0.000000e+00> : vector<32x512xf32>
    %76 = tpu.matmul %60, %75, %cst_36 {dimension_numbers = #tpu.dot_dimension_numbers<[1], [0], [0], [1], [0, 0, 1, 1], [], []>} : vector<32x128xbf16>, vector<128x512xbf16>, vector<32x512xf32> -> vector<32x512xf32>
    %77 = vector.extract_strided_slice %76 {offsets = [0, 0], sizes = [32, 128], strides = [1, 1]} : vector<32x512xf32> to vector<32x128xf32>
    %78 = arith.truncf %77 : vector<32x128xf32> to vector<32x128xbf16>
    %c128 = arith.constant 128 : index
    %c0_37 = arith.constant 0 : index
    %79 = vector.load %arg15[%c128, %c0_37] : memref<512x128xbf16, #tpu.memory_space<vmem>>, vector<32x128xbf16>
    tpu.vector_store %arg15[%c128, %c0_37], %78 {strides = array<i32>} : memref<512x128xbf16, #tpu.memory_space<vmem>>, vector<32x128xbf16>,
    %80 = vector.extract_strided_slice %76 {offsets = [0, 128], sizes = [32, 128], strides = [1, 1]} : vector<32x512xf32> to vector<32x128xf32>
    %81 = arith.truncf %80 : vector<32x128xf32> to vector<32x128xbf16>
    %c160 = arith.constant 160 : index
    %c0_38 = arith.constant 0 : index
    %82 = vector.load %arg15[%c160, %c0_38] : memref<512x128xbf16, #tpu.memory_space<vmem>>, vector<32x128xbf16>
    tpu.vector_store %arg15[%c160, %c0_38], %81 {strides = array<i32>} : memref<512x128xbf16, #tpu.memory_space<vmem>>, vector<32x128xbf16>,
    %83 = vector.extract_strided_slice %76 {offsets = [0, 256], sizes = [32, 128], strides = [1, 1]} : vector<32x512xf32> to vector<32x128xf32>
    %84 = arith.truncf %83 : vector<32x128xf32> to vector<32x128xbf16>
    %c192 = arith.constant 192 : index
    %c0_39 = arith.constant 0 : index
    %85 = vector.load %arg15[%c192, %c0_39] : memref<512x128xbf16, #tpu.memory_space<vmem>>, vector<32x128xbf16>
    tpu.vector_store %arg15[%c192, %c0_39], %84 {strides = array<i32>} : memref<512x128xbf16, #tpu.memory_space<vmem>>, vector<32x128xbf16>,
    %86 = vector.extract_strided_slice %76 {offsets = [0, 384], sizes = [32, 128], strides = [1, 1]} : vector<32x512xf32> to vector<32x128xf32>
    %87 = arith.truncf %86 : vector<32x128xf32> to vector<32x128xbf16>
    %c224 = arith.constant 224 : index
    %c0_40 = arith.constant 0 : index
    %88 = vector.load %arg15[%c224, %c0_40] : memref<512x128xbf16, #tpu.memory_space<vmem>>, vector<32x128xbf16>
    tpu.vector_store %arg15[%c224, %c0_40], %87 {strides = array<i32>} : memref<512x128xbf16, #tpu.memory_space<vmem>>, vector<32x128xbf16>,
    %c0_41 = arith.constant 0 : index
    %c1024 = arith.constant 1024 : index
    %89 = vector.load %arg5[%c0_41, %c1024] : memref<128x2048xbf16, #tpu.memory_space<vmem>>, vector<128x512xbf16>
    %cst_42 = arith.constant dense<0.000000e+00> : vector<32x512xf32>
    %90 = tpu.matmul %60, %89, %cst_42 {dimension_numbers = #tpu.dot_dimension_numbers<[1], [0], [0], [1], [0, 0, 1, 1], [], []>} : vector<32x128xbf16>, vector<128x512xbf16>, vector<32x512xf32> -> vector<32x512xf32>
    %91 = vector.extract_strided_slice %90 {offsets = [0, 0], sizes = [32, 128], strides = [1, 1]} : vector<32x512xf32> to vector<32x128xf32>
    %92 = arith.truncf %91 : vector<32x128xf32> to vector<32x128xbf16>
    %c256 = arith.constant 256 : index
    %c0_43 = arith.constant 0 : index
    %93 = vector.load %arg15[%c256, %c0_43] : memref<512x128xbf16, #tpu.memory_space<vmem>>, vector<32x128xbf16>
    tpu.vector_store %arg15[%c256, %c0_43], %92 {strides = array<i32>} : memref<512x128xbf16, #tpu.memory_space<vmem>>, vector<32x128xbf16>,
    %94 = vector.extract_strided_slice %90 {offsets = [0, 128], sizes = [32, 128], strides = [1, 1]} : vector<32x512xf32> to vector<32x128xf32>
    %95 = arith.truncf %94 : vector<32x128xf32> to vector<32x128xbf16>
    %c288 = arith.constant 288 : index
    %c0_44 = arith.constant 0 : index
    %96 = vector.load %arg15[%c288, %c0_44] : memref<512x128xbf16, #tpu.memory_space<vmem>>, vector<32x128xbf16>
    tpu.vector_store %arg15[%c288, %c0_44], %95 {strides = array<i32>} : memref<512x128xbf16, #tpu.memory_space<vmem>>, vector<32x128xbf16>,
    %97 = vector.extract_strided_slice %90 {offsets = [0, 256], sizes = [32, 128], strides = [1, 1]} : vector<32x512xf32> to vector<32x128xf32>
    %98 = arith.truncf %97 : vector<32x128xf32> to vector<32x128xbf16>
    %c320 = arith.constant 320 : index
    %c0_45 = arith.constant 0 : index
    %99 = vector.load %arg15[%c320, %c0_45] : memref<512x128xbf16, #tpu.memory_space<vmem>>, vector<32x128xbf16>
    tpu.vector_store %arg15[%c320, %c0_45], %98 {strides = array<i32>} : memref<512x128xbf16, #tpu.memory_space<vmem>>, vector<32x128xbf16>,
    %100 = vector.extract_strided_slice %90 {offsets = [0, 384], sizes = [32, 128], strides = [1, 1]} : vector<32x512xf32> to vector<32x128xf32>
    %101 = arith.truncf %100 : vector<32x128xf32> to vector<32x128xbf16>
    %c352 = arith.constant 352 : index
    %c0_46 = arith.constant 0 : index
    %102 = vector.load %arg15[%c352, %c0_46] : memref<512x128xbf16, #tpu.memory_space<vmem>>, vector<32x128xbf16>
    tpu.vector_store %arg15[%c352, %c0_46], %101 {strides = array<i32>} : memref<512x128xbf16, #tpu.memory_space<vmem>>, vector<32x128xbf16>,
    %c0_47 = arith.constant 0 : index
    %c1536 = arith.constant 1536 : index
    %103 = vector.load %arg5[%c0_47, %c1536] : memref<128x2048xbf16, #tpu.memory_space<vmem>>, vector<128x512xbf16>
    %cst_48 = arith.constant dense<0.000000e+00> : vector<32x512xf32>
    %104 = tpu.matmul %60, %103, %cst_48 {dimension_numbers = #tpu.dot_dimension_numbers<[1], [0], [0], [1], [0, 0, 1, 1], [], []>} : vector<32x128xbf16>, vector<128x512xbf16>, vector<32x512xf32> -> vector<32x512xf32>
    %105 = vector.extract_strided_slice %104 {offsets = [0, 0], sizes = [32, 128], strides = [1, 1]} : vector<32x512xf32> to vector<32x128xf32>
    %106 = arith.truncf %105 : vector<32x128xf32> to vector<32x128xbf16>
    %c384 = arith.constant 384 : index
    %c0_49 = arith.constant 0 : index
    %107 = vector.load %arg15[%c384, %c0_49] : memref<512x128xbf16, #tpu.memory_space<vmem>>, vector<32x128xbf16>
    tpu.vector_store %arg15[%c384, %c0_49], %106 {strides = array<i32>} : memref<512x128xbf16, #tpu.memory_space<vmem>>, vector<32x128xbf16>,
    %108 = vector.extract_strided_slice %104 {offsets = [0, 128], sizes = [32, 128], strides = [1, 1]} : vector<32x512xf32> to vector<32x128xf32>
    %109 = arith.truncf %108 : vector<32x128xf32> to vector<32x128xbf16>
    %c416 = arith.constant 416 : index
    %c0_50 = arith.constant 0 : index
    %110 = vector.load %arg15[%c416, %c0_50] : memref<512x128xbf16, #tpu.memory_space<vmem>>, vector<32x128xbf16>
    tpu.vector_store %arg15[%c416, %c0_50], %109 {strides = array<i32>} : memref<512x128xbf16, #tpu.memory_space<vmem>>, vector<32x128xbf16>,
    %111 = vector.extract_strided_slice %104 {offsets = [0, 256], sizes = [32, 128], strides = [1, 1]} : vector<32x512xf32> to vector<32x128xf32>
    %112 = arith.truncf %111 : vector<32x128xf32> to vector<32x128xbf16>
    %c448 = arith.constant 448 : index
    %c0_51 = arith.constant 0 : index
    %113 = vector.load %arg15[%c448, %c0_51] : memref<512x128xbf16, #tpu.memory_space<vmem>>, vector<32x128xbf16>
    tpu.vector_store %arg15[%c448, %c0_51], %112 {strides = array<i32>} : memref<512x128xbf16, #tpu.memory_space<vmem>>, vector<32x128xbf16>,
    %114 = vector.extract_strided_slice %104 {offsets = [0, 384], sizes = [32, 128], strides = [1, 1]} : vector<32x512xf32> to vector<32x128xf32>
    %115 = arith.truncf %114 : vector<32x128xf32> to vector<32x128xbf16>
    %c480 = arith.constant 480 : index
    %c0_52 = arith.constant 0 : index
    %116 = vector.load %arg15[%c480, %c0_52] : memref<512x128xbf16, #tpu.memory_space<vmem>>, vector<32x128xbf16>
    tpu.vector_store %arg15[%c480, %c0_52], %115 {strides = array<i32>} : memref<512x128xbf16, #tpu.memory_space<vmem>>, vector<32x128xbf16>,
    %c0_53 = arith.constant 0 : index
    %c0_54 = arith.constant 0 : index
    %117 = vector.load %arg6[%c0_53, %c0_54] : memref<128x512xbf16, #tpu.memory_space<vmem>>, vector<128x512xbf16>
    %c0_55 = arith.constant 0 : index
    %c0_56 = arith.constant 0 : index
    %118 = vector.load %arg15[%c0_55, %c0_56] : memref<512x128xbf16, #tpu.memory_space<vmem>>, vector<512x128xbf16>
    %cst_57 = arith.constant dense<0.000000e+00> : vector<128x128xf32>
    %119 = tpu.matmul %117, %118, %cst_57 {dimension_numbers = #tpu.dot_dimension_numbers<[1], [0], [0], [1], [0, 0, 1, 1], [], []>} : vector<128x512xbf16>, vector<512x128xbf16>, vector<128x128xf32> -> vector<128x128xf32>
    %120 = vector.extract_strided_slice %0 {offsets = [3, 0], sizes = [1, 128], strides = [1, 1]} : vector<8x128xf32> to vector<1x128xf32>
    %121 = vector.broadcast %120 : vector<1x128xf32> to vector<128x128xf32>
    %122 = arith.addf %119, %121 : vector<128x128xf32>
    %cst_58 = arith.constant 0.000000e+00 : f32
    %123 = vector.broadcast %cst_58 : f32 to vector<128x128xf32>
    %124 = arith.maximumf %122, %123 : vector<128x128xf32>
    %125 = arith.truncf %124 : vector<128x128xf32> to vector<128x128xbf16>
    %c0_59 = arith.constant 0 : index
    %c0_60 = arith.constant 0 : index
    %126 = vector.load %arg7[%c0_59, %c0_60] : memref<128x512xbf16, #tpu.memory_space<vmem>>, vector<128x256xbf16>
    %cst_61 = arith.constant dense<0.000000e+00> : vector<128x256xf32>
    %127 = tpu.matmul %125, %126, %cst_61 {dimension_numbers = #tpu.dot_dimension_numbers<[1], [0], [0], [1], [0, 0, 1, 1], [], []>} : vector<128x128xbf16>, vector<128x256xbf16>, vector<128x256xf32> -> vector<128x256xf32>
    %128 = vector.extract_strided_slice %127 {offsets = [0, 0], sizes = [128, 128], strides = [1, 1]} : vector<128x256xf32> to vector<128x128xf32>
    %129 = arith.truncf %128 : vector<128x128xf32> to vector<128x128xbf16>
    %c0_62 = arith.constant 0 : index
    %c0_63 = arith.constant 0 : index
    %130 = vector.load %arg15[%c0_62, %c0_63] : memref<512x128xbf16, #tpu.memory_space<vmem>>, vector<128x128xbf16>
    tpu.vector_store %arg15[%c0_62, %c0_63], %129 {strides = array<i32>} : memref<512x128xbf16, #tpu.memory_space<vmem>>, vector<128x128xbf16>,
    %131 = vector.extract_strided_slice %127 {offsets = [0, 128], sizes = [128, 128], strides = [1, 1]} : vector<128x256xf32> to vector<128x128xf32>
    %132 = arith.truncf %131 : vector<128x128xf32> to vector<128x128xbf16>
    %c128_64 = arith.constant 128 : index
    %c0_65 = arith.constant 0 : index
    %133 = vector.load %arg15[%c128_64, %c0_65] : memref<512x128xbf16, #tpu.memory_space<vmem>>, vector<128x128xbf16>
    tpu.vector_store %arg15[%c128_64, %c0_65], %132 {strides = array<i32>} : memref<512x128xbf16, #tpu.memory_space<vmem>>, vector<128x128xbf16>,
    %c0_66 = arith.constant 0 : index
    %c256_67 = arith.constant 256 : index
    %134 = vector.load %arg7[%c0_66, %c256_67] : memref<128x512xbf16, #tpu.memory_space<vmem>>, vector<128x256xbf16>
    %cst_68 = arith.constant dense<0.000000e+00> : vector<128x256xf32>
    %135 = tpu.matmul %125, %134, %cst_68 {dimension_numbers = #tpu.dot_dimension_numbers<[1], [0], [0], [1], [0, 0, 1, 1], [], []>} : vector<128x128xbf16>, vector<128x256xbf16>, vector<128x256xf32> -> vector<128x256xf32>
    %136 = vector.extract_strided_slice %135 {offsets = [0, 0], sizes = [128, 128], strides = [1, 1]} : vector<128x256xf32> to vector<128x128xf32>
    %137 = arith.truncf %136 : vector<128x128xf32> to vector<128x128xbf16>
    %c256_69 = arith.constant 256 : index
    %c0_70 = arith.constant 0 : index
    %138 = vector.load %arg15[%c256_69, %c0_70] : memref<512x128xbf16, #tpu.memory_space<vmem>>, vector<128x128xbf16>
    tpu.vector_store %arg15[%c256_69, %c0_70], %137 {strides = array<i32>} : memref<512x128xbf16, #tpu.memory_space<vmem>>, vector<128x128xbf16>,
    %139 = vector.extract_strided_slice %135 {offsets = [0, 128], sizes = [128, 128], strides = [1, 1]} : vector<128x256xf32> to vector<128x128xf32>
    %140 = arith.truncf %139 : vector<128x128xf32> to vector<128x128xbf16>
    %c384_71 = arith.constant 384 : index
    %c0_72 = arith.constant 0 : index
    %141 = vector.load %arg15[%c384_71, %c0_72] : memref<512x128xbf16, #tpu.memory_space<vmem>>, vector<128x128xbf16>
    tpu.vector_store %arg15[%c384_71, %c0_72], %140 {strides = array<i32>} : memref<512x128xbf16, #tpu.memory_space<vmem>>, vector<128x128xbf16>,
    %c0_73 = arith.constant 0 : index
    %c0_74 = arith.constant 0 : index
    %142 = vector.load %arg8[%c0_73, %c0_74] : memref<128x512xbf16, #tpu.memory_space<vmem>>, vector<128x512xbf16>
    %c0_75 = arith.constant 0 : index
    %c0_76 = arith.constant 0 : index
    %143 = vector.load %arg15[%c0_75, %c0_76] : memref<512x128xbf16, #tpu.memory_space<vmem>>, vector<512x128xbf16>
    %cst_77 = arith.constant dense<0.000000e+00> : vector<128x128xf32>
    %144 = tpu.matmul %142, %143, %cst_77 {dimension_numbers = #tpu.dot_dimension_numbers<[1], [0], [0], [1], [0, 0, 1, 1], [], []>} : vector<128x512xbf16>, vector<512x128xbf16>, vector<128x128xf32> -> vector<128x128xf32>
    %145 = vector.extract_strided_slice %0 {offsets = [4, 0], sizes = [1, 128], strides = [1, 1]} : vector<8x128xf32> to vector<1x128xf32>
    %146 = vector.broadcast %145 : vector<1x128xf32> to vector<128x128xf32>
    %147 = arith.addf %144, %146 : vector<128x128xf32>
    %cst_78 = arith.constant 0.000000e+00 : f32
    %148 = vector.broadcast %cst_78 : f32 to vector<128x128xf32>
    %149 = arith.maximumf %147, %148 : vector<128x128xf32>
    %150 = arith.truncf %149 : vector<128x128xf32> to vector<128x128xbf16>
    %c0_79 = arith.constant 0 : index
    %c0_80 = arith.constant 0 : index
    %151 = vector.load %arg9[%c0_79, %c0_80] : memref<128x512xbf16, #tpu.memory_space<vmem>>, vector<128x256xbf16>
    %cst_81 = arith.constant dense<0.000000e+00> : vector<128x256xf32>
    %152 = tpu.matmul %150, %151, %cst_81 {dimension_numbers = #tpu.dot_dimension_numbers<[1], [0], [0], [1], [0, 0, 1, 1], [], []>} : vector<128x128xbf16>, vector<128x256xbf16>, vector<128x256xf32> -> vector<128x256xf32>
    %153 = vector.extract_strided_slice %152 {offsets = [0, 0], sizes = [128, 128], strides = [1, 1]} : vector<128x256xf32> to vector<128x128xf32>
    %154 = arith.truncf %153 : vector<128x128xf32> to vector<128x128xbf16>
    %c0_82 = arith.constant 0 : index
    %c0_83 = arith.constant 0 : index
    %155 = vector.load %arg15[%c0_82, %c0_83] : memref<512x128xbf16, #tpu.memory_space<vmem>>, vector<128x128xbf16>
    tpu.vector_store %arg15[%c0_82, %c0_83], %154 {strides = array<i32>} : memref<512x128xbf16, #tpu.memory_space<vmem>>, vector<128x128xbf16>,
    %156 = vector.extract_strided_slice %152 {offsets = [0, 128], sizes = [128, 128], strides = [1, 1]} : vector<128x256xf32> to vector<128x128xf32>
    %157 = arith.truncf %156 : vector<128x128xf32> to vector<128x128xbf16>
    %c128_84 = arith.constant 128 : index
    %c0_85 = arith.constant 0 : index
    %158 = vector.load %arg15[%c128_84, %c0_85] : memref<512x128xbf16, #tpu.memory_space<vmem>>, vector<128x128xbf16>
    tpu.vector_store %arg15[%c128_84, %c0_85], %157 {strides = array<i32>} : memref<512x128xbf16, #tpu.memory_space<vmem>>, vector<128x128xbf16>,
    %c0_86 = arith.constant 0 : index
    %c256_87 = arith.constant 256 : index
    %159 = vector.load %arg9[%c0_86, %c256_87] : memref<128x512xbf16, #tpu.memory_space<vmem>>, vector<128x256xbf16>
    %cst_88 = arith.constant dense<0.000000e+00> : vector<128x256xf32>
    %160 = tpu.matmul %150, %159, %cst_88 {dimension_numbers = #tpu.dot_dimension_numbers<[1], [0], [0], [1], [0, 0, 1, 1], [], []>} : vector<128x128xbf16>, vector<128x256xbf16>, vector<128x256xf32> -> vector<128x256xf32>
    %161 = vector.extract_strided_slice %160 {offsets = [0, 0], sizes = [128, 128], strides = [1, 1]} : vector<128x256xf32> to vector<128x128xf32>
    %162 = arith.truncf %161 : vector<128x128xf32> to vector<128x128xbf16>
    %c256_89 = arith.constant 256 : index
    %c0_90 = arith.constant 0 : index
    %163 = vector.load %arg15[%c256_89, %c0_90] : memref<512x128xbf16, #tpu.memory_space<vmem>>, vector<128x128xbf16>
    tpu.vector_store %arg15[%c256_89, %c0_90], %162 {strides = array<i32>} : memref<512x128xbf16, #tpu.memory_space<vmem>>, vector<128x128xbf16>,
    %164 = vector.extract_strided_slice %160 {offsets = [0, 128], sizes = [128, 128], strides = [1, 1]} : vector<128x256xf32> to vector<128x128xf32>
    %165 = arith.truncf %164 : vector<128x128xf32> to vector<128x128xbf16>
    %c384_91 = arith.constant 384 : index
    %c0_92 = arith.constant 0 : index
    %166 = vector.load %arg15[%c384_91, %c0_92] : memref<512x128xbf16, #tpu.memory_space<vmem>>, vector<128x128xbf16>
    tpu.vector_store %arg15[%c384_91, %c0_92], %165 {strides = array<i32>} : memref<512x128xbf16, #tpu.memory_space<vmem>>, vector<128x128xbf16>,
    %c0_93 = arith.constant 0 : index
    %c0_94 = arith.constant 0 : index
    %167 = vector.load %arg10[%c0_93, %c0_94] : memref<96x512xbf16, #tpu.memory_space<vmem>>, vector<96x512xbf16>
    %c0_95 = arith.constant 0 : index
    %c0_96 = arith.constant 0 : index
    %168 = vector.load %arg15[%c0_95, %c0_96] : memref<512x128xbf16, #tpu.memory_space<vmem>>, vector<512x128xbf16>
    %cst_97 = arith.constant dense<0.000000e+00> : vector<96x128xf32>
    %169 = tpu.matmul %167, %168, %cst_97 {dimension_numbers = #tpu.dot_dimension_numbers<[1], [0], [0], [1], [0, 0, 1, 1], [], []>} : vector<96x512xbf16>, vector<512x128xbf16>, vector<96x128xf32> -> vector<96x128xf32>
    %170 = vector.extract_strided_slice %0 {offsets = [5, 0], sizes = [1, 128], strides = [1, 1]} : vector<8x128xf32> to vector<1x128xf32>
    %171 = vector.broadcast %170 : vector<1x128xf32> to vector<96x128xf32>
    %172 = arith.addf %169, %171 : vector<96x128xf32>
    %cst_98 = arith.constant 0.000000e+00 : f32
    %173 = vector.broadcast %cst_98 : f32 to vector<96x128xf32>
    %174 = arith.maximumf %172, %173 : vector<96x128xf32>
    %175 = arith.truncf %174 : vector<96x128xf32> to vector<96x128xbf16>
    %c0_99 = arith.constant 0 : index
    %c0_100 = arith.constant 0 : index
    %176 = vector.load %arg11[%c0_99, %c0_100] : memref<128x512xbf16, #tpu.memory_space<vmem>>, vector<128x256xbf16>
    %cst_101 = arith.constant dense<0.000000e+00> : vector<96x256xf32>
    %177 = tpu.matmul %175, %176, %cst_101 {dimension_numbers = #tpu.dot_dimension_numbers<[1], [0], [0], [1], [0, 0, 1, 1], [], []>} : vector<96x128xbf16>, vector<128x256xbf16>, vector<96x256xf32> -> vector<96x256xf32>
    %178 = vector.extract_strided_slice %177 {offsets = [0, 0], sizes = [96, 128], strides = [1, 1]} : vector<96x256xf32> to vector<96x128xf32>
    %179 = arith.truncf %178 : vector<96x128xf32> to vector<96x128xbf16>
    %c0_102 = arith.constant 0 : index
    %c0_103 = arith.constant 0 : index
    %180 = vector.load %arg15[%c0_102, %c0_103] : memref<512x128xbf16, #tpu.memory_space<vmem>>, vector<96x128xbf16>
    tpu.vector_store %arg15[%c0_102, %c0_103], %179 {strides = array<i32>} : memref<512x128xbf16, #tpu.memory_space<vmem>>, vector<96x128xbf16>,
    %181 = vector.extract_strided_slice %177 {offsets = [0, 128], sizes = [96, 128], strides = [1, 1]} : vector<96x256xf32> to vector<96x128xf32>
    %182 = arith.truncf %181 : vector<96x128xf32> to vector<96x128xbf16>
    %c96_104 = arith.constant 96 : index
    %c0_105 = arith.constant 0 : index
    %183 = vector.load %arg15[%c96_104, %c0_105] : memref<512x128xbf16, #tpu.memory_space<vmem>>, vector<96x128xbf16>
    tpu.vector_store %arg15[%c96_104, %c0_105], %182 {strides = array<i32>} : memref<512x128xbf16, #tpu.memory_space<vmem>>, vector<96x128xbf16>,
    %c0_106 = arith.constant 0 : index
    %c256_107 = arith.constant 256 : index
    %184 = vector.load %arg11[%c0_106, %c256_107] : memref<128x512xbf16, #tpu.memory_space<vmem>>, vector<128x256xbf16>
    %cst_108 = arith.constant dense<0.000000e+00> : vector<96x256xf32>
    %185 = tpu.matmul %175, %184, %cst_108 {dimension_numbers = #tpu.dot_dimension_numbers<[1], [0], [0], [1], [0, 0, 1, 1], [], []>} : vector<96x128xbf16>, vector<128x256xbf16>, vector<96x256xf32> -> vector<96x256xf32>
    %186 = vector.extract_strided_slice %185 {offsets = [0, 0], sizes = [96, 128], strides = [1, 1]} : vector<96x256xf32> to vector<96x128xf32>
    %187 = arith.truncf %186 : vector<96x128xf32> to vector<96x128xbf16>
    %c192_109 = arith.constant 192 : index
    %c0_110 = arith.constant 0 : index
    %188 = vector.load %arg15[%c192_109, %c0_110] : memref<512x128xbf16, #tpu.memory_space<vmem>>, vector<96x128xbf16>
    tpu.vector_store %arg15[%c192_109, %c0_110], %187 {strides = array<i32>} : memref<512x128xbf16, #tpu.memory_space<vmem>>, vector<96x128xbf16>,
    %189 = vector.extract_strided_slice %185 {offsets = [0, 128], sizes = [96, 128], strides = [1, 1]} : vector<96x256xf32> to vector<96x128xf32>
    %190 = arith.truncf %189 : vector<96x128xf32> to vector<96x128xbf16>
    %c288_111 = arith.constant 288 : index
    %c0_112 = arith.constant 0 : index
    %191 = vector.load %arg15[%c288_111, %c0_112] : memref<512x128xbf16, #tpu.memory_space<vmem>>, vector<96x128xbf16>
    tpu.vector_store %arg15[%c288_111, %c0_112], %190 {strides = array<i32>} : memref<512x128xbf16, #tpu.memory_space<vmem>>, vector<96x128xbf16>,
    %c0_113 = arith.constant 0 : index
    %c0_114 = arith.constant 0 : index
    %192 = vector.load %arg12[%c0_113, %c0_114] : memref<32x384xbf16, #tpu.memory_space<vmem>>, vector<32x384xbf16>
    %c0_115 = arith.constant 0 : index
    %c0_116 = arith.constant 0 : index
    %193 = vector.load %arg15[%c0_115, %c0_116] : memref<512x128xbf16, #tpu.memory_space<vmem>>, vector<384x128xbf16>
    %cst_117 = arith.constant dense<0.000000e+00> : vector<32x128xf32>
    %194 = tpu.matmul %192, %193, %cst_117 {dimension_numbers = #tpu.dot_dimension_numbers<[1], [0], [0], [1], [0, 0, 1, 1], [], []>} : vector<32x384xbf16>, vector<384x128xbf16>, vector<32x128xf32> -> vector<32x128xf32>
    %c0_118 = arith.constant 0 : index
    %c0_119 = arith.constant 0 : index
    %195 = vector.load %arg14[%c0_118, %c0_119] : memref<32x128xf32, #tpu.memory_space<vmem>>, vector<32x128xf32>
    tpu.vector_store %arg14[%c0_118, %c0_119], %194 {strides = array<i32>} : memref<32x128xf32, #tpu.memory_space<vmem>>, vector<32x128xf32>,
    return
  }
}

</mosaic_0001>

<bundles_post_ra>
// kernel: forward.1
= control target key start
LH: loop header
LB: loop body
LE: loop exit
PB: predicated region body
PF: predicated region fallthrough
CT: control target
= control target key end

     0   :  { %s11620_s0 = inlined_call_operand.vmem [shape: bf16[128,256], index: 0, kind: input, shape index: {}]   ;;  %s11621_s1 = inlined_call_operand.vmem [shape: bf16[256,128], index: 1, kind: input, shape index: {}]   ;;  %s11622_s2 = inlined_call_operand.vmem [shape: bf16[288,128], index: 2, kind: input, shape index: {}]   ;;  %s11623_s3 = inlined_call_operand.vmem [shape: bf16[128,512], index: 3, kind: input, shape index: {}]   ;;  %s11624_s4 = inlined_call_operand.vmem [shape: bf16[32,128], index: 4, kind: input, shape index: {}]   ;;  %s11625_s5 = inlined_call_operand.vmem [shape: bf16[128,2048], index: 5, kind: input, shape index: {}]   ;;  %s11626_s6 = inlined_call_operand.vmem [shape: bf16[128,512], index: 6, kind: input, shape index: {}]   ;;  %s11627_s7 = inlined_call_operand.vmem [shape: bf16[128,512], index: 7, kind: input, shape index: {}]   ;;  %s11628_s8 = inlined_call_operand.vmem [shape: bf16[128,512], index: 8, kind: input, shape index: {}]   ;;  %s11629_s9 = inlined_call_operand.vmem [shape: bf16[128,512], index: 9, kind: input, shape index: {}]   ;;  %s11630_s10 = inlined_call_operand.vmem [shape: bf16[96,512], index: 10, kind: input, shape index: {}]   ;;  %s11631_s11 = inlined_call_operand.vmem [shape: bf16[128,512], index: 11, kind: input, shape index: {}]   ;;  %s11632_s12 = inlined_call_operand.vmem [shape: bf16[32,384], index: 12, kind: input, shape index: {}]   ;;  %s11633_s13 = inlined_call_operand.vmem [shape: f32[8,128], index: 13, kind: input, shape index: {}]   ;;  %s11634_s14 = inlined_call_operand.hbm [shape: f32[32,128], index: 14, kind: output, shape index: {}]  }
   0x1   :  { %v9570_v0 = vld [vmem:[%s11621_s1 + $0x78] sm:$0xff]   ;;  %v9572_v2 = vld [vmem:[%s11621_s1 + $0x70] sm:$0xff]   ;;  %v9574_v4 = vld [vmem:[%s11621_s1 + $0x68] sm:$0xff]  }
   0x2   :  { %v9571_v1 = vld [vmem:[%s11621_s1 + $0x38] sm:$0xff]   ;;  %8976 = vmatprep.subr.bf16.mxu0 %v9570_v0  ;;  %v9573_v3 = vld [vmem:[%s11621_s1 + $0x30] sm:$0xff]   ;;  %v9575_v5 = vld [vmem:[%s11621_s1 + $0x28] sm:$0xff]  }
   0x3   :  { %8977 = vmatpush3.bf16.msra.mxu0 %v9571_v1  ;;  %v9576_v6 = vld [vmem:[%s11621_s1 + $0x60] sm:$0xff]   ;;  %v9578_v8 = vld [vmem:[%s11621_s1 + $0x58] sm:$0xff]   ;;  %v9580_v10 = vld [vmem:[%s11621_s1 + $0x50] sm:$0xff]  }
   0x4   :  { %8978 = vmatprep.subr.bf16.mxu0 %v9572_v2  ;;  %v9577_v7 = vld [vmem:[%s11621_s1 + $0x20] sm:$0xff]   ;;  %v9579_v9 = vld [vmem:[%s11621_s1 + $0x18] sm:$0xff]   ;;  %v9581_v12 = vld [vmem:[%s11621_s1 + $0x10] sm:$0xff]  }
   0x5   :  { %v9588_v11 = vld [vmem:[%s11620_s0 + $0x4] ss:$8 sps:$4 sm:$0xff]   ;;  %v9586_v17 = vld [vmem:[%s11620_s0] ss:$8 sps:$4 sm:$0xff]   ;;  %v9589_v18 = vld [vmem:[%s11620_s0 + $0x14] ss:$8 sps:$4 sm:$0xff]  }
   0x6   :  { %310 = vmatprep.mubr.bf16.mxu0 %v9588_v11  ;;  %v9582_v13 = vld [vmem:[%s11621_s1 + $0x48] sm:$0xff]   ;;  %v9584_v15 = vld [vmem:[%s11621_s1 + $0x40] sm:$0xff]   ;;  %v9591_v19 = vld [vmem:[%s11620_s0 + $0x10] ss:$8 sps:$4 sm:$0xff]  }
   0x7   :  { %8979 = vmatpush3.bf16.msra.mxu0 %v9573_v3  ;;  %v9583_v14 = vld [vmem:[%s11621_s1 + $0x8] sm:$0xff]   ;;  %v9585_v16 = vld [vmem:[%s11621_s1] sm:$0xff]   ;;  %v9595_v22 = vld [vmem:[%s11620_s0 + $0x34] ss:$8 sps:$4 sm:$0xff]  }
   0x8   :  { %8980 = vmatprep.subr.bf16.mxu0 %v9574_v4  ;;  %v9592_v20 = vld [vmem:[%s11620_s0 + $0x24] ss:$8 sps:$4 sm:$0xff]   ;;  %v9594_v21 = vld [vmem:[%s11620_s0 + $0x20] ss:$8 sps:$4 sm:$0xff]   ;;  %v9597_v23 = vld [vmem:[%s11620_s0 + $0x30] ss:$8 sps:$4 sm:$0xff]  }
   0x9   :  { %v9598_v24 = vld [vmem:[%s11620_s0 + $0x44] ss:$8 sps:$4 sm:$0xff]   ;;  %v9600_v25 = vld [vmem:[%s11620_s0 + $0x40] ss:$8 sps:$4 sm:$0xff]   ;;  %v9601_v26 = vld [vmem:[%s11620_s0 + $0x54] ss:$8 sps:$4 sm:$0xff]  }
   0xa   :  { %v9603_v27 = vld [vmem:[%s11620_s0 + $0x50] ss:$8 sps:$4 sm:$0xff]   ;;  %v9604_v28 = vld [vmem:[%s11620_s0 + $0x64] ss:$8 sps:$4 sm:$0xff]   ;;  %v9606_v29 = vld [vmem:[%s11620_s0 + $0x60] ss:$8 sps:$4 sm:$0xff]  }
   0xb   :  { %8981 = vmatpush3.bf16.msra.mxu0 %v9575_v5  ;;  %v9607_v30 = vld [vmem:[%s11620_s0 + $0x74] ss:$8 sps:$4 sm:$0xff]   ;;  %v9609_v31 = vld [vmem:[%s11620_s0 + $0x70] ss:$8 sps:$4 sm:$0xff]  }
   0xc   :  { %8982 = vmatprep.subr.bf16.mxu0 %v9576_v6 }
   0xf   :  { %8983 = vmatpush3.bf16.msra.mxu0 %v9577_v7 }
  0x10   :  { %8984 = vmatprep.subr.bf16.mxu0 %v9578_v8 }
  0x13   :  { %8985 = vmatpush3.bf16.msra.mxu0 %v9579_v9 }
  0x14   :  { %8986 = vmatprep.subr.bf16.mxu0 %v9580_v10 }
  0x17   :  { %8987 = vmatpush3.bf16.msra.mxu0 %v9581_v12 }
  0x18   :  { %8988 = vmatprep.subr.bf16.mxu0 %v9582_v13 }
  0x1b   :  { %8989 = vmatpush3.bf16.msra.mxu0 %v9583_v14 }
  0x1c   :  { %8990 = vmatprep.subr.bf16.mxu0 %v9584_v15 }
  0x1f   :  { %8991 = vmatpush3.bf16.msra.mxu0 %v9585_v16 }
  0x22   :  { %311 = vmatmul.mubr.bf16.vlgmr.msra.gmra.mxu0 %v9586_v17 }
  0x23   :  { %318 = vmatprep.mubr.bf16.mxu0 %v9589_v18 }
  0x2a   :  { %319 = vmatmul.mubr.bf16.gmra.mxu0 %v9591_v19 }
  0x2b   :  { %326 = vmatprep.mubr.bf16.mxu0 %v9592_v20 }
  0x32   :  { %327 = vmatmul.mubr.bf16.gmra.mxu0 %v9594_v21 }
  0x33   :  { %334 = vmatprep.mubr.bf16.mxu0 %v9595_v22 }
  0x3a   :  { %335 = vmatmul.mubr.bf16.gmra.mxu0 %v9597_v23 }
  0x3b   :  { %342 = vmatprep.mubr.bf16.mxu0 %v9598_v24 }
  0x42   :  { %343 = vmatmul.mubr.bf16.gmra.mxu0 %v9600_v25 }
  0x43   :  { %350 = vmatprep.mubr.bf16.mxu0 %v9601_v26 }
  0x4a   :  { %351 = vmatmul.mubr.bf16.gmra.mxu0 %v9603_v27 }
  0x4b   :  { %358 = vmatprep.mubr.bf16.mxu0 %v9604_v28 }
  0x52   :  { %359 = vmatmul.mubr.bf16.gmra.mxu0 %v9606_v29 }
  0x53   :  { %366 = vmatprep.mubr.bf16.mxu0 %v9607_v30 }
  0x5a   :  { %367 = vmatmul.mubr.bf16.gmra.mxu0 %v9609_v31 }
  0x5b   :  { %19 = vsyncpa [#allocation4], 0  ;;  %v9610_v32 = vld [vmem:[%s11622_s2] sm:$0xff]   ;;  %v98_v33 = vlaneseq }
  0x5c   :  { %9490 = vmatprep.mubr.bf16.mxu1 %v9610_v32  ;;  %v10299_v37 = vld [vmem:[%s11633_s13] sm:$0xff] }
  0x5d   :  { %v10293_v34 = vshrl.u32 %v98_v33, 7 }
  0x5f   :  { %v100_v35 = vsub.s32 0, %v10293_v34 }
  0x61   :  { %v10302_v39 = vrot.slane %v10299_v37, %v100_v35 }
  0xe2   :  { %v8992_v36 = vpop.f32.mrf.mxu0 }
  0xe4   :  { %v8993_v38 = vpop.f32.mrf.mxu0 }
  0xe5   :  { %v8994_v40 = vadd.f32 %v8993_v38, %v8992_v36 }
  0xe6   :  { %v8995_v41 = vpop.f32.mrf.mxu0 }
  0xe7   :  { %v313_v43 = vadd.f32 %v8994_v40, %v10302_v39 }
  0xe8   :  { %v8996_v42 = vpop.f32.mrf.mxu0 }
  0xe9   :  { %v8997_v44 = vadd.f32 %v8996_v42, %v8995_v41  ;;  %v375_v48 = vmax.f32 %v313_v43, 0.0 }
  0xea   :  { %v8998_v45 = vpop.f32.mrf.mxu0 }
  0xeb   :  { %v316_v46 = vadd.f32 %v8997_v44, %v10302_v39 }
  0xec   :  { %v8999_v47 = vpop.f32.mrf.mxu0 }
  0xed   :  { %v376_v49 = vmax.f32 %v316_v46, 0.0  ;;  %v9000_v50 = vadd.f32 %v8999_v47, %v8998_v45 }
  0xee   :  { %v9001_v51 = vpop.f32.mrf.mxu0 }
  0xef   :  { %v10306_v52 = vpack.c.bf16 %v376_v49, %v375_v48  ;;  %v321_v54 = vadd.f32 %v9000_v50, %v10302_v39 }
  0xf0   :  { %v9002_v53 = vpop.f32.mrf.mxu0 }
  0xf1   :  { %v9003_v55 = vadd.f32 %v9002_v53, %v9001_v51  ;;  %v377_v59 = vmax.f32 %v321_v54, 0.0 }
  0xf2   :  { %v9004_v56 = vpop.f32.mrf.mxu0 }
  0xf3   :  { %v324_v57 = vadd.f32 %v9003_v55, %v10302_v39 }
  0xf4   :  { %v9005_v58 = vpop.f32.mrf.mxu0 }
  0xf5   :  { %v378_v60 = vmax.f32 %v324_v57, 0.0  ;;  %v9006_v54 = vadd.f32 %v9005_v58, %v9004_v56  ;;  %v9612_v56 = vld [vmem:[%s11622_s2 + $0x10] sm:$0xff]   ;;  %v9613_v58 = vld [vmem:[%s11622_s2 + $0x18] sm:$0xff]  }
  0xf6   :  { %v9007_v61 = vpop.f32.mrf.mxu0 }
  0xf7   :  { %v10310_v62 = vpack.c.bf16 %v378_v60, %v377_v59 }
  0xf8   :  { %v9008_v63 = vpop.f32.mrf.mxu0 }
  0xf9   :  { %v9009_v49 = vadd.f32 %v9008_v63, %v9007_v61 }
  0xfa   :  { %v9010_v0 = vpop.f32.mrf.mxu0 }
  0xfb   :  { %v332_v59 = vadd.f32 %v9009_v49, %v10302_v39  ;;  %v9675_v49 = vld [vmem:[%s11623_s3 + $0xc] ss:$16 sps:$4 sm:$0xff]  }
  0xfc   :  { %v9011_v1 = vpop.f32.mrf.mxu0 }
  0xfd   :  { %v9012_v46 = vadd.f32 %v9011_v1, %v9010_v0  ;;  %v329_v0 = vadd.f32 %v9006_v54, %v10302_v39  ;;  %v380_v61 = vmax.f32 %v332_v59, 0.0 }
  0xfe   :  { %v9013_v2 = vpop.f32.mrf.mxu0 }
  0xff   :  { %v337_v55 = vadd.f32 %v9012_v46, %v10302_v39  ;;  %v9664_v46 = vld [vmem:[%s11623_s3 + $0x20] ss:$16 sps:$4 sm:$0xff]  }
 0x100   :  { %v9014_v3 = vpop.f32.mrf.mxu0 }
 0x101   :  { %v9015_v42 = vadd.f32 %v9014_v3, %v9013_v2  ;;  %v381_v1 = vmax.f32 %v337_v55, 0.0  ;;  %v379_v3 = vmax.f32 %v329_v0, 0.0 }
 0x102   :  { %v9016_v4 = vpop.f32.mrf.mxu0 }
 0x103   :  { %v340_v50 = vadd.f32 %v9015_v42, %v10302_v39  ;;  %v9658_v42 = vld [vmem:[%s11623_s3 + $0x40] ss:$16 sps:$4 sm:$0xff]  }
 0x104   :  { %v9017_v5 = vpop.f32.mrf.mxu0 }
 0x105   :  { %v9018_v36 = vadd.f32 %v9017_v5, %v9016_v4  ;;  %v382_v60 = vmax.f32 %v340_v50, 0.0  ;;  %v393_v4 = vpack.c.bf16 %v380_v61, %v379_v3  ;;  %v9616_v5 = vld [vmem:[%s11622_s2 + $0x30] sm:$0xff]  }
 0x106   :  { %v9019_v6 = vpop.f32.mrf.mxu0  ;;  %v9670_v50 = vld [vmem:[%s11623_s3] ss:$16 sps:$4 sm:$0xff]  }
 0x107   :  { %v345_v47 = vadd.f32 %v9018_v36, %v10302_v39  ;;  %v394_v63 = vpack.c.bf16 %v382_v60, %v381_v1  ;;  %v9652_v36 = vld [vmem:[%s11623_s3 + $0x60] ss:$16 sps:$4 sm:$0xff]  }
 0x108   :  { %v9020_v7 = vpop.f32.mrf.mxu0 }
 0x109   :  { %v9021_v30 = vadd.f32 %v9020_v7, %v9019_v6  ;;  %v383_v57 = vmax.f32 %v345_v47, 0.0  ;;  %v9617_v6 = vld [vmem:[%s11622_s2 + $0x38] sm:$0xff]   ;;  %v9618_v7 = vld [vmem:[%s11622_s2 + $0x40] sm:$0xff]  }
 0x10a   :  { %v9022_v8 = vpop.f32.mrf.mxu0  ;;  %v9667_v47 = vld [vmem:[%s11623_s3 + $0x28] ss:$16 sps:$4 sm:$0xff]  }
 0x10b   :  { %v348_v43 = vadd.f32 %v9021_v30, %v10302_v39  ;;  %v9651_v30 = vld [vmem:[%s11623_s3 + $0x8c] ss:$16 sps:$4 sm:$0xff]  }
 0x10c   :  { %v9023_v9 = vpop.f32.mrf.mxu0 }
 0x10d   :  { %v9024_v27 = vadd.f32 %v9023_v9, %v9022_v8  ;;  %v384_v51 = vmax.f32 %v348_v43, 0.0  ;;  %v9619_v8 = vld [vmem:[%s11622_s2 + $0x48] sm:$0xff]   ;;  %v9620_v9 = vld [vmem:[%s11622_s2 + $0x50] sm:$0xff]  }
 0x10e   :  { %v9025_v10 = vpop.f32.mrf.mxu0  ;;  %v9661_v43 = vld [vmem:[%s11623_s3 + $0x48] ss:$16 sps:$4 sm:$0xff]  }
 0x10f   :  { %v353_v38 = vadd.f32 %v9024_v27, %v10302_v39  ;;  %v395_v2 = vpack.c.bf16 %v384_v51, %v383_v57  ;;  %v9640_v27 = vld [vmem:[%s11623_s3 + $0xa0] ss:$16 sps:$4 sm:$0xff]   ;;  %v9673_v51 = vld [vmem:[%s11623_s3 + $0x8] ss:$16 sps:$4 sm:$0xff]  }
 0x110   :  { %v9026_v11 = vpop.f32.mrf.mxu0 }
 0x111   :  { %v9027_v23 = vadd.f32 %v9026_v11, %v9025_v10  ;;  %v385_v48 = vmax.f32 %v353_v38, 0.0  ;;  %v9621_v10 = vld [vmem:[%s11622_s2 + $0x58] sm:$0xff]   ;;  %v9622_v11 = vld [vmem:[%s11622_s2 + $0x60] sm:$0xff]  }
 0x112   :  { %v9028_v12 = vpop.f32.mrf.mxu0  ;;  %v9655_v38 = vld [vmem:[%s11623_s3 + $0x68] ss:$16 sps:$4 sm:$0xff]  }
 0x113   :  { %v356_v31 = vadd.f32 %v9027_v23, %v10302_v39  ;;  %v9639_v23 = vld [vmem:[%s11623_s3 + $0xc4] ss:$16 sps:$4 sm:$0xff]  }
 0x114   :  { %v9029_v13 = vpop.f32.mrf.mxu0 }
 0x115   :  { %v9030_v21 = vadd.f32 %v9029_v13, %v9028_v12  ;;  %v386_v44 = vmax.f32 %v356_v31, 0.0  ;;  %v9623_v12 = vld [vmem:[%s11622_s2 + $0x68] sm:$0xff]   ;;  %v9624_v13 = vld [vmem:[%s11622_s2 + $0x70] sm:$0xff]  }
 0x116   :  { %v9031_v14 = vpop.f32.mrf.mxu0  ;;  %v9646_v31 = vld [vmem:[%s11623_s3 + $0x80] ss:$16 sps:$4 sm:$0xff]  }
 0x117   :  { %v361_v28 = vadd.f32 %v9030_v21, %v10302_v39  ;;  %v396_v53 = vpack.c.bf16 %v386_v44, %v385_v48  ;;  %v9634_v21 = vld [vmem:[%s11623_s3 + $0xc8] ss:$16 sps:$4 sm:$0xff]   ;;  %v9666_v44 = vld [vmem:[%s11623_s3 + $0x24] ss:$16 sps:$4 sm:$0xff]  }
 0x118   :  { %v9032_v15 = vpop.f32.mrf.mxu0  ;;  %v9672_v48 = vld [vmem:[%s11623_s3 + $0x4] ss:$16 sps:$4 sm:$0xff]  }
 0x119   :  { %v9033_v18 = vadd.f32 %v9032_v15, %v9031_v14  ;;  %v387_v40 = vmax.f32 %v361_v28, 0.0  ;;  %v9625_v14 = vld [vmem:[%s11622_s2 + $0x78] sm:$0xff]   ;;  %v9626_v15 = vld [vmem:[%s11622_s2 + $0x80] sm:$0xff]  }
 0x11a   :  { %v9034_v16 = vpop.f32.mrf.mxu0  ;;  %v9643_v28 = vld [vmem:[%s11623_s3 + $0xa8] ss:$16 sps:$4 sm:$0xff]  }
 0x11b   :  { %v364_v24 = vadd.f32 %v9033_v18, %v10302_v39  ;;  %v9630_v18 = vld [vmem:[%s11623_s3 + $0xec] ss:$16 sps:$4 sm:$0xff]  }
 0x11c   :  { %v9035_v17 = vpop.f32.mrf.mxu0 }
 0x11d   :  { %v9036_v19 = vadd.f32 %v9035_v17, %v9034_v16  ;;  %v388_v32 = vmax.f32 %v364_v24, 0.0  ;;  %v9627_v16 = vld [vmem:[%s11622_s2 + $0x88] sm:$0xff]   ;;  %v9637_v24 = vld [vmem:[%s11623_s3 + $0xc0] ss:$16 sps:$4 sm:$0xff]  }
 0x11e   :  { %v9037_v20 = vpop.f32.mrf.mxu0  ;;  %v9628_v17 = vld [vmem:[%s11623_s3 + $0xe8] ss:$16 sps:$4 sm:$0xff]  }
 0x11f   :  { %v369_v25 = vadd.f32 %v9036_v19, %v10302_v39  ;;  %v397_v45 = vpack.c.bf16 %v388_v32, %v387_v40  ;;  %v9633_v19 = vld [vmem:[%s11623_s3 + $0xe4] ss:$16 sps:$4 sm:$0xff]   ;;  %v9649_v32 = vld [vmem:[%s11623_s3 + $0x88] ss:$16 sps:$4 sm:$0xff]  }
 0x120   :  { %v9038_v22 = vpop.f32.mrf.mxu0  ;;  %966 = vmatprep.subr.bf16.mxu0 %v9633_v19  ;;  %v9660_v40 = vld [vmem:[%s11623_s3 + $0x44] ss:$16 sps:$4 sm:$0xff]   ;;  %v754_v19 = vsub.s32 6, %v10293_v34 }
 0x121   :  { %v9039_v26 = vadd.f32 %v9038_v22, %v9037_v20  ;;  %v389_v33 = vmax.f32 %v369_v25, 0.0  ;;  %v9631_v20 = vld [vmem:[%s11623_s3 + $0xe0] ss:$16 sps:$4 sm:$0xff]   ;;  %v9636_v22 = vld [vmem:[%s11623_s3 + $0xcc] ss:$16 sps:$4 sm:$0xff]  }
 0x122   :  { %967 = vmatpush1.bf16.msra.mxu0 %v9631_v20  ;;  %v9642_v25 = vld [vmem:[%s11623_s3 + $0xa4] ss:$16 sps:$4 sm:$0xff]  }
 0x123   :  { %v372_v29 = vadd.f32 %v9039_v26, %v10302_v39  ;;  %v9611_v39 = vld [vmem:[%s11622_s2 + $0x8] sm:$0xff]   ;;  %968 = vmatprep.subr.bf16.mxu0 %v9639_v23 }
 0x124   :  { %v9645_v26 = vld [vmem:[%s11623_s3 + $0xac] ss:$16 sps:$4 sm:$0xff]  }
 0x125   :  { %v390_v35 = vmax.f32 %v372_v29, 0.0  ;;  %v9648_v29 = vld [vmem:[%s11623_s3 + $0x84] ss:$16 sps:$4 sm:$0xff]  }
 0x126   :  { %969 = vmatpush1.bf16.msra.mxu0 %v9637_v24 }
 0x127   :  { %v398_v41 = vpack.c.bf16 %v390_v35, %v389_v33  ;;  %970 = vmatprep.subr.bf16.mxu0 %v9642_v25  ;;  %v9654_v33 = vld [vmem:[%s11623_s3 + $0x64] ss:$16 sps:$4 sm:$0xff]   ;;  %v9657_v35 = vld [vmem:[%s11623_s3 + $0x6c] ss:$16 sps:$4 sm:$0xff]  }
 0x129   :  { %9474 = vmatprep.subr.bf16.mxu1 %v398_v41 }
 0x12a   :  { %9475 = vmatpush3.bf16.msra.mxu1 %v398_v41  ;;  %971 = vmatpush1.bf16.msra.mxu0 %v9640_v27  ;;  %v9663_v41 = vld [vmem:[%s11623_s3 + $0x4c] ss:$16 sps:$4 sm:$0xff]  }
 0x12b   :  { %9476 = vmatprep.subr.bf16.mxu1 %v397_v45  ;;  %972 = vmatprep.subr.bf16.mxu0 %v9648_v29 }
 0x12e   :  { %9477 = vmatpush3.bf16.msra.mxu1 %v397_v45  ;;  %973 = vmatpush1.bf16.msra.mxu0 %v9646_v31  ;;  %v9669_v45 = vld [vmem:[%s11623_s3 + $0x2c] ss:$16 sps:$4 sm:$0xff]  }
 0x12f   :  { %9478 = vmatprep.subr.bf16.mxu1 %v396_v53  ;;  %974 = vmatprep.subr.bf16.mxu0 %v9654_v33 }
 0x132   :  { %9479 = vmatpush3.bf16.msra.mxu1 %v396_v53  ;;  %975 = vmatpush1.bf16.msra.mxu0 %v9652_v36  ;;  %v10115_v53 = vmov 0  }
 0x133   :  { %9480 = vmatprep.subr.bf16.mxu1 %v395_v2  ;;  %976 = vmatprep.subr.bf16.mxu0 %v9660_v40 }
 0x134   :  { %998 = vmatprep.mubr.bf16.mxu0 %v10115_v53 }
 0x136   :  { %9481 = vmatpush3.bf16.msra.mxu1 %v395_v2  ;;  %977 = vmatpush1.bf16.msra.mxu0 %v9658_v42  ;;  %v762_v42 = vsub.s32 1, %v10293_v34 }
 0x137   :  { %9482 = vmatprep.subr.bf16.mxu1 %v394_v63  ;;  %978 = vmatprep.subr.bf16.mxu0 %v9666_v44 }
 0x13a   :  { %9483 = vmatpush3.bf16.msra.mxu1 %v394_v63  ;;  %979 = vmatpush1.bf16.msra.mxu0 %v9664_v46 }
 0x13b   :  { %9484 = vmatprep.subr.bf16.mxu1 %v393_v4  ;;  %980 = vmatprep.subr.bf16.mxu0 %v9672_v48 }
 0x13e   :  { %9485 = vmatpush3.bf16.msra.mxu1 %v393_v4  ;;  %981 = vmatpush1.bf16.msra.mxu0 %v9670_v50 }
 0x13f   :  { %9486 = vmatprep.subr.bf16.mxu1 %v10310_v62 }
 0x142   :  { %9487 = vmatpush3.bf16.msra.mxu1 %v10310_v62  ;;  %v9614_v62 = vld [vmem:[%s11622_s2 + $0x20] sm:$0xff]  }
 0x143   :  { %9488 = vmatprep.subr.bf16.mxu1 %v10306_v52 }
 0x146   :  { %9489 = vmatpush3.bf16.msra.mxu1 %v10306_v52  ;;  %v9615_v52 = vld [vmem:[%s11622_s2 + $0x28] sm:$0xff]  }
 0x147   :  { %1019 = vmatprep.subr.bf16.mxu1 %v9630_v18 }
 0x149   :  { %9491 = vmatmul.mubr.bf16.vlgmr.msra.gmra.mxu1 %v9611_v39 }
 0x14a   :  { %9494 = vmatprep.mubr.bf16.mxu1 %v9612_v56  ;;  %1020 = vmatpush1.bf16.msra.mxu1 %v9628_v17 }
 0x14b   :  { %1021 = vmatprep.subr.bf16.mxu1 %v9636_v22 }
 0x14e   :  { %1022 = vmatpush1.bf16.msra.mxu1 %v9634_v21 }
 0x14f   :  { %1023 = vmatprep.subr.bf16.mxu1 %v9645_v26 }
 0x151   :  { %9495 = vmatmul.mubr.bf16.gmra.mxu1 %v9613_v58 }
 0x152   :  { %9498 = vmatprep.mubr.bf16.mxu1 %v9614_v62  ;;  %1024 = vmatpush1.bf16.msra.mxu1 %v9643_v28 }
 0x153   :  { %1025 = vmatprep.subr.bf16.mxu1 %v9651_v30  ;;  %v755_v30 = vrot.slane %v10299_v37, %v754_v19  ;;  %v1317_v19 = vld [vmem:[%s11625_s5 + $0x340] sm:$0xff] }
 0x156   :  { %1026 = vmatpush1.bf16.msra.mxu1 %v9649_v32 }
 0x157   :  { %1027 = vmatprep.subr.bf16.mxu1 %v9657_v35 }
 0x159   :  { %9499 = vmatmul.mubr.bf16.gmra.mxu1 %v9615_v52 }
 0x15a   :  { %9502 = vmatprep.mubr.bf16.mxu1 %v9616_v5  ;;  %1028 = vmatpush1.bf16.msra.mxu1 %v9655_v38 }
 0x15b   :  { %1029 = vmatprep.subr.bf16.mxu1 %v9663_v41 }
 0x15e   :  { %1030 = vmatpush1.bf16.msra.mxu1 %v9661_v43 }
 0x15f   :  { %1031 = vmatprep.subr.bf16.mxu1 %v9669_v45 }
 0x161   :  { %9503 = vmatmul.mubr.bf16.gmra.mxu1 %v9617_v6 }
 0x162   :  { %9506 = vmatprep.mubr.bf16.mxu1 %v9618_v7  ;;  %1032 = vmatpush1.bf16.msra.mxu1 %v9667_v47 }
 0x163   :  { %1033 = vmatprep.subr.bf16.mxu1 %v9675_v49 }
 0x166   :  { %1034 = vmatpush1.bf16.msra.mxu1 %v9673_v51 }
 0x169   :  { %9507 = vmatmul.mubr.bf16.gmra.mxu1 %v9619_v8 }
 0x16a   :  { %9510 = vmatprep.mubr.bf16.mxu1 %v9620_v9 }
 0x171   :  { %9511 = vmatmul.mubr.bf16.gmra.mxu1 %v9621_v10 }
 0x172   :  { %9514 = vmatprep.mubr.bf16.mxu1 %v9622_v11 }
 0x179   :  { %9515 = vmatmul.mubr.bf16.gmra.mxu1 %v9623_v12 }
 0x17a   :  { %9518 = vmatprep.mubr.bf16.mxu1 %v9624_v13 }
 0x181   :  { %9519 = vmatmul.mubr.bf16.gmra.mxu1 %v9625_v14 }
 0x182   :  { %9522 = vmatprep.mubr.bf16.mxu1 %v9626_v15 }
 0x189   :  { %9523 = vmatmul.mubr.bf16.gmra.mxu1 %v9627_v16 }
 0x18a   :  { %1051 = vmatprep.mubr.bf16.mxu1 %v10115_v53 }
 0x209   :  { %v9492_v54 = vpop.f32.mrf.mxu1 }
 0x20b   :  { %v577_v55 = vpop.f32.mrf.mxu1 }
 0x20d   :  { %v9493_v57 = vpop.f32.mrf.mxu1 }
 0x20f   :  { %v580_v59 = vpop.f32.mrf.mxu1 }
 0x211   :  { %v9496_v60 = vpop.f32.mrf.mxu1 }
 0x212   :  { %v722_v2 = vmax.f32 %v9492_v54, %v9496_v60 }
 0x213   :  { %v593_v0 = vpop.f32.mrf.mxu1 }
 0x214   :  { %v720_v27 = vmax.f32 %v577_v55, %v593_v0  ;;  %v763_v55 = vrot.slane %v10299_v37, %v762_v42 }
 0x215   :  { %v9497_v1 = vpop.f32.mrf.mxu1 }
 0x216   :  { %v723_v36 = vmax.f32 %v9493_v57, %v9497_v1 }
 0x217   :  { %v596_v61 = vpop.f32.mrf.mxu1 }
 0x218   :  { %v721_v47 = vmax.f32 %v580_v59, %v596_v61 }
 0x219   :  { %v9500_v63 = vpop.f32.mrf.mxu1 }
 0x21b   :  { %v609_v3 = vpop.f32.mrf.mxu1 }
 0x21d   :  { %v9501_v4 = vpop.f32.mrf.mxu1 }
 0x21f   :  { %v612_v39 = vpop.f32.mrf.mxu1 }
 0x221   :  { %v9504_v56 = vpop.f32.mrf.mxu1 }
 0x222   :  { %v726_v17 = vmax.f32 %v9500_v63, %v9504_v56 }
 0x223   :  { %v625_v58 = vpop.f32.mrf.mxu1 }
 0x224   :  { %v724_v22 = vmax.f32 %v609_v3, %v625_v58  ;;  %v738_v28 = vmax.f32 %v722_v2, %v726_v17 }
 0x225   :  { %v9505_v62 = vpop.f32.mrf.mxu1 }
 0x226   :  { %v727_v31 = vmax.f32 %v9501_v4, %v9505_v62  ;;  %v736_v38 = vmax.f32 %v720_v27, %v724_v22  ;;  %v1311_v22 = vld [vmem:[%s11625_s5 + $0x280] sm:$0xff] }
 0x227   :  { %v628_v52 = vpop.f32.mrf.mxu1  ;;  %v1309_v27 = vld [vmem:[%s11625_s5 + $0x240] sm:$0xff] }
 0x228   :  { %v725_v40 = vmax.f32 %v612_v39, %v628_v52  ;;  %v739_v49 = vmax.f32 %v723_v36, %v727_v31  ;;  %v1305_v31 = vld [vmem:[%s11625_s5 + $0x1c0] sm:$0xff] }
 0x229   :  { %v9508_v5 = vpop.f32.mrf.mxu1 }
 0x22a   :  { %v737_v2 = vmax.f32 %v721_v47, %v725_v40 }
 0x22b   :  { %v641_v6 = vpop.f32.mrf.mxu1 }
 0x22d   :  { %v9509_v7 = vpop.f32.mrf.mxu1 }
 0x22f   :  { %v644_v8 = vpop.f32.mrf.mxu1 }
 0x231   :  { %v9512_v9 = vpop.f32.mrf.mxu1 }
 0x232   :  { %v730_v20 = vmax.f32 %v9508_v5, %v9512_v9 }
 0x233   :  { %v657_v10 = vpop.f32.mrf.mxu1 }
 0x234   :  { %v728_v24 = vmax.f32 %v641_v6, %v657_v10 }
 0x235   :  { %v9513_v11 = vpop.f32.mrf.mxu1 }
 0x236   :  { %v731_v32 = vmax.f32 %v9509_v7, %v9513_v11 }
 0x237   :  { %v660_v12 = vpop.f32.mrf.mxu1 }
 0x238   :  { %v729_v43 = vmax.f32 %v644_v8, %v660_v12 }
 0x239   :  { %v9516_v13 = vpop.f32.mrf.mxu1 }
 0x23b   :  { %v673_v14 = vpop.f32.mrf.mxu1 }
 0x23d   :  { %v9517_v15 = vpop.f32.mrf.mxu1 }
 0x23f   :  { %v676_v16 = vpop.f32.mrf.mxu1 }
 0x241   :  { %v9520_v18 = vpop.f32.mrf.mxu1 }
 0x242   :  { %v734_v21 = vmax.f32 %v9516_v13, %v9520_v18  ;;  %v9684_v13 = vld [vmem:[%s11624_s4] sm:$0xff]  }
 0x243   :  { %v689_v23 = vpop.f32.mrf.mxu1  ;;  %v1315_v18 = vld [vmem:[%s11625_s5 + $0x300] sm:$0xff] }
 0x244   :  { %v742_v25 = vmax.f32 %v730_v20, %v734_v21  ;;  %v732_v26 = vmax.f32 %v673_v14, %v689_v23  ;;  %v1319_v14 = vld [vmem:[%s11625_s5 + $0x380] sm:$0xff]  ;;  %v7304_v20 = vcombine.high %v1315_v18, %v1317_v19  ;;  %v7303_v21 = vcombine.low %v1315_v18, %v1317_v19  ;;  %v1310_v18 = vld [vmem:[%s11625_s5 + $0x248] sm:$0xff] }
 0x245   :  { %v9521_v29 = vpop.f32.mrf.mxu1  ;;  %v1313_v23 = vld [vmem:[%s11625_s5 + $0x2c0] sm:$0xff] }
 0x246   :  { %v740_v33 = vmax.f32 %v728_v24, %v732_v26  ;;  %v735_v35 = vmax.f32 %v9517_v15, %v9521_v29  ;;  %v746_v46 = vmax.f32 %v738_v28, %v742_v25  ;;  %v1321_v15 = vld [vmem:[%s11625_s5 + $0x3c0] sm:$0xff]  ;;  %v7300_v24 = vcombine.high %v1311_v22, %v1313_v23 }
 0x247   :  { %v692_v41 = vpop.f32.mrf.mxu1  ;;  %v7308_v17 = vcombine.high %v1319_v14, %v1321_v15  ;;  %v7299_v25 = vcombine.low %v1311_v22, %v1313_v23  ;;  %v1307_v26 = vld [vmem:[%s11625_s5 + $0x200] sm:$0xff]  ;;  %v1306_v22 = vld [vmem:[%s11625_s5 + $0x1c8] sm:$0xff] }
 0x248   :  { %v743_v44 = vmax.f32 %v731_v32, %v735_v35  ;;  %v733_v45 = vmax.f32 %v676_v16, %v692_v41  ;;  %v744_v54 = vmax.f32 %v736_v38, %v740_v33  ;;  %v7307_v16 = vcombine.low %v1319_v14, %v1321_v15  ;;  %v1314_v14 = vld [vmem:[%s11625_s5 + $0x2c8] sm:$0xff] }
 0x249   :  { %v9524_v48 = vpop.f32.mrf.mxu1  ;;  %1483 = vmatprep.subr.bf16.mxu1 %v7308_v17  ;;  %v7296_v28 = vcombine.high %v1307_v26, %v1309_v27  ;;  %v7295_v29 = vcombine.low %v1307_v26, %v1309_v27  ;;  %v1308_v17 = vld [vmem:[%s11625_s5 + $0x208] sm:$0xff]  ;;  %v1299_v26 = vld [vmem:[%s11625_s5 + $0x100] sm:$0xff] }
 0x24a   :  { %v741_v50 = vmax.f32 %v729_v43, %v733_v45  ;;  %v750_v51 = vmax.f32 %v746_v46, %v9524_v48  ;;  %v747_v1 = vmax.f32 %v739_v49, %v743_v44  ;;  %v7297_v23 = vcombine.low %v1308_v17, %v1310_v18  ;;  %v1301_v27 = vld [vmem:[%s11625_s5 + $0x140] sm:$0xff] }
 0x24b   :  { %v705_v60 = vpop.f32.mrf.mxu1 }
 0x24c   :  { %v758_v57 = vmul.f32 %v755_v30, %v750_v51  ;;  %v748_v0 = vmax.f32 %v744_v54, %v705_v60  ;;  %v745_v39 = vmax.f32 %v737_v2, %v741_v50 }
 0x24d   :  { %v9525_v63 = vpop.f32.mrf.mxu1 }
 0x24e   :  { %v756_v3 = vmul.f32 %v755_v30, %v748_v0  ;;  %v751_v4 = vmax.f32 %v747_v1, %v9525_v63  ;;  %v766_v58 = vadd.f32 %v763_v55, %v758_v57 }
 0x24f   :  { %v708_v56 = vpop.f32.mrf.mxu1 }
 0x250   :  { %v759_v62 = vmul.f32 %v755_v30, %v751_v4  ;;  %v749_v59 = vmax.f32 %v745_v39, %v708_v56  ;;  %v764_v61 = vadd.f32 %v763_v55, %v756_v3  ;;  %v770_v6 = vmax.f32 %v766_v58, 0.0 }
 0x252   :  { %v767_v52 = vadd.f32 %v763_v55, %v759_v62  ;;  %v757_v5 = vmul.f32 %v755_v30, %v749_v59  ;;  %v768_v9 = vmax.f32 %v764_v61, 0.0  ;;  %v1303_v30 = vld [vmem:[%s11625_s5 + $0x180] sm:$0xff] }
 0x253   :  { %v7292_v32 = vcombine.high %v1303_v30, %v1305_v31  ;;  %v7291_v33 = vcombine.low %v1303_v30, %v1305_v31  ;;  %v1302_v30 = vld [vmem:[%s11625_s5 + $0x148] sm:$0xff]  ;;  %v7287_v31 = vcombine.low %v1299_v26, %v1301_v27 }
 0x254   :  { %v771_v7 = vmax.f32 %v767_v52, 0.0  ;;  %v765_v8 = vadd.f32 %v763_v55, %v757_v5  ;;  %v1320_v52 = vld [vmem:[%s11625_s5 + $0x388] sm:$0xff] }
 0x255   :  { %v1322_v5 = vld [vmem:[%s11625_s5 + $0x3c8] sm:$0xff] }
 0x256   :  { %v769_v10 = vmax.f32 %v765_v8, 0.0  ;;  %v773_v11 = vpack.c.bf16 %v771_v7, %v770_v6  ;;  %v7310_v7 = vcombine.high %v1320_v52, %v1322_v5  ;;  %v1316_v8 = vld [vmem:[%s11625_s5 + $0x308] sm:$0xff] }
 0x258   :  { %v772_v12 = vpack.c.bf16 %v769_v10, %v768_v9  ;;  %v1318_v9 = vld [vmem:[%s11625_s5 + $0x348] sm:$0xff] }
 0x259   :  { %v9685_v10 = vld [vmem:[%s11624_s4 + $0x8] sm:$0xff]   ;;  %v7305_v15 = vcombine.low %v1316_v8, %v1318_v9 }
 0x25a   :  { %999 = vmatmul.mubr.bf16.vlgmr.msra.gmra.mxu0 %v772_v12  ;;  %1052 = vmatmul.mubr.bf16.vlgmr.msra.gmra.mxu1 %v772_v12  ;;  %v7306_v12 = vcombine.high %v1316_v8, %v1318_v9 }
 0x25b   :  { %1008 = vmatprep.mubr.bf16.mxu0 %v10115_v53  ;;  %1061 = vmatprep.mubr.bf16.mxu1 %v10115_v53 }
 0x25c   :  { %1484 = vmatpush1.bf16.msra.mxu1 %v7307_v16 }
 0x25d   :  { %1485 = vmatprep.subr.bf16.mxu1 %v7304_v20  ;;  %v7298_v20 = vcombine.high %v1308_v17, %v1310_v18  ;;  %v1692_v17 = vld [vmem:[%s11625_s5 + $0x2d8] sm:$0xff] }
 0x260   :  { %1486 = vmatpush1.bf16.msra.mxu1 %v7303_v21  ;;  %v1304_v21 = vld [vmem:[%s11625_s5 + $0x188] sm:$0xff] }
 0x261   :  { %1487 = vmatprep.subr.bf16.mxu1 %v7300_v24  ;;  %v7294_v24 = vcombine.high %v1304_v21, %v1306_v22 }
 0x262   :  { %1009 = vmatmul.mubr.bf16.gmra.mxu0 %v773_v11  ;;  %1062 = vmatmul.mubr.bf16.gmra.mxu1 %v773_v11  ;;  %v7309_v11 = vcombine.low %v1320_v52, %v1322_v5  ;;  %v1693_v5 = vld [vmem:[%s11625_s5 + $0x310] sm:$0xff] }
 0x263   :  { %1515 = vmatprep.mubr.bf16.mxu1 %v10115_v53  ;;  %9542 = vmatprep.mubr.bf16.mxu0 %v9684_v13  ;;  %v1312_v13 = vld [vmem:[%s11625_s5 + $0x288] sm:$0xff] }
 0x264   :  { %1488 = vmatpush1.bf16.msra.mxu1 %v7299_v25  ;;  %v7302_v16 = vcombine.high %v1312_v13, %v1314_v14  ;;  %v7301_v19 = vcombine.low %v1312_v13, %v1314_v14  ;;  %v7293_v25 = vcombine.low %v1304_v21, %v1306_v22  ;;  %v1689_v14 = vld [vmem:[%s11625_s5 + $0x290] sm:$0xff] }
 0x265   :  { %1489 = vmatprep.subr.bf16.mxu1 %v7296_v28  ;;  %v1300_v28 = vld [vmem:[%s11625_s5 + $0x108] sm:$0xff] }
 0x268   :  { %1490 = vmatpush1.bf16.msra.mxu1 %v7295_v29  ;;  %v7288_v29 = vcombine.high %v1299_v26, %v1301_v27  ;;  %v1686_v26 = vld [vmem:[%s11625_s5 + $0x218] sm:$0xff] }
 0x269   :  { %1491 = vmatprep.subr.bf16.mxu1 %v7292_v32  ;;  %v7289_v32 = vcombine.low %v1300_v28, %v1302_v30  ;;  %v1688_v27 = vld [vmem:[%s11625_s5 + $0x258] sm:$0xff] }
 0x26c   :  { %1492 = vmatpush1.bf16.msra.mxu1 %v7291_v33  ;;  %v7290_v33 = vcombine.high %v1300_v28, %v1302_v30 }
 0x26d   :  { %1493 = vmatprep.subr.bf16.mxu1 %v7288_v29 }
 0x270   :  { %1494 = vmatpush1.bf16.msra.mxu1 %v7287_v31 }
 0x31a   :  { %v1000_v35 = vpop.f32.mrf.mxu0  ;;  %v1053_v36 = vpop.f32.mrf.mxu1 }
 0x31c   :  { %v1002_v38 = vpop.f32.mrf.mxu0  ;;  %v1055_v40 = vpop.f32.mrf.mxu1 }
 0x31e   :  { %v1004_v41 = vpop.f32.mrf.mxu0  ;;  %v1057_v42 = vpop.f32.mrf.mxu1 }
 0x31f   :  { %v8216_v43 = vpack.c.bf16 %v1004_v41, %v1000_v35  ;;  %v8236_v44 = vpack.c.bf16 %v1057_v42, %v1053_v36  ;;  %v1295_v35 = vld [vmem:[%s11625_s5 + $0x80] sm:$0xff]  ;;  %v1298_v41 = vld [vmem:[%s11625_s5 + $0xc8] sm:$0xff] }
 0x320   :  { %v1006_v45 = vpop.f32.mrf.mxu0  ;;  %v1059_v46 = vpop.f32.mrf.mxu1  ;;  %v1297_v36 = vld [vmem:[%s11625_s5 + $0xc0] sm:$0xff] }
 0x321   :  { %8217 = vst [vmem:[#allocation2] sm:$0xff] %v8216_v43   ;;  %8856 = vst [vmem:[#allocation2 + $0x20] sm:$0xff] %v8236_v44   ;;  %v8226_v47 = vpack.c.bf16 %v1006_v45, %v1002_v38  ;;  %v8246_v48 = vpack.c.bf16 %v1059_v46, %v1055_v40  ;;  %v1296_v38 = vld [vmem:[%s11625_s5 + $0x88] sm:$0xff]  ;;  %v7284_v40 = vcombine.high %v1295_v35, %v1297_v36  ;;  %v1291_v45 = vld [vmem:[%s11625_s5] sm:$0xff] }
 0x322   :  { %v1010_v49 = vpop.f32.mrf.mxu0  ;;  %v1063_v50 = vpop.f32.mrf.mxu1  ;;  %v7283_v42 = vcombine.low %v1295_v35, %v1297_v36  ;;  %v7285_v43 = vcombine.low %v1296_v38, %v1298_v41  ;;  %v7286_v44 = vcombine.high %v1296_v38, %v1298_v41  ;;  %v1293_v46 = vld [vmem:[%s11625_s5 + $0x40] sm:$0xff]  ;;  %v1681_v35 = vld [vmem:[%s11625_s5 + $0x190] sm:$0xff]  ;;  %v1682_v38 = vld [vmem:[%s11625_s5 + $0x198] sm:$0xff] }
 0x323   :  { %8854 = vst [vmem:[#allocation2 + $0x10] sm:$0xff] %v8226_v47   ;;  %8858 = vst [vmem:[#allocation2 + $0x30] sm:$0xff] %v8246_v48   ;;  %1495 = vmatprep.subr.bf16.mxu1 %v7284_v40  ;;  %v1292_v47 = vld [vmem:[%s11625_s5 + $0x8] sm:$0xff]  ;;  %v7280_v48 = vcombine.high %v1291_v45, %v1293_v46  ;;  %v1683_v36 = vld [vmem:[%s11625_s5 + $0x1d0] sm:$0xff] }
 0x324   :  { %v1012_v51 = vpop.f32.mrf.mxu0  ;;  %v1065_v54 = vpop.f32.mrf.mxu1  ;;  %1496 = vmatpush1.bf16.msra.mxu1 %v7283_v42  ;;  %v1684_v40 = vld [vmem:[%s11625_s5 + $0x1d8] sm:$0xff]  ;;  %v7345_v42 = vcombine.low %v1686_v26, %v1688_v27 }
 0x325   :  { %1497 = vmatprep.subr.bf16.mxu1 %v7280_v48  ;;  %v1680_v48 = vld [vmem:[%s11625_s5 + $0x158] sm:$0xff] }
 0x326   :  { %v1014_v55 = vpop.f32.mrf.mxu0  ;;  %v1067_v60 = vpop.f32.mrf.mxu1 }
 0x327   :  { %v8221_v2 = vpack.c.bf16 %v1014_v55, %v1010_v49  ;;  %v8241_v57 = vpack.c.bf16 %v1067_v60, %v1063_v50  ;;  %v1294_v49 = vld [vmem:[%s11625_s5 + $0x48] sm:$0xff]  ;;  %v7279_v50 = vcombine.low %v1291_v45, %v1293_v46  ;;  %v1697_v55 = vld [vmem:[%s11625_s5 + $0x390] sm:$0xff] }
 0x328   :  { %v1016_v0 = vpop.f32.mrf.mxu0  ;;  %v1069_v1 = vpop.f32.mrf.mxu1  ;;  %v9679_v58 = vld [vmem:[#allocation2 + $0x20] sm:$0xff]   ;;  %v1699_v60 = vld [vmem:[%s11625_s5 + $0x3d0] sm:$0xff] }
 0x329   :  { %8853 = vst [vmem:[#allocation2 + $0x8] sm:$0xff] %v8221_v2   ;;  %8857 = vst [vmem:[#allocation2 + $0x28] sm:$0xff] %v8241_v57   ;;  %v8231_v63 = vpack.c.bf16 %v1016_v0, %v1012_v51  ;;  %v8251_v3 = vpack.c.bf16 %v1069_v1, %v1065_v54  ;;  %v9683_v6 = vld [vmem:[#allocation2] sm:$0xff]   ;;  %v7281_v51 = vcombine.low %v1292_v47, %v1294_v49  ;;  %1498 = vmatpush1.bf16.msra.mxu1 %v7279_v50  ;;  %v1698_v2 = vld [vmem:[%s11625_s5 + $0x398] sm:$0xff] }
 0x32a   :  { %v9677_v39 = vld [vmem:[#allocation2 + $0x30] sm:$0xff]   ;;  %v7282_v54 = vcombine.high %v1292_v47, %v1294_v49  ;;  %v7355_v57 = vcombine.low %v1697_v55, %v1699_v60  ;;  %v7356_v0 = vcombine.high %v1697_v55, %v1699_v60  ;;  %v1700_v1 = vld [vmem:[%s11625_s5 + $0x3d8] sm:$0xff]  ;;  %v7339_v49 = vcombine.low %v1681_v35, %v1683_v36 }
 0x32b   :  { %8855 = vst [vmem:[#allocation2 + $0x18] sm:$0xff] %v8231_v63   ;;  %8859 = vst [vmem:[#allocation2 + $0x38] sm:$0xff] %v8251_v3   ;;  %v9681_v59 = vld [vmem:[#allocation2 + $0x10] sm:$0xff]   ;;  %v7357_v63 = vcombine.low %v1698_v2, %v1700_v1  ;;  %v7358_v3 = vcombine.high %v1698_v2, %v1700_v1  ;;  %v1678_v47 = vld [vmem:[%s11625_s5 + $0x118] sm:$0xff]  ;;  %v7341_v50 = vcombine.low %v1682_v38, %v1684_v40 }
 0x32c   :  { %1861 = vmatprep.subr.bf16.mxu1 %v7356_v0  ;;  %v1677_v45 = vld [vmem:[%s11625_s5 + $0x110] sm:$0xff]  ;;  %v1674_v2 = vld [vmem:[%s11625_s5 + $0x98] sm:$0xff]  ;;  %v7337_v1 = vcombine.low %v1678_v47, %v1680_v48 }
 0x32d   :  { %v1679_v46 = vld [vmem:[%s11625_s5 + $0x150] sm:$0xff] }
 0x32e   :  { %v1673_v55 = vld [vmem:[%s11625_s5 + $0x90] sm:$0xff]  ;;  %v7335_v0 = vcombine.low %v1677_v45, %v1679_v46 }
 0x32f   :  { %v1675_v60 = vld [vmem:[%s11625_s5 + $0xd0] sm:$0xff] }
 0x330   :  { %v9678_v56 = vld [vmem:[#allocation2 + $0x28] sm:$0xff]  }
 0x331   :  { %v9682_v61 = vld [vmem:[#allocation2 + $0x8] sm:$0xff]  }
 0x332   :  { %v9676_v4 = vld [vmem:[#allocation2 + $0x38] sm:$0xff]  }
 0x333   :  { %9526 = vmatprep.subr.bf16.mxu0 %v9676_v4  ;;  %v9680_v62 = vld [vmem:[#allocation2 + $0x18] sm:$0xff]  }
 0x334   :  { %9527 = vmatpush3.bf16.msra.mxu0 %v9676_v4  ;;  %v1174_v4 = vsub.s32 2, %v10293_v34 }
 0x335   :  { %9528 = vmatprep.subr.bf16.mxu0 %v9677_v39 }
 0x338   :  { %9529 = vmatpush3.bf16.msra.mxu0 %v9677_v39 }
 0x339   :  { %9530 = vmatprep.subr.bf16.mxu0 %v9678_v56 }
 0x33c   :  { %9531 = vmatpush3.bf16.msra.mxu0 %v9678_v56 }
 0x33d   :  { %9532 = vmatprep.subr.bf16.mxu0 %v9679_v58 }
 0x340   :  { %9533 = vmatpush3.bf16.msra.mxu0 %v9679_v58  ;;  %v1175_v58 = vrot.slane %v10299_v37, %v1174_v4  ;;  %v1696_v37 = vld [vmem:[%s11625_s5 + $0x358] sm:$0xff]  ;;  %v1669_v4 = vld [vmem:[%s11625_s5 + $0x10] sm:$0xff] }
 0x341   :  { %9534 = vmatprep.subr.bf16.mxu0 %v9680_v62 }
 0x344   :  { %9535 = vmatpush3.bf16.msra.mxu0 %v9680_v62 }
 0x345   :  { %9536 = vmatprep.subr.bf16.mxu0 %v9681_v59 }
 0x348   :  { %9537 = vmatpush3.bf16.msra.mxu0 %v9681_v59 }
 0x349   :  { %9538 = vmatprep.subr.bf16.mxu0 %v9682_v61 }
 0x34c   :  { %9539 = vmatpush3.bf16.msra.mxu0 %v9682_v61 }
 0x34d   :  { %9540 = vmatprep.subr.bf16.mxu0 %v9683_v6 }
 0x350   :  { %9541 = vmatpush3.bf16.msra.mxu0 %v9683_v6  ;;  %v1695_v6 = vld [vmem:[%s11625_s5 + $0x350] sm:$0xff] }
 0x351   :  { %1536 = vmatprep.subr.bf16.mxu0 %v7310_v7  ;;  %v1694_v7 = vld [vmem:[%s11625_s5 + $0x318] sm:$0xff] }
 0x352   :  { %v7354_v13 = vcombine.high %v1694_v7, %v1696_v37 }
 0x353   :  { %9543 = vmatmul.mubr.bf16.vlgmr.msra.gmra.mxu0 %v9685_v10 }
 0x354   :  { %1537 = vmatpush1.bf16.msra.mxu0 %v7309_v11  ;;  %1568 = vmatprep.mubr.bf16.mxu0 %v10115_v53 }
 0x355   :  { %1538 = vmatprep.subr.bf16.mxu0 %v7306_v12  ;;  %v7352_v12 = vcombine.high %v1693_v5, %v1695_v6 }
 0x358   :  { %1539 = vmatpush1.bf16.msra.mxu0 %v7305_v15  ;;  %v1691_v15 = vld [vmem:[%s11625_s5 + $0x2d0] sm:$0xff] }
 0x359   :  { %1540 = vmatprep.subr.bf16.mxu0 %v7302_v16  ;;  %v1690_v16 = vld [vmem:[%s11625_s5 + $0x298] sm:$0xff]  ;;  %v7348_v22 = vcombine.high %v1689_v14, %v1691_v15  ;;  %v7347_v29 = vcombine.low %v1689_v14, %v1691_v15  ;;  %v2073_v14 = vld [vmem:[%s11625_s5 + $0x360] sm:$0xff]  ;;  %v2072_v15 = vld [vmem:[%s11625_s5 + $0x328] sm:$0xff] }
 0x35a   :  { %v7349_v30 = vcombine.low %v1690_v16, %v1692_v17 }
 0x35c   :  { %1541 = vmatpush1.bf16.msra.mxu0 %v7301_v19  ;;  %v7351_v19 = vcombine.low %v1693_v5, %v1695_v6  ;;  %v2075_v5 = vld [vmem:[%s11625_s5 + $0x3a0] sm:$0xff] }
 0x35d   :  { %1542 = vmatprep.subr.bf16.mxu0 %v7298_v20  ;;  %v7353_v20 = vcombine.low %v1694_v7, %v1696_v37  ;;  %v2077_v6 = vld [vmem:[%s11625_s5 + $0x3e0] sm:$0xff]  ;;  %v2076_v7 = vld [vmem:[%s11625_s5 + $0x3a8] sm:$0xff] }
 0x35e   :  { %v2078_v37 = vld [vmem:[%s11625_s5 + $0x3e8] sm:$0xff] }
 0x360   :  { %1543 = vmatpush1.bf16.msra.mxu0 %v7297_v23  ;;  %v7350_v23 = vcombine.high %v1690_v16, %v1692_v17  ;;  %v2074_v16 = vld [vmem:[%s11625_s5 + $0x368] sm:$0xff]  ;;  %v7403_v17 = vcombine.low %v2075_v5, %v2077_v6 }
 0x361   :  { %1544 = vmatprep.subr.bf16.mxu0 %v7294_v24  ;;  %v1685_v24 = vld [vmem:[%s11625_s5 + $0x210] sm:$0xff] }
 0x364   :  { %1545 = vmatpush1.bf16.msra.mxu0 %v7293_v25  ;;  %v1687_v25 = vld [vmem:[%s11625_s5 + $0x250] sm:$0xff] }
 0x365   :  { %1546 = vmatprep.subr.bf16.mxu0 %v7290_v33  ;;  %v7346_v33 = vcombine.high %v1686_v26, %v1688_v27  ;;  %v7343_v41 = vcombine.low %v1685_v24, %v1687_v25  ;;  %v7401_v26 = vcombine.low %v2072_v15, %v2074_v16 }
 0x368   :  { %1547 = vmatpush1.bf16.msra.mxu0 %v7289_v32  ;;  %v7344_v32 = vcombine.high %v1685_v24, %v1687_v25  ;;  %v2070_v24 = vld [vmem:[%s11625_s5 + $0x2e8] sm:$0xff] }
 0x369   :  { %1548 = vmatprep.subr.bf16.mxu0 %v7286_v44  ;;  %v7342_v44 = vcombine.high %v1682_v38, %v1684_v40 }
 0x36c   :  { %1549 = vmatpush1.bf16.msra.mxu0 %v7285_v43  ;;  %v7340_v43 = vcombine.high %v1681_v35, %v1683_v36 }
 0x36d   :  { %1550 = vmatprep.subr.bf16.mxu0 %v7282_v54  ;;  %v7338_v54 = vcombine.high %v1678_v47, %v1680_v48 }
 0x370   :  { %1551 = vmatpush1.bf16.msra.mxu0 %v7281_v51  ;;  %v7336_v51 = vcombine.high %v1677_v45, %v1679_v46 }
 0x371   :  { %1914 = vmatprep.subr.bf16.mxu0 %v7358_v3 }
 0x413   :  { %v9544_v39 = vpop.f32.mrf.mxu0 }
 0x414   :  { %v1279_v18 = vadd.f32 %v9544_v39, %v1175_v58  ;;  %v1671_v39 = vld [vmem:[%s11625_s5 + $0x50] sm:$0xff] }
 0x415   :  { %v1270_v56 = vpop.f32.mrf.mxu0 }
 0x416   :  { %v1271_v59 = vadd.f32 %v1270_v56, %v1175_v58  ;;  %v1287_v28 = vmax.f32 %v1279_v18, 0.0  ;;  %v1670_v56 = vld [vmem:[%s11625_s5 + $0x18] sm:$0xff]  ;;  %v7405_v18 = vcombine.low %v2076_v7, %v2078_v37 }
 0x417   :  { %v9545_v62 = vpop.f32.mrf.mxu0 }
 0x418   :  { %v1285_v8 = vmax.f32 %v1271_v59, 0.0  ;;  %v1282_v10 = vadd.f32 %v9545_v62, %v1175_v58  ;;  %v7331_v62 = vcombine.low %v1673_v55, %v1675_v60 }
 0x419   :  { %v1273_v61 = vpop.f32.mrf.mxu0 }
 0x41a   :  { %v1274_v52 = vadd.f32 %v1273_v61, %v1175_v58  ;;  %v1288_v21 = vmax.f32 %v1282_v10, 0.0  ;;  %v1672_v58 = vld [vmem:[%s11625_s5 + $0x58] sm:$0xff]  ;;  %v7328_v61 = vcombine.high %v1669_v4, %v1671_v39  ;;  %v7404_v10 = vcombine.high %v2075_v5, %v2077_v6 }
 0x41c   :  { %v1286_v9 = vmax.f32 %v1274_v52, 0.0  ;;  %v10643_v31 = vpack.c.bf16 %v1288_v21, %v1287_v28  ;;  %v7330_v52 = vcombine.high %v1670_v56, %v1672_v58  ;;  %v2067_v21 = vld [vmem:[%s11625_s5 + $0x2a0] sm:$0xff] }
 0x41e   :  { %v10613_v11 = vpack.c.bf16 %v1286_v9, %v1285_v8  ;;  %v7327_v8 = vcombine.low %v1669_v4, %v1671_v39  ;;  %v7329_v9 = vcombine.low %v1670_v56, %v1672_v58 }
 0x420   :  { %1516 = vmatmul.mubr.bf16.vlgmr.msra.gmra.mxu1 %v10613_v11  ;;  %1569 = vmatmul.mubr.bf16.vlgmr.msra.gmra.mxu0 %v10613_v11 }
 0x421   :  { %1862 = vmatpush1.bf16.msra.mxu1 %v7355_v57  ;;  %1915 = vmatpush1.bf16.msra.mxu0 %v7357_v63  ;;  %v1676_v57 = vld [vmem:[%s11625_s5 + $0xd8] sm:$0xff]  ;;  %v7332_v63 = vcombine.high %v1673_v55, %v1675_v60 }
 0x422   :  { %1863 = vmatprep.subr.bf16.mxu1 %v7352_v12  ;;  %1916 = vmatprep.subr.bf16.mxu0 %v7354_v13  ;;  %v7334_v3 = vcombine.high %v1674_v2, %v1676_v57  ;;  %v7333_v59 = vcombine.low %v1674_v2, %v1676_v57  ;;  %v7406_v12 = vcombine.high %v2076_v7, %v2078_v37  ;;  %v2071_v13 = vld [vmem:[%s11625_s5 + $0x320] sm:$0xff] }
 0x423   :  { %1525 = vmatprep.mubr.bf16.mxu1 %v10115_v53  ;;  %1578 = vmatprep.mubr.bf16.mxu0 %v10115_v53  ;;  %v7399_v25 = vcombine.low %v2071_v13, %v2073_v14 }
 0x425   :  { %1864 = vmatpush1.bf16.msra.mxu1 %v7351_v19  ;;  %1917 = vmatpush1.bf16.msra.mxu0 %v7353_v20  ;;  %v7400_v19 = vcombine.high %v2071_v13, %v2073_v14  ;;  %v7402_v20 = vcombine.high %v2072_v15, %v2074_v16 }
 0x426   :  { %1865 = vmatprep.subr.bf16.mxu1 %v7348_v22  ;;  %1918 = vmatprep.subr.bf16.mxu0 %v7350_v23  ;;  %v2069_v22 = vld [vmem:[%s11625_s5 + $0x2e0] sm:$0xff]  ;;  %v2068_v23 = vld [vmem:[%s11625_s5 + $0x2a8] sm:$0xff] }
 0x427   :  { %v7396_v27 = vcombine.high %v2067_v21, %v2069_v22  ;;  %v7398_v28 = vcombine.high %v2068_v23, %v2070_v24  ;;  %v7395_v35 = vcombine.low %v2067_v21, %v2069_v22  ;;  %v7397_v36 = vcombine.low %v2068_v23, %v2070_v24 }
 0x428   :  { %1526 = vmatmul.mubr.bf16.gmra.mxu1 %v10643_v31  ;;  %1579 = vmatmul.mubr.bf16.gmra.mxu0 %v10643_v31 }
 0x429   :  { %1866 = vmatpush1.bf16.msra.mxu1 %v7347_v29  ;;  %1919 = vmatpush1.bf16.msra.mxu0 %v7349_v30  ;;  %v2063_v29 = vld [vmem:[%s11625_s5 + $0x220] sm:$0xff] }
 0x42a   :  { %1867 = vmatprep.subr.bf16.mxu1 %v7344_v32  ;;  %1920 = vmatprep.subr.bf16.mxu0 %v7346_v33  ;;  %v2065_v30 = vld [vmem:[%s11625_s5 + $0x260] sm:$0xff]  ;;  %v2064_v32 = vld [vmem:[%s11625_s5 + $0x228] sm:$0xff] }
 0x42b   :  { %1893 = vmatprep.mubr.bf16.mxu1 %v10115_v53  ;;  %1946 = vmatprep.mubr.bf16.mxu0 %v10115_v53  ;;  %v2066_v33 = vld [vmem:[%s11625_s5 + $0x268] sm:$0xff]  ;;  %v7392_v38 = vcombine.high %v2063_v29, %v2065_v30  ;;  %v7391_v45 = vcombine.low %v2063_v29, %v2065_v30 }
 0x42c   :  { %v7394_v40 = vcombine.high %v2064_v32, %v2066_v33  ;;  %v7393_v46 = vcombine.low %v2064_v32, %v2066_v33 }
 0x42d   :  { %1868 = vmatpush1.bf16.msra.mxu1 %v7343_v41  ;;  %1921 = vmatpush1.bf16.msra.mxu0 %v7345_v42  ;;  %v2059_v41 = vld [vmem:[%s11625_s5 + $0x1a0] sm:$0xff] }
 0x42e   :  { %1869 = vmatprep.subr.bf16.mxu1 %v7340_v43  ;;  %1922 = vmatprep.subr.bf16.mxu0 %v7342_v44  ;;  %v2061_v42 = vld [vmem:[%s11625_s5 + $0x1e0] sm:$0xff]  ;;  %v2060_v43 = vld [vmem:[%s11625_s5 + $0x1a8] sm:$0xff] }
 0x42f   :  { %v2062_v44 = vld [vmem:[%s11625_s5 + $0x1e8] sm:$0xff]  ;;  %v7388_v47 = vcombine.high %v2059_v41, %v2061_v42  ;;  %v7387_v55 = vcombine.low %v2059_v41, %v2061_v42 }
 0x430   :  { %v7390_v48 = vcombine.high %v2060_v43, %v2062_v44  ;;  %v7389_v60 = vcombine.low %v2060_v43, %v2062_v44 }
 0x431   :  { %1870 = vmatpush1.bf16.msra.mxu1 %v7339_v49  ;;  %1923 = vmatpush1.bf16.msra.mxu0 %v7341_v50  ;;  %v2055_v49 = vld [vmem:[%s11625_s5 + $0x120] sm:$0xff] }
 0x432   :  { %1871 = vmatprep.subr.bf16.mxu1 %v7336_v51  ;;  %1924 = vmatprep.subr.bf16.mxu0 %v7338_v54  ;;  %v2057_v50 = vld [vmem:[%s11625_s5 + $0x160] sm:$0xff]  ;;  %v2056_v51 = vld [vmem:[%s11625_s5 + $0x128] sm:$0xff] }
 0x433   :  { %v2058_v54 = vld [vmem:[%s11625_s5 + $0x168] sm:$0xff]  ;;  %v7384_v2 = vcombine.high %v2055_v49, %v2057_v50  ;;  %v7383_v4 = vcombine.low %v2055_v49, %v2057_v50 }
 0x434   :  { %v7386_v57 = vcombine.high %v2056_v51, %v2058_v54  ;;  %v7385_v39 = vcombine.low %v2056_v51, %v2058_v54 }
 0x435   :  { %1872 = vmatpush1.bf16.msra.mxu1 %v7335_v0  ;;  %1925 = vmatpush1.bf16.msra.mxu0 %v7337_v1  ;;  %v2051_v0 = vld [vmem:[%s11625_s5 + $0xa0] sm:$0xff] }
 0x436   :  { %1873 = vmatprep.subr.bf16.mxu1 %v7332_v63  ;;  %1926 = vmatprep.subr.bf16.mxu0 %v7334_v3  ;;  %v2053_v1 = vld [vmem:[%s11625_s5 + $0xe0] sm:$0xff]  ;;  %v2052_v63 = vld [vmem:[%s11625_s5 + $0xa8] sm:$0xff] }
 0x437   :  { %v2054_v3 = vld [vmem:[%s11625_s5 + $0xe8] sm:$0xff]  ;;  %v7380_v56 = vcombine.high %v2051_v0, %v2053_v1  ;;  %v7379_v5 = vcombine.low %v2051_v0, %v2053_v1 }
 0x438   :  { %v7382_v58 = vcombine.high %v2052_v63, %v2054_v3  ;;  %v7381_v6 = vcombine.low %v2052_v63, %v2054_v3 }
 0x439   :  { %1874 = vmatpush1.bf16.msra.mxu1 %v7331_v62  ;;  %1927 = vmatpush1.bf16.msra.mxu0 %v7333_v59  ;;  %v2047_v62 = vld [vmem:[%s11625_s5 + $0x20] sm:$0xff] }
 0x43a   :  { %1875 = vmatprep.subr.bf16.mxu1 %v7328_v61  ;;  %1928 = vmatprep.subr.bf16.mxu0 %v7330_v52  ;;  %v2049_v59 = vld [vmem:[%s11625_s5 + $0x60] sm:$0xff]  ;;  %v2048_v61 = vld [vmem:[%s11625_s5 + $0x28] sm:$0xff] }
 0x43b   :  { %v2050_v52 = vld [vmem:[%s11625_s5 + $0x68] sm:$0xff]  ;;  %v7376_v7 = vcombine.high %v2047_v62, %v2049_v59  ;;  %v7375_v13 = vcombine.low %v2047_v62, %v2049_v59 }
 0x43c   :  { %v7378_v37 = vcombine.high %v2048_v61, %v2050_v52  ;;  %v7377_v14 = vcombine.low %v2048_v61, %v2050_v52 }
 0x43d   :  { %1876 = vmatpush1.bf16.msra.mxu1 %v7327_v8  ;;  %1929 = vmatpush1.bf16.msra.mxu0 %v7329_v9  ;;  %v2453_v8 = vld [vmem:[%s11625_s5 + $0x3b0] sm:$0xff] }
 0x43e   :  { %2239 = vmatprep.subr.bf16.mxu1 %v7404_v10  ;;  %2292 = vmatprep.subr.bf16.mxu0 %v7406_v12  ;;  %v2455_v9 = vld [vmem:[%s11625_s5 + $0x3f0] sm:$0xff]  ;;  %v2454_v10 = vld [vmem:[%s11625_s5 + $0x3b8] sm:$0xff] }
 0x43f   :  { %v2456_v12 = vld [vmem:[%s11625_s5 + $0x3f8] sm:$0xff]  ;;  %v7452_v15 = vcombine.high %v2453_v8, %v2455_v9  ;;  %v7451_v21 = vcombine.low %v2453_v8, %v2455_v9 }
 0x440   :  { %1894 = vmatmul.mubr.bf16.vlgmr.msra.gmra.mxu1 %v10613_v11  ;;  %1947 = vmatmul.mubr.bf16.vlgmr.msra.gmra.mxu0 %v10613_v11  ;;  %v7454_v16 = vcombine.high %v2454_v10, %v2456_v12  ;;  %v7453_v22 = vcombine.low %v2454_v10, %v2456_v12 }
 0x441   :  { %2240 = vmatpush1.bf16.msra.mxu1 %v7403_v17  ;;  %2293 = vmatpush1.bf16.msra.mxu0 %v7405_v18  ;;  %v2449_v17 = vld [vmem:[%s11625_s5 + $0x330] sm:$0xff] }
 0x442   :  { %2241 = vmatprep.subr.bf16.mxu1 %v7400_v19  ;;  %2294 = vmatprep.subr.bf16.mxu0 %v7402_v20  ;;  %v2451_v18 = vld [vmem:[%s11625_s5 + $0x370] sm:$0xff]  ;;  %v2450_v19 = vld [vmem:[%s11625_s5 + $0x338] sm:$0xff] }
 0x443   :  { %1903 = vmatprep.mubr.bf16.mxu1 %v10115_v53  ;;  %1956 = vmatprep.mubr.bf16.mxu0 %v10115_v53  ;;  %v2452_v20 = vld [vmem:[%s11625_s5 + $0x378] sm:$0xff]  ;;  %v7448_v23 = vcombine.high %v2449_v17, %v2451_v18  ;;  %v7447_v29 = vcombine.low %v2449_v17, %v2451_v18 }
 0x444   :  { %v7450_v24 = vcombine.high %v2450_v19, %v2452_v20  ;;  %v7449_v30 = vcombine.low %v2450_v19, %v2452_v20 }
 0x445   :  { %2242 = vmatpush1.bf16.msra.mxu1 %v7399_v25  ;;  %2295 = vmatpush1.bf16.msra.mxu0 %v7401_v26  ;;  %v2445_v25 = vld [vmem:[%s11625_s5 + $0x2b0] sm:$0xff] }
 0x446   :  { %2243 = vmatprep.subr.bf16.mxu1 %v7396_v27  ;;  %2296 = vmatprep.subr.bf16.mxu0 %v7398_v28  ;;  %v2447_v26 = vld [vmem:[%s11625_s5 + $0x2f0] sm:$0xff]  ;;  %v2446_v27 = vld [vmem:[%s11625_s5 + $0x2b8] sm:$0xff] }
 0x447   :  { %v2448_v28 = vld [vmem:[%s11625_s5 + $0x2f8] sm:$0xff]  ;;  %v7444_v32 = vcombine.high %v2445_v25, %v2447_v26  ;;  %v7443_v41 = vcombine.low %v2445_v25, %v2447_v26 }
 0x448   :  { %1904 = vmatmul.mubr.bf16.gmra.mxu1 %v10643_v31  ;;  %1957 = vmatmul.mubr.bf16.gmra.mxu0 %v10643_v31  ;;  %v7446_v33 = vcombine.high %v2446_v27, %v2448_v28  ;;  %v7445_v42 = vcombine.low %v2446_v27, %v2448_v28 }
 0x449   :  { %2244 = vmatpush1.bf16.msra.mxu1 %v7395_v35  ;;  %2297 = vmatpush1.bf16.msra.mxu0 %v7397_v36  ;;  %v2441_v35 = vld [vmem:[%s11625_s5 + $0x230] sm:$0xff] }
 0x44a   :  { %2245 = vmatprep.subr.bf16.mxu1 %v7392_v38  ;;  %2298 = vmatprep.subr.bf16.mxu0 %v7394_v40  ;;  %v2443_v36 = vld [vmem:[%s11625_s5 + $0x270] sm:$0xff]  ;;  %v2442_v38 = vld [vmem:[%s11625_s5 + $0x238] sm:$0xff] }
 0x44b   :  { %2271 = vmatprep.mubr.bf16.mxu1 %v10115_v53  ;;  %2324 = vmatprep.mubr.bf16.mxu0 %v10115_v53  ;;  %v2444_v40 = vld [vmem:[%s11625_s5 + $0x278] sm:$0xff]  ;;  %v7440_v43 = vcombine.high %v2441_v35, %v2443_v36  ;;  %v7439_v49 = vcombine.low %v2441_v35, %v2443_v36 }
 0x44c   :  { %v7442_v44 = vcombine.high %v2442_v38, %v2444_v40  ;;  %v7441_v50 = vcombine.low %v2442_v38, %v2444_v40 }
 0x44d   :  { %2246 = vmatpush1.bf16.msra.mxu1 %v7391_v45  ;;  %2299 = vmatpush1.bf16.msra.mxu0 %v7393_v46  ;;  %v2437_v45 = vld [vmem:[%s11625_s5 + $0x1b0] sm:$0xff] }
 0x44e   :  { %2247 = vmatprep.subr.bf16.mxu1 %v7388_v47  ;;  %2300 = vmatprep.subr.bf16.mxu0 %v7390_v48  ;;  %v2439_v46 = vld [vmem:[%s11625_s5 + $0x1f0] sm:$0xff]  ;;  %v2438_v47 = vld [vmem:[%s11625_s5 + $0x1b8] sm:$0xff] }
 0x44f   :  { %v2440_v48 = vld [vmem:[%s11625_s5 + $0x1f8] sm:$0xff]  ;;  %v7436_v51 = vcombine.high %v2437_v45, %v2439_v46  ;;  %v7435_v0 = vcombine.low %v2437_v45, %v2439_v46 }
 0x450   :  { %v7438_v54 = vcombine.high %v2438_v47, %v2440_v48  ;;  %v7437_v1 = vcombine.low %v2438_v47, %v2440_v48 }
 0x451   :  { %2248 = vmatpush1.bf16.msra.mxu1 %v7387_v55  ;;  %2301 = vmatpush1.bf16.msra.mxu0 %v7389_v60  ;;  %v2433_v55 = vld [vmem:[%s11625_s5 + $0x130] sm:$0xff] }
 0x452   :  { %2249 = vmatprep.subr.bf16.mxu1 %v7384_v2  ;;  %2302 = vmatprep.subr.bf16.mxu0 %v7386_v57  ;;  %v2435_v60 = vld [vmem:[%s11625_s5 + $0x170] sm:$0xff]  ;;  %v2434_v2 = vld [vmem:[%s11625_s5 + $0x138] sm:$0xff] }
 0x453   :  { %v2436_v57 = vld [vmem:[%s11625_s5 + $0x178] sm:$0xff]  ;;  %v7432_v63 = vcombine.high %v2433_v55, %v2435_v60  ;;  %v7431_v62 = vcombine.low %v2433_v55, %v2435_v60 }
 0x454   :  { %v7434_v3 = vcombine.high %v2434_v2, %v2436_v57  ;;  %v7433_v59 = vcombine.low %v2434_v2, %v2436_v57 }
 0x455   :  { %2250 = vmatpush1.bf16.msra.mxu1 %v7383_v4  ;;  %2303 = vmatpush1.bf16.msra.mxu0 %v7385_v39  ;;  %v2429_v4 = vld [vmem:[%s11625_s5 + $0xb0] sm:$0xff] }
 0x456   :  { %2251 = vmatprep.subr.bf16.mxu1 %v7380_v56  ;;  %2304 = vmatprep.subr.bf16.mxu0 %v7382_v58  ;;  %v2431_v39 = vld [vmem:[%s11625_s5 + $0xf0] sm:$0xff]  ;;  %v2430_v56 = vld [vmem:[%s11625_s5 + $0xb8] sm:$0xff] }
 0x457   :  { %v2432_v58 = vld [vmem:[%s11625_s5 + $0xf8] sm:$0xff]  ;;  %v7428_v61 = vcombine.high %v2429_v4, %v2431_v39  ;;  %v7427_v8 = vcombine.low %v2429_v4, %v2431_v39 }
 0x458   :  { %v7430_v52 = vcombine.high %v2430_v56, %v2432_v58  ;;  %v7429_v9 = vcombine.low %v2430_v56, %v2432_v58 }
 0x459   :  { %2252 = vmatpush1.bf16.msra.mxu1 %v7379_v5  ;;  %2305 = vmatpush1.bf16.msra.mxu0 %v7381_v6  ;;  %v2425_v5 = vld [vmem:[%s11625_s5 + $0x30] sm:$0xff] }
 0x45a   :  { %2253 = vmatprep.subr.bf16.mxu1 %v7376_v7  ;;  %2306 = vmatprep.subr.bf16.mxu0 %v7378_v37  ;;  %v2427_v6 = vld [vmem:[%s11625_s5 + $0x70] sm:$0xff]  ;;  %v2426_v7 = vld [vmem:[%s11625_s5 + $0x38] sm:$0xff] }
 0x45b   :  { %v2428_v37 = vld [vmem:[%s11625_s5 + $0x78] sm:$0xff]  ;;  %v7424_v10 = vcombine.high %v2425_v5, %v2427_v6 }
 0x45c   :  { %v7426_v12 = vcombine.high %v2426_v7, %v2428_v37 }
 0x45d   :  { %2254 = vmatpush1.bf16.msra.mxu1 %v7375_v13  ;;  %2307 = vmatpush1.bf16.msra.mxu0 %v7377_v14  ;;  %v7423_v13 = vcombine.low %v2425_v5, %v2427_v6  ;;  %v7425_v14 = vcombine.low %v2426_v7, %v2428_v37 }
 0x45e   :  { %2617 = vmatprep.subr.bf16.mxu1 %v7452_v15  ;;  %2670 = vmatprep.subr.bf16.mxu0 %v7454_v16 }
 0x460   :  { %2272 = vmatmul.mubr.bf16.vlgmr.msra.gmra.mxu1 %v10613_v11  ;;  %2325 = vmatmul.mubr.bf16.vlgmr.msra.gmra.mxu0 %v10613_v11 }
 0x461   :  { %2618 = vmatpush1.bf16.msra.mxu1 %v7451_v21  ;;  %2671 = vmatpush1.bf16.msra.mxu0 %v7453_v22 }
 0x462   :  { %2619 = vmatprep.subr.bf16.mxu1 %v7448_v23  ;;  %2672 = vmatprep.subr.bf16.mxu0 %v7450_v24 }
 0x463   :  { %2281 = vmatprep.mubr.bf16.mxu1 %v10115_v53  ;;  %2334 = vmatprep.mubr.bf16.mxu0 %v10115_v53 }
 0x465   :  { %2620 = vmatpush1.bf16.msra.mxu1 %v7447_v29  ;;  %2673 = vmatpush1.bf16.msra.mxu0 %v7449_v30 }
 0x466   :  { %2621 = vmatprep.subr.bf16.mxu1 %v7444_v32  ;;  %2674 = vmatprep.subr.bf16.mxu0 %v7446_v33 }
 0x468   :  { %2282 = vmatmul.mubr.bf16.gmra.mxu1 %v10643_v31  ;;  %2335 = vmatmul.mubr.bf16.gmra.mxu0 %v10643_v31 }
 0x469   :  { %2622 = vmatpush1.bf16.msra.mxu1 %v7443_v41  ;;  %2675 = vmatpush1.bf16.msra.mxu0 %v7445_v42  ;;  %v9717_v41 = vld [vmem:[%s11626_s6 + $0x4] ss:$16 sps:$4 sm:$0xff]   ;;  %v9725_v42 = vld [vmem:[%s11626_s6 + $0xc] ss:$16 sps:$4 sm:$0xff]  }
 0x46a   :  { %2623 = vmatprep.subr.bf16.mxu1 %v7440_v43  ;;  %2676 = vmatprep.subr.bf16.mxu0 %v7442_v44 }
 0x46b   :  { %2649 = vmatprep.mubr.bf16.mxu1 %v10115_v53  ;;  %2702 = vmatprep.mubr.bf16.mxu0 %v10115_v53 }
 0x46d   :  { %2624 = vmatpush1.bf16.msra.mxu1 %v7439_v49  ;;  %2677 = vmatpush1.bf16.msra.mxu0 %v7441_v50 }
 0x46e   :  { %2625 = vmatprep.subr.bf16.mxu1 %v7436_v51  ;;  %2678 = vmatprep.subr.bf16.mxu0 %v7438_v54 }
 0x471   :  { %2626 = vmatpush1.bf16.msra.mxu1 %v7435_v0  ;;  %2679 = vmatpush1.bf16.msra.mxu0 %v7437_v1 }
 0x472   :  { %2627 = vmatprep.subr.bf16.mxu1 %v7432_v63  ;;  %2680 = vmatprep.subr.bf16.mxu0 %v7434_v3 }
 0x475   :  { %2628 = vmatpush1.bf16.msra.mxu1 %v7431_v62  ;;  %2681 = vmatpush1.bf16.msra.mxu0 %v7433_v59 }
 0x476   :  { %2629 = vmatprep.subr.bf16.mxu1 %v7428_v61  ;;  %2682 = vmatprep.subr.bf16.mxu0 %v7430_v52 }
 0x479   :  { %2630 = vmatpush1.bf16.msra.mxu1 %v7427_v8  ;;  %2683 = vmatpush1.bf16.msra.mxu0 %v7429_v9 }
 0x47a   :  { %2631 = vmatprep.subr.bf16.mxu1 %v7424_v10  ;;  %2684 = vmatprep.subr.bf16.mxu0 %v7426_v12 }
 0x47d   :  { %2632 = vmatpush1.bf16.msra.mxu1 %v7423_v13  ;;  %2685 = vmatpush1.bf16.msra.mxu0 %v7425_v14 }
 0x480   :  { %2650 = vmatmul.mubr.bf16.vlgmr.msra.gmra.mxu1 %v10613_v11  ;;  %2703 = vmatmul.mubr.bf16.vlgmr.msra.gmra.mxu0 %v10613_v11 }
 0x481   :  { %2659 = vmatprep.mubr.bf16.mxu1 %v10115_v53  ;;  %2712 = vmatprep.mubr.bf16.mxu0 %v10115_v53 }
 0x488   :  { %2660 = vmatmul.mubr.bf16.gmra.mxu1 %v10643_v31  ;;  %2713 = vmatmul.mubr.bf16.gmra.mxu0 %v10643_v31 }
 0x489   :  { %3287 = vmatprep.mubr.bf16.mxu1 %v9717_v41  ;;  %3384 = vmatprep.mubr.bf16.mxu0 %v9725_v42 }
 0x4e0   :  { %v1517_v15 = vpop.f32.mrf.mxu1  ;;  %v1570_v16 = vpop.f32.mrf.mxu0 }
 0x4e2   :  { %v1519_v17 = vpop.f32.mrf.mxu1  ;;  %v1572_v18 = vpop.f32.mrf.mxu0 }
 0x4e4   :  { %v1521_v19 = vpop.f32.mrf.mxu1  ;;  %v1574_v20 = vpop.f32.mrf.mxu0 }
 0x4e5   :  { %v8256_v21 = vpack.c.bf16 %v1521_v19, %v1517_v15  ;;  %v8276_v22 = vpack.c.bf16 %v1574_v20, %v1570_v16 }
 0x4e6   :  { %v1523_v23 = vpop.f32.mrf.mxu1  ;;  %v1576_v24 = vpop.f32.mrf.mxu0 }
 0x4e7   :  { %8257 = vst [vmem:[#allocation2] sm:$0xff] %v8256_v21   ;;  %8863 = vst [vmem:[#allocation2 + $0x20] sm:$0xff] %v8276_v22   ;;  %v8266_v11 = vpack.c.bf16 %v1523_v23, %v1519_v17  ;;  %v8286_v25 = vpack.c.bf16 %v1576_v24, %v1572_v18 }
 0x4e8   :  { %v1527_v26 = vpop.f32.mrf.mxu1  ;;  %v1580_v27 = vpop.f32.mrf.mxu0 }
 0x4e9   :  { %8861 = vst [vmem:[#allocation2 + $0x10] sm:$0xff] %v8266_v11   ;;  %8865 = vst [vmem:[#allocation2 + $0x30] sm:$0xff] %v8286_v25  }
 0x4ea   :  { %v1529_v28 = vpop.f32.mrf.mxu1  ;;  %v1582_v31 = vpop.f32.mrf.mxu0 }
 0x4ec   :  { %v1531_v29 = vpop.f32.mrf.mxu1  ;;  %v1584_v30 = vpop.f32.mrf.mxu0 }
 0x4ed   :  { %v8261_v32 = vpack.c.bf16 %v1531_v29, %v1527_v26  ;;  %v8281_v33 = vpack.c.bf16 %v1584_v30, %v1580_v27 }
 0x4ee   :  { %v1533_v35 = vpop.f32.mrf.mxu1  ;;  %v1586_v36 = vpop.f32.mrf.mxu0  ;;  %v9693_v18 = vld [vmem:[#allocation2 + $0x20] sm:$0xff]  }
 0x4ef   :  { %8860 = vst [vmem:[#allocation2 + $0x8] sm:$0xff] %v8261_v32   ;;  %8864 = vst [vmem:[#allocation2 + $0x28] sm:$0xff] %v8281_v33   ;;  %v8271_v38 = vpack.c.bf16 %v1533_v35, %v1529_v28  ;;  %v8291_v40 = vpack.c.bf16 %v1586_v36, %v1582_v31 }
 0x4f0   :  { %v9689_v6 = vld [vmem:[#allocation2 + $0x30] sm:$0xff]  }
 0x4f1   :  { %8862 = vst [vmem:[#allocation2 + $0x18] sm:$0xff] %v8271_v38   ;;  %8866 = vst [vmem:[#allocation2 + $0x38] sm:$0xff] %v8291_v40   ;;  %v9697_v33 = vld [vmem:[#allocation2 + $0x10] sm:$0xff]  }
 0x4f6   :  { %v9691_v9 = vld [vmem:[#allocation2 + $0x28] sm:$0xff]  }
 0x4f7   :  { %v9699_v42 = vld [vmem:[#allocation2 + $0x8] sm:$0xff]  }
 0x4f8   :  { %v9687_v52 = vld [vmem:[#allocation2 + $0x38] sm:$0xff]  }
 0x4f9   :  { %v9695_v25 = vld [vmem:[#allocation2 + $0x18] sm:$0xff]  }
 0x500   :  { %v1895_v43 = vpop.f32.mrf.mxu1  ;;  %v1948_v44 = vpop.f32.mrf.mxu0 }
 0x502   :  { %v1897_v45 = vpop.f32.mrf.mxu1  ;;  %v1950_v46 = vpop.f32.mrf.mxu0 }
 0x504   :  { %v1899_v47 = vpop.f32.mrf.mxu1  ;;  %v1952_v48 = vpop.f32.mrf.mxu0 }
 0x505   :  { %v8296_v49 = vpack.c.bf16 %v1899_v47, %v1895_v43  ;;  %v8316_v50 = vpack.c.bf16 %v1952_v48, %v1948_v44  ;;  %v9768_v44 = vld [vmem:[%s11627_s7 + $0xe4] ss:$16 sps:$4 sm:$0xff]   ;;  %v9766_v48 = vld [vmem:[%s11627_s7 + $0xe0] ss:$16 sps:$4 sm:$0xff]  }
 0x506   :  { %v1901_v51 = vpop.f32.mrf.mxu1  ;;  %v1954_v54 = vpop.f32.mrf.mxu0  ;;  %v9721_v47 = vld [vmem:[%s11626_s6 + $0x24] ss:$16 sps:$4 sm:$0xff]  }
 0x507   :  { %8867 = vst [vmem:[#allocation2 + $0x40] sm:$0xff] %v8296_v49   ;;  %8871 = vst [vmem:[#allocation2 + $0x60] sm:$0xff] %v8316_v50   ;;  %v8306_v55 = vpack.c.bf16 %v1901_v51, %v1897_v45  ;;  %v8326_v60 = vpack.c.bf16 %v1954_v54, %v1950_v46  ;;  %v9701_v45 = vld [vmem:[#allocation2] sm:$0xff]  }
 0x508   :  { %v1905_v2 = vpop.f32.mrf.mxu1  ;;  %v1958_v57 = vpop.f32.mrf.mxu0  ;;  %v9715_v46 = vld [vmem:[%s11626_s6] ss:$16 sps:$4 sm:$0xff]   ;;  %v9774_v49 = vld [vmem:[%s11627_s7 + $0xc4] ss:$16 sps:$4 sm:$0xff]  }
 0x509   :  { %8869 = vst [vmem:[#allocation2 + $0x50] sm:$0xff] %v8306_v55   ;;  %8873 = vst [vmem:[#allocation2 + $0x70] sm:$0xff] %v8326_v60   ;;  %v9772_v50 = vld [vmem:[%s11627_s7 + $0xc0] ss:$16 sps:$4 sm:$0xff]   ;;  %v9780_v51 = vld [vmem:[%s11627_s7 + $0xa4] ss:$16 sps:$4 sm:$0xff]  }
 0x50a   :  { %v1907_v0 = vpop.f32.mrf.mxu1  ;;  %v1960_v1 = vpop.f32.mrf.mxu0  ;;  %v9726_v54 = vld [vmem:[%s11626_s6 + $0x20] ss:$16 sps:$4 sm:$0xff]   ;;  %v9727_v55 = vld [vmem:[%s11626_s6 + $0x44] ss:$16 sps:$4 sm:$0xff]  }
 0x50b   :  { %v9778_v60 = vld [vmem:[%s11627_s7 + $0xa0] ss:$16 sps:$4 sm:$0xff]  }
 0x50c   :  { %v1909_v63 = vpop.f32.mrf.mxu1  ;;  %v1962_v3 = vpop.f32.mrf.mxu0 }
 0x50d   :  { %v8301_v4 = vpack.c.bf16 %v1909_v63, %v1905_v2  ;;  %v8321_v39 = vpack.c.bf16 %v1962_v3, %v1958_v57 }
 0x50e   :  { %v1911_v56 = vpop.f32.mrf.mxu1  ;;  %v1964_v58 = vpop.f32.mrf.mxu0  ;;  %v9692_v13 = vld [vmem:[#allocation2 + $0x60] sm:$0xff]  }
 0x50f   :  { %8868 = vst [vmem:[#allocation2 + $0x48] sm:$0xff] %v8301_v4   ;;  %8872 = vst [vmem:[#allocation2 + $0x68] sm:$0xff] %v8321_v39   ;;  %v8311_v62 = vpack.c.bf16 %v1911_v56, %v1907_v0  ;;  %v8331_v59 = vpack.c.bf16 %v1964_v58, %v1960_v1  ;;  %v9700_v43 = vld [vmem:[#allocation2 + $0x40] sm:$0xff]  }
 0x510   :  { %v9688_v5 = vld [vmem:[#allocation2 + $0x70] sm:$0xff]  }
 0x511   :  { %8870 = vst [vmem:[#allocation2 + $0x58] sm:$0xff] %v8311_v62   ;;  %8874 = vst [vmem:[#allocation2 + $0x78] sm:$0xff] %v8331_v59   ;;  %v9696_v28 = vld [vmem:[#allocation2 + $0x50] sm:$0xff]  }
 0x512   :  { %v9731_v62 = vld [vmem:[%s11626_s6 + $0x40] ss:$16 sps:$4 sm:$0xff]  }
 0x516   :  { %v9690_v7 = vld [vmem:[#allocation2 + $0x68] sm:$0xff]  }
 0x517   :  { %v9698_v38 = vld [vmem:[#allocation2 + $0x48] sm:$0xff]  }
 0x518   :  { %v9686_v61 = vld [vmem:[#allocation2 + $0x78] sm:$0xff]  }
 0x519   :  { %9076 = vmatprep.subr.bf16.mxu1 %v9686_v61  ;;  %v9694_v21 = vld [vmem:[#allocation2 + $0x58] sm:$0xff]  }
 0x51a   :  { %9077 = vmatpush3.bf16.msra.mxu1 %v9687_v52  ;;  %v9733_v52 = vld [vmem:[%s11626_s6 + $0x64] ss:$16 sps:$4 sm:$0xff]  }
 0x51b   :  { %9078 = vmatprep.subr.bf16.mxu1 %v9688_v5 }
 0x51e   :  { %9079 = vmatpush3.bf16.msra.mxu1 %v9689_v6 }
 0x51f   :  { %9080 = vmatprep.subr.bf16.mxu1 %v9690_v7 }
 0x520   :  { %v2273_v37 = vpop.f32.mrf.mxu1  ;;  %v2326_v8 = vpop.f32.mrf.mxu0 }
 0x522   :  { %v2275_v10 = vpop.f32.mrf.mxu1  ;;  %v2328_v12 = vpop.f32.mrf.mxu0  ;;  %9081 = vmatpush3.bf16.msra.mxu1 %v9691_v9 }
 0x523   :  { %9082 = vmatprep.subr.bf16.mxu1 %v9692_v13 }
 0x524   :  { %v2277_v14 = vpop.f32.mrf.mxu1  ;;  %v2330_v15 = vpop.f32.mrf.mxu0 }
 0x525   :  { %v8336_v16 = vpack.c.bf16 %v2277_v14, %v2273_v37  ;;  %v8356_v17 = vpack.c.bf16 %v2330_v15, %v2326_v8  ;;  %v9737_v15 = vld [vmem:[%s11626_s6 + $0x60] ss:$16 sps:$4 sm:$0xff]  }
 0x526   :  { %v2279_v19 = vpop.f32.mrf.mxu1  ;;  %v2332_v20 = vpop.f32.mrf.mxu0  ;;  %9083 = vmatpush3.bf16.msra.mxu1 %v9693_v18  ;;  %v9739_v18 = vld [vmem:[%s11626_s6 + $0x84] ss:$16 sps:$4 sm:$0xff]  }
 0x527   :  { %8875 = vst [vmem:[#allocation2 + $0x80] sm:$0xff] %v8336_v16   ;;  %8879 = vst [vmem:[#allocation2 + $0xa0] sm:$0xff] %v8356_v17   ;;  %v8346_v22 = vpack.c.bf16 %v2279_v19, %v2275_v10  ;;  %v8366_v23 = vpack.c.bf16 %v2332_v20, %v2328_v12  ;;  %9084 = vmatprep.subr.bf16.mxu1 %v9694_v21  ;;  %v9743_v19 = vld [vmem:[%s11626_s6 + $0x80] ss:$16 sps:$4 sm:$0xff]   ;;  %v9745_v20 = vld [vmem:[%s11626_s6 + $0xa4] ss:$16 sps:$4 sm:$0xff]  }
 0x528   :  { %v2283_v24 = vpop.f32.mrf.mxu1  ;;  %v2336_v11 = vpop.f32.mrf.mxu0 }
 0x529   :  { %8877 = vst [vmem:[#allocation2 + $0x90] sm:$0xff] %v8346_v22   ;;  %8881 = vst [vmem:[#allocation2 + $0xb0] sm:$0xff] %v8366_v23  }
 0x52a   :  { %v2285_v26 = vpop.f32.mrf.mxu1  ;;  %v2338_v27 = vpop.f32.mrf.mxu0  ;;  %9085 = vmatpush3.bf16.msra.mxu1 %v9695_v25  ;;  %v9749_v25 = vld [vmem:[%s11626_s6 + $0xa0] ss:$16 sps:$4 sm:$0xff]  }
 0x52b   :  { %9086 = vmatprep.subr.bf16.mxu1 %v9696_v28 }
 0x52c   :  { %v2287_v31 = vpop.f32.mrf.mxu1  ;;  %v2340_v29 = vpop.f32.mrf.mxu0 }
 0x52d   :  { %v8341_v30 = vpack.c.bf16 %v2287_v31, %v2283_v24  ;;  %v8361_v32 = vpack.c.bf16 %v2340_v29, %v2336_v11 }
 0x52e   :  { %v2289_v35 = vpop.f32.mrf.mxu1  ;;  %v2342_v36 = vpop.f32.mrf.mxu0  ;;  %9087 = vmatpush3.bf16.msra.mxu1 %v9697_v33  ;;  %v9709_v31 = vld [vmem:[#allocation2 + $0xa0] sm:$0xff]  }
 0x52f   :  { %8876 = vst [vmem:[#allocation2 + $0x88] sm:$0xff] %v8341_v30   ;;  %8880 = vst [vmem:[#allocation2 + $0xa8] sm:$0xff] %v8361_v32   ;;  %v8351_v40 = vpack.c.bf16 %v2289_v35, %v2285_v26  ;;  %v8371_v41 = vpack.c.bf16 %v2342_v36, %v2338_v27  ;;  %9088 = vmatprep.subr.bf16.mxu1 %v9698_v38  ;;  %v9751_v26 = vld [vmem:[%s11626_s6 + $0xc4] ss:$16 sps:$4 sm:$0xff]   ;;  %v9755_v30 = vld [vmem:[%s11626_s6 + $0xc0] ss:$16 sps:$4 sm:$0xff]  }
 0x530   :  { %v9705_v24 = vld [vmem:[#allocation2 + $0xb0] sm:$0xff]  }
 0x531   :  { %8878 = vst [vmem:[#allocation2 + $0x98] sm:$0xff] %v8351_v40   ;;  %8882 = vst [vmem:[#allocation2 + $0xb8] sm:$0xff] %v8371_v41   ;;  %v9757_v32 = vld [vmem:[%s11626_s6 + $0xe4] ss:$16 sps:$4 sm:$0xff]   ;;  %v9761_v40 = vld [vmem:[%s11626_s6 + $0xe0] ss:$16 sps:$4 sm:$0xff]  }
 0x532   :  { %9089 = vmatpush3.bf16.msra.mxu1 %v9699_v42  ;;  %v9713_v36 = vld [vmem:[#allocation2 + $0x90] sm:$0xff]  }
 0x533   :  { %9090 = vmatprep.subr.bf16.mxu1 %v9700_v43  ;;  %v9771_v43 = vld [vmem:[%s11627_s7 + $0xec] ss:$16 sps:$4 sm:$0xff]  }
 0x536   :  { %9091 = vmatpush3.bf16.msra.mxu1 %v9701_v45  ;;  %v9707_v27 = vld [vmem:[#allocation2 + $0xa8] sm:$0xff]  }
 0x537   :  { %3569 = vmatprep.subr.bf16.mxu1 %v9768_v44  ;;  %v9718_v41 = vld [vmem:[#allocation2 + $0x88] sm:$0xff]   ;;  %v9720_v44 = vld [vmem:[#allocation2 + $0x80] sm:$0xff]  }
 0x538   :  { %v9703_v22 = vld [vmem:[#allocation2 + $0xb8] sm:$0xff]  }
 0x539   :  { %3288 = vmatmul.mubr.bf16.vlgmr.msra.gmra.mxu1 %v9715_v46  ;;  %v9711_v33 = vld [vmem:[#allocation2 + $0x98] sm:$0xff]  }
 0x53a   :  { %3295 = vmatprep.mubr.bf16.mxu1 %v9721_v47  ;;  %3570 = vmatpush1.bf16.msra.mxu1 %v9766_v48  ;;  %v9723_v45 = vld [vmem:[%s11626_s6 + $0x8] ss:$16 sps:$4 sm:$0xff]   ;;  %v9729_v46 = vld [vmem:[%s11626_s6 + $0x2c] ss:$16 sps:$4 sm:$0xff]  }
 0x53b   :  { %3571 = vmatprep.subr.bf16.mxu1 %v9774_v49  ;;  %v9769_v47 = vld [vmem:[%s11627_s7 + $0xe8] ss:$16 sps:$4 sm:$0xff]   ;;  %v9777_v48 = vld [vmem:[%s11627_s7 + $0xcc] ss:$16 sps:$4 sm:$0xff]  }
 0x53c   :  { %v9775_v49 = vld [vmem:[%s11627_s7 + $0xc8] ss:$16 sps:$4 sm:$0xff]  }
 0x53e   :  { %3572 = vmatpush1.bf16.msra.mxu1 %v9772_v50  ;;  %v9783_v50 = vld [vmem:[%s11627_s7 + $0xac] ss:$16 sps:$4 sm:$0xff]  }
 0x53f   :  { %3573 = vmatprep.subr.bf16.mxu1 %v9780_v51  ;;  %v9732_v51 = vld [vmem:[%s11626_s6 + $0x28] ss:$16 sps:$4 sm:$0xff]  }
 0x540   :  { %v2651_v2 = vpop.f32.mrf.mxu1  ;;  %v2704_v57 = vpop.f32.mrf.mxu0 }
 0x541   :  { %3296 = vmatmul.mubr.bf16.gmra.mxu1 %v9726_v54  ;;  %v9735_v54 = vld [vmem:[%s11626_s6 + $0x4c] ss:$16 sps:$4 sm:$0xff]  }
 0x542   :  { %v2653_v0 = vpop.f32.mrf.mxu1  ;;  %v2706_v1 = vpop.f32.mrf.mxu0  ;;  %3303 = vmatprep.mubr.bf16.mxu1 %v9727_v55  ;;  %3574 = vmatpush1.bf16.msra.mxu1 %v9778_v60  ;;  %v9781_v55 = vld [vmem:[%s11627_s7 + $0xa8] ss:$16 sps:$4 sm:$0xff]   ;;  %v9784_v60 = vld [vmem:[%s11627_s7 + $0x80] ss:$16 sps:$4 sm:$0xff]  }
 0x544   :  { %v2655_v63 = vpop.f32.mrf.mxu1  ;;  %v2708_v3 = vpop.f32.mrf.mxu0 }
 0x545   :  { %v8376_v4 = vpack.c.bf16 %v2655_v63, %v2651_v2  ;;  %v8396_v39 = vpack.c.bf16 %v2708_v3, %v2704_v57  ;;  %v9786_v2 = vld [vmem:[%s11627_s7 + $0x84] ss:$16 sps:$4 sm:$0xff]   ;;  %v9789_v57 = vld [vmem:[%s11627_s7 + $0x8c] ss:$16 sps:$4 sm:$0xff]  }
 0x546   :  { %v2657_v56 = vpop.f32.mrf.mxu1  ;;  %v2710_v58 = vpop.f32.mrf.mxu0  ;;  %3575 = vmatprep.subr.bf16.mxu1 %v9786_v2  ;;  %v9792_v63 = vld [vmem:[%s11627_s7 + $0x64] ss:$16 sps:$4 sm:$0xff]   ;;  %v9795_v3 = vld [vmem:[%s11627_s7 + $0x6c] ss:$16 sps:$4 sm:$0xff]  }
 0x547   :  { %8883 = vst [vmem:[#allocation2 + $0xc0] sm:$0xff] %v8376_v4   ;;  %8887 = vst [vmem:[#allocation2 + $0xe0] sm:$0xff] %v8396_v39   ;;  %v8386_v59 = vpack.c.bf16 %v2657_v56, %v2653_v0  ;;  %v8406_v61 = vpack.c.bf16 %v2710_v58, %v2706_v1  ;;  %3576 = vmatpush1.bf16.msra.mxu1 %v9784_v60  ;;  %v9787_v0 = vld [vmem:[%s11627_s7 + $0x88] ss:$16 sps:$4 sm:$0xff]   ;;  %v9790_v1 = vld [vmem:[%s11627_s7 + $0x60] ss:$16 sps:$4 sm:$0xff]  }
 0x548   :  { %v2661_v5 = vpop.f32.mrf.mxu1  ;;  %v2714_v6 = vpop.f32.mrf.mxu0  ;;  %3577 = vmatprep.subr.bf16.mxu1 %v9792_v63  ;;  %v9738_v4 = vld [vmem:[%s11626_s6 + $0x48] ss:$16 sps:$4 sm:$0xff]   ;;  %v9741_v39 = vld [vmem:[%s11626_s6 + $0x6c] ss:$16 sps:$4 sm:$0xff]  }
 0x549   :  { %8885 = vst [vmem:[#allocation2 + $0xd0] sm:$0xff] %v8386_v59   ;;  %8889 = vst [vmem:[#allocation2 + $0xf0] sm:$0xff] %v8406_v61   ;;  %3304 = vmatmul.mubr.bf16.gmra.mxu1 %v9731_v62  ;;  %v9793_v56 = vld [vmem:[%s11627_s7 + $0x68] ss:$16 sps:$4 sm:$0xff]   ;;  %v9747_v62 = vld [vmem:[%s11626_s6 + $0x8c] ss:$16 sps:$4 sm:$0xff]  }
 0x54a   :  { %v2663_v7 = vpop.f32.mrf.mxu1  ;;  %v2716_v37 = vpop.f32.mrf.mxu0  ;;  %3311 = vmatprep.mubr.bf16.mxu1 %v9733_v52  ;;  %v9744_v58 = vld [vmem:[%s11626_s6 + $0x68] ss:$16 sps:$4 sm:$0xff]   ;;  %v9753_v61 = vld [vmem:[%s11626_s6 + $0xac] ss:$16 sps:$4 sm:$0xff]  }
 0x54b   :  { %3578 = vmatpush1.bf16.msra.mxu1 %v9790_v1  ;;  %v9750_v59 = vld [vmem:[%s11626_s6 + $0x88] ss:$16 sps:$4 sm:$0xff]  }
 0x54c   :  { %v2665_v8 = vpop.f32.mrf.mxu1  ;;  %v2718_v9 = vpop.f32.mrf.mxu0  ;;  %v9756_v52 = vld [vmem:[%s11626_s6 + $0xa8] ss:$16 sps:$4 sm:$0xff]  }
 0x54d   :  { %v8381_v10 = vpack.c.bf16 %v2665_v8, %v2661_v5  ;;  %v8401_v12 = vpack.c.bf16 %v2718_v9, %v2714_v6  ;;  %v9759_v5 = vld [vmem:[%s11626_s6 + $0xcc] ss:$16 sps:$4 sm:$0xff]   ;;  %v9762_v6 = vld [vmem:[%s11626_s6 + $0xc8] ss:$16 sps:$4 sm:$0xff]   ;;  %v9798_v8 = vld [vmem:[%s11627_s7 + $0x44] ss:$16 sps:$4 sm:$0xff]  }
 0x54e   :  { %v2667_v13 = vpop.f32.mrf.mxu1  ;;  %v2720_v14 = vpop.f32.mrf.mxu0  ;;  %v9708_v28 = vld [vmem:[#allocation2 + $0xe0] sm:$0xff]   ;;  %v9801_v9 = vld [vmem:[%s11627_s7 + $0x4c] ss:$16 sps:$4 sm:$0xff]   ;;  %3579 = vmatprep.subr.bf16.mxu1 %v9798_v8 }
 0x54f   :  { %8884 = vst [vmem:[#allocation2 + $0xc8] sm:$0xff] %v8381_v10   ;;  %8888 = vst [vmem:[#allocation2 + $0xe8] sm:$0xff] %v8401_v12   ;;  %v8391_v16 = vpack.c.bf16 %v2667_v13, %v2663_v7  ;;  %v8411_v17 = vpack.c.bf16 %v2720_v14, %v2716_v37  ;;  %v9719_v42 = vld [vmem:[#allocation2 + $0xc0] sm:$0xff]   ;;  %v9763_v7 = vld [vmem:[%s11626_s6 + $0xec] ss:$16 sps:$4 sm:$0xff]  }
 0x550   :  { %v9704_v23 = vld [vmem:[#allocation2 + $0xf0] sm:$0xff]   ;;  %v9765_v37 = vld [vmem:[%s11626_s6 + $0xe8] ss:$16 sps:$4 sm:$0xff]   ;;  %v9807_v14 = vld [vmem:[%s11627_s7 + $0x2c] ss:$16 sps:$4 sm:$0xff]  }
 0x551   :  { %8886 = vst [vmem:[#allocation2 + $0xd8] sm:$0xff] %v8391_v16   ;;  %8890 = vst [vmem:[#allocation2 + $0xf8] sm:$0xff] %v8411_v17   ;;  %3312 = vmatmul.mubr.bf16.gmra.mxu1 %v9737_v15  ;;  %v9712_v35 = vld [vmem:[#allocation2 + $0xd0] sm:$0xff]   ;;  %v9799_v12 = vld [vmem:[%s11627_s7 + $0x48] ss:$16 sps:$4 sm:$0xff]  }
 0x552   :  { %3319 = vmatprep.mubr.bf16.mxu1 %v9739_v18  ;;  %v9796_v10 = vld [vmem:[%s11627_s7 + $0x40] ss:$16 sps:$4 sm:$0xff]   ;;  %v9804_v13 = vld [vmem:[%s11627_s7 + $0x24] ss:$16 sps:$4 sm:$0xff]   ;;  %v9805_v16 = vld [vmem:[%s11627_s7 + $0x28] ss:$16 sps:$4 sm:$0xff]  }
 0x553   :  { %3580 = vmatpush1.bf16.msra.mxu1 %v9796_v10  ;;  %v9802_v15 = vld [vmem:[%s11627_s7 + $0x20] ss:$16 sps:$4 sm:$0xff]   ;;  %v9810_v17 = vld [vmem:[%s11627_s7 + $0x4] ss:$16 sps:$4 sm:$0xff]   ;;  %v9813_v18 = vld [vmem:[%s11627_s7 + $0xc] ss:$16 sps:$4 sm:$0xff]  }
 0x554   :  { %3581 = vmatprep.subr.bf16.mxu1 %v9804_v13 }
 0x556   :  { %v9706_v11 = vld [vmem:[#allocation2 + $0xe8] sm:$0xff]  }
 0x557   :  { %v9714_v38 = vld [vmem:[#allocation2 + $0xc8] sm:$0xff]   ;;  %3582 = vmatpush1.bf16.msra.mxu1 %v9802_v15 }
 0x558   :  { %v9702_v21 = vld [vmem:[#allocation2 + $0xf8] sm:$0xff]   ;;  %3583 = vmatprep.subr.bf16.mxu1 %v9810_v17 }
 0x559   :  { %9140 = vmatprep.subr.bf16.mxu0 %v9702_v21  ;;  %3320 = vmatmul.mubr.bf16.gmra.mxu1 %v9743_v19  ;;  %v9710_v29 = vld [vmem:[#allocation2 + $0xd8] sm:$0xff]   ;;  %v9808_v19 = vld [vmem:[%s11627_s7] ss:$16 sps:$4 sm:$0xff]  }
 0x55a   :  { %9141 = vmatpush3.bf16.msra.mxu0 %v9703_v22  ;;  %3327 = vmatprep.mubr.bf16.mxu1 %v9745_v20  ;;  %v9811_v20 = vld [vmem:[%s11627_s7 + $0x8] ss:$16 sps:$4 sm:$0xff]  }
 0x55b   :  { %9142 = vmatprep.subr.bf16.mxu0 %v9704_v23  ;;  %3584 = vmatpush1.bf16.msra.mxu1 %v9808_v19 }
 0x55e   :  { %9143 = vmatpush3.bf16.msra.mxu0 %v9705_v24 }
 0x55f   :  { %9144 = vmatprep.subr.bf16.mxu0 %v9706_v11 }
 0x561   :  { %3328 = vmatmul.mubr.bf16.gmra.mxu1 %v9749_v25 }
 0x562   :  { %9145 = vmatpush3.bf16.msra.mxu0 %v9707_v27  ;;  %3335 = vmatprep.mubr.bf16.mxu1 %v9751_v26 }
 0x563   :  { %9146 = vmatprep.subr.bf16.mxu0 %v9708_v28 }
 0x566   :  { %9147 = vmatpush3.bf16.msra.mxu0 %v9709_v31 }
 0x567   :  { %9148 = vmatprep.subr.bf16.mxu0 %v9710_v29 }
 0x569   :  { %3336 = vmatmul.mubr.bf16.gmra.mxu1 %v9755_v30 }
 0x56a   :  { %9149 = vmatpush3.bf16.msra.mxu0 %v9711_v33  ;;  %3343 = vmatprep.mubr.bf16.mxu1 %v9757_v32 }
 0x56b   :  { %9150 = vmatprep.subr.bf16.mxu0 %v9712_v35 }
 0x56e   :  { %9151 = vmatpush3.bf16.msra.mxu0 %v9713_v36 }
 0x56f   :  { %9152 = vmatprep.subr.bf16.mxu0 %v9714_v38 }
 0x571   :  { %3344 = vmatmul.mubr.bf16.gmra.mxu1 %v9761_v40  ;;  %v2901_v40 = vsub.s32 3, %v10293_v34 }
 0x572   :  { %9153 = vmatpush3.bf16.msra.mxu0 %v9718_v41  ;;  %3601 = vmatprep.mubr.bf16.mxu1 %v10115_v53 }
 0x573   :  { %9154 = vmatprep.subr.bf16.mxu0 %v9719_v42 }
 0x576   :  { %9155 = vmatpush3.bf16.msra.mxu0 %v9720_v44 }
 0x577   :  { %3938 = vmatprep.subr.bf16.mxu0 %v9771_v43  ;;  %v10090_v43 = vld [vmem:[%s11633_s13] sm:$0xff] }
 0x578   :  { %v11121_v44 = vrot.slane %v10090_v43, %v2901_v40 }
 0x579   :  { %3385 = vmatmul.mubr.bf16.vlgmr.msra.gmra.mxu0 %v9723_v45 }
 0x57a   :  { %3392 = vmatprep.mubr.bf16.mxu0 %v9729_v46  ;;  %3939 = vmatpush1.bf16.msra.mxu0 %v9769_v47 }
 0x57b   :  { %3940 = vmatprep.subr.bf16.mxu0 %v9777_v48 }
 0x57e   :  { %3941 = vmatpush1.bf16.msra.mxu0 %v9775_v49 }
 0x57f   :  { %3942 = vmatprep.subr.bf16.mxu0 %v9783_v50 }
 0x581   :  { %3393 = vmatmul.mubr.bf16.gmra.mxu0 %v9732_v51 }
 0x582   :  { %3400 = vmatprep.mubr.bf16.mxu0 %v9735_v54  ;;  %3943 = vmatpush1.bf16.msra.mxu0 %v9781_v55 }
 0x583   :  { %3944 = vmatprep.subr.bf16.mxu0 %v9789_v57 }
 0x586   :  { %3945 = vmatpush1.bf16.msra.mxu0 %v9787_v0 }
 0x587   :  { %3946 = vmatprep.subr.bf16.mxu0 %v9795_v3 }
 0x589   :  { %3401 = vmatmul.mubr.bf16.gmra.mxu0 %v9738_v4 }
 0x58a   :  { %3408 = vmatprep.mubr.bf16.mxu0 %v9741_v39  ;;  %3947 = vmatpush1.bf16.msra.mxu0 %v9793_v56 }
 0x58b   :  { %3948 = vmatprep.subr.bf16.mxu0 %v9801_v9 }
 0x58e   :  { %3949 = vmatpush1.bf16.msra.mxu0 %v9799_v12 }
 0x58f   :  { %3950 = vmatprep.subr.bf16.mxu0 %v9807_v14 }
 0x591   :  { %3409 = vmatmul.mubr.bf16.gmra.mxu0 %v9744_v58 }
 0x592   :  { %3416 = vmatprep.mubr.bf16.mxu0 %v9747_v62  ;;  %3951 = vmatpush1.bf16.msra.mxu0 %v9805_v16 }
 0x593   :  { %3952 = vmatprep.subr.bf16.mxu0 %v9813_v18 }
 0x596   :  { %3953 = vmatpush1.bf16.msra.mxu0 %v9811_v20 }
 0x599   :  { %3417 = vmatmul.mubr.bf16.gmra.mxu0 %v9750_v59 }
 0x59a   :  { %3424 = vmatprep.mubr.bf16.mxu0 %v9753_v61 }
 0x5a1   :  { %3425 = vmatmul.mubr.bf16.gmra.mxu0 %v9756_v52 }
 0x5a2   :  { %3432 = vmatprep.mubr.bf16.mxu0 %v9759_v5 }
 0x5a9   :  { %3433 = vmatmul.mubr.bf16.gmra.mxu0 %v9762_v6 }
 0x5aa   :  { %3440 = vmatprep.mubr.bf16.mxu0 %v9763_v7 }
 0x5b1   :  { %3441 = vmatmul.mubr.bf16.gmra.mxu0 %v9765_v37 }
 0x5b2   :  { %3970 = vmatprep.mubr.bf16.mxu0 %v10115_v53 }
 0x5f9   :  { %v9092_v21 = vpop.f32.mrf.mxu1 }
 0x5fb   :  { %v9093_v22 = vpop.f32.mrf.mxu1 }
 0x5fc   :  { %v9094_v45 = vadd.f32 %v9093_v22, %v9092_v21 }
 0x5fd   :  { %v9095_v23 = vpop.f32.mrf.mxu1 }
 0x5fe   :  { %v3290_v51 = vadd.f32 %v9094_v45, %v11121_v44 }
 0x5ff   :  { %v9096_v24 = vpop.f32.mrf.mxu1 }
 0x600   :  { %v9097_v47 = vadd.f32 %v9096_v24, %v9095_v23 }
 0x601   :  { %v9098_v11 = vpop.f32.mrf.mxu1 }
 0x602   :  { %v3293_v55 = vadd.f32 %v9097_v47, %v11121_v44 }
 0x603   :  { %v9099_v25 = vpop.f32.mrf.mxu1 }
 0x604   :  { %v9100_v1 = vadd.f32 %v9099_v25, %v9098_v11 }
 0x605   :  { %v9101_v26 = vpop.f32.mrf.mxu1 }
 0x606   :  { %v3298_v61 = vadd.f32 %v9100_v1, %v11121_v44 }
 0x607   :  { %v9102_v27 = vpop.f32.mrf.mxu1 }
 0x608   :  { %v9103_v39 = vadd.f32 %v9102_v27, %v9101_v26 }
 0x609   :  { %v9104_v28 = vpop.f32.mrf.mxu1 }
 0x60a   :  { %v3301_v6 = vadd.f32 %v9103_v39, %v11121_v44 }
 0x60b   :  { %v9105_v31 = vpop.f32.mrf.mxu1 }
 0x60c   :  { %v9106_v10 = vadd.f32 %v9105_v31, %v9104_v28 }
 0x60d   :  { %v9107_v29 = vpop.f32.mrf.mxu1 }
 0x60e   :  { %v3306_v20 = vadd.f32 %v9106_v10, %v11121_v44 }
 0x60f   :  { %v9108_v30 = vpop.f32.mrf.mxu1 }
 0x610   :  { %v9109_v15 = vadd.f32 %v9108_v30, %v9107_v29 }
 0x611   :  { %v11105_v32 = vpop.f32.mrf.mxu1 }
 0x612   :  { %v3309_v23 = vadd.f32 %v9109_v15, %v11121_v44 }
 0x613   :  { %v11107_v33 = vpop.f32.mrf.mxu1 }
 0x614   :  { %v9112_v27 = vadd.f32 %v11107_v33, %v11105_v32 }
 0x615   :  { %v11109_v35 = vpop.f32.mrf.mxu1 }
 0x617   :  { %v11111_v36 = vpop.f32.mrf.mxu1 }
 0x618   :  { %v9115_v30 = vadd.f32 %v11111_v36, %v11109_v35 }
 0x619   :  { %v11113_v38 = vpop.f32.mrf.mxu1 }
 0x61b   :  { %v11116_v42 = vpop.f32.mrf.mxu1 }
 0x61c   :  { %v9118_v35 = vadd.f32 %v11116_v42, %v11113_v38 }
 0x61d   :  { %v11123_v50 = vpop.f32.mrf.mxu1 }
 0x61f   :  { %v11127_v0 = vpop.f32.mrf.mxu1 }
 0x621   :  { %v11129_v59 = vpop.f32.mrf.mxu1 }
 0x623   :  { %v11135_v9 = vpop.f32.mrf.mxu1 }
 0x625   :  { %v9125_v19 = vpop.f32.mrf.mxu1 }
 0x627   :  { %v9126_v26 = vpop.f32.mrf.mxu1 }
 0x629   :  { %v9128_v45 = vpop.f32.mrf.mxu1 }
 0x62b   :  { %v9129_v33 = vpop.f32.mrf.mxu1 }
 0x639   :  { %v9156_v41 = vpop.f32.mrf.mxu0 }
 0x63b   :  { %v9157_v46 = vpop.f32.mrf.mxu0 }
 0x63c   :  { %v9158_v48 = vadd.f32 %v9157_v46, %v9156_v41  ;;  %v3314_v46 = vadd.f32 %v9112_v27, %v11121_v44 }
 0x63d   :  { %v9159_v49 = vpop.f32.mrf.mxu0 }
 0x63e   :  { %v3387_v60 = vadd.f32 %v9158_v48, %v3290_v51 }
 0x63f   :  { %v9160_v54 = vpop.f32.mrf.mxu0 }
 0x640   :  { %v9161_v2 = vadd.f32 %v9160_v54, %v9159_v49  ;;  %v3449_v4 = vmax.f32 %v3387_v60, 0.0  ;;  %v3317_v49 = vadd.f32 %v9115_v30, %v11121_v44 }
 0x641   :  { %v9162_v57 = vpop.f32.mrf.mxu0 }
 0x642   :  { %v3390_v63 = vadd.f32 %v9161_v2, %v3293_v55  ;;  %v9121_v2 = vadd.f32 %v11127_v0, %v11123_v50  ;;  %v9124_v50 = vadd.f32 %v11135_v9, %v11129_v59  ;;  %v9130_v9 = vadd.f32 %v9129_v33, %v9128_v45 }
 0x643   :  { %v9163_v3 = vpop.f32.mrf.mxu0 }
 0x644   :  { %v3450_v56 = vmax.f32 %v3390_v63, 0.0  ;;  %v9164_v58 = vadd.f32 %v9163_v3, %v9162_v57  ;;  %v9131_v3 = vpop.f32.mrf.mxu1 }
 0x645   :  { %v9165_v62 = vpop.f32.mrf.mxu0 }
 0x646   :  { %v3465_v52 = vpack.c.bf16 %v3450_v56, %v3449_v4  ;;  %v3395_v7 = vadd.f32 %v9164_v58, %v3298_v61  ;;  %v3322_v4 = vadd.f32 %v9118_v35, %v11121_v44  ;;  %v3325_v58 = vadd.f32 %v9121_v2, %v11121_v44  ;;  %v9132_v42 = vpop.f32.mrf.mxu1 }
 0x647   :  { %v9166_v5 = vpop.f32.mrf.mxu0 }
 0x648   :  { %v9167_v37 = vadd.f32 %v9166_v5, %v9165_v62  ;;  %3602 = vmatmul.mubr.bf16.vlgmr.msra.gmra.mxu1 %v3465_v52  ;;  %3971 = vmatmul.mubr.bf16.vlgmr.msra.gmra.mxu0 %v3465_v52  ;;  %v3451_v14 = vmax.f32 %v3395_v7, 0.0  ;;  %v9134_v10 = vpop.f32.mrf.mxu1 }
 0x649   :  { %v9168_v8 = vpop.f32.mrf.mxu0  ;;  %3611 = vmatprep.mubr.bf16.mxu1 %v10115_v53  ;;  %3980 = vmatprep.mubr.bf16.mxu0 %v10115_v53 }
 0x64a   :  { %v3398_v12 = vadd.f32 %v9167_v37, %v3301_v6  ;;  %v9127_v6 = vadd.f32 %v9126_v26, %v9125_v19  ;;  %v9135_v59 = vpop.f32.mrf.mxu1  ;;  %v3338_v26 = vadd.f32 %v9130_v9, %v11121_v44 }
 0x64b   :  { %v9169_v13 = vpop.f32.mrf.mxu0 }
 0x64c   :  { %v3452_v16 = vmax.f32 %v3398_v12, 0.0  ;;  %v9170_v17 = vadd.f32 %v9169_v13, %v9168_v8  ;;  %v3330_v12 = vadd.f32 %v9124_v50, %v11121_v44  ;;  %v3333_v15 = vadd.f32 %v9127_v6, %v11121_v44 }
 0x64d   :  { %v9171_v18 = vpop.f32.mrf.mxu0 }
 0x64e   :  { %v3466_v21 = vpack.c.bf16 %v3452_v16, %v3451_v14  ;;  %v3403_v24 = vadd.f32 %v9170_v17, %v3306_v20 }
 0x64f   :  { %v9172_v22 = vpop.f32.mrf.mxu0 }
 0x650   :  { %v9173_v11 = vadd.f32 %v9172_v22, %v9171_v18  ;;  %3612 = vmatmul.mubr.bf16.gmra.mxu1 %v3466_v21  ;;  %3981 = vmatmul.mubr.bf16.gmra.mxu0 %v3466_v21  ;;  %v3453_v29 = vmax.f32 %v3403_v24, 0.0  ;;  %v9133_v22 = vadd.f32 %v9132_v42, %v9131_v3  ;;  %v9848_v3 = vld [vmem:[%s11628_s8 + $0x4] ss:$16 sps:$4 sm:$0xff]  }
 0x651   :  { %v9174_v25 = vpop.f32.mrf.mxu0  ;;  %3621 = vmatprep.mubr.bf16.mxu1 %v10115_v53  ;;  %3990 = vmatprep.mubr.bf16.mxu0 %v10115_v53 }
 0x652   :  { %v3406_v28 = vadd.f32 %v9173_v11, %v3309_v23  ;;  %v9137_v11 = vpop.f32.mrf.mxu1 }
 0x653   :  { %v9175_v31 = vpop.f32.mrf.mxu0 }
 0x654   :  { %v3454_v40 = vmax.f32 %v3406_v28, 0.0  ;;  %v9176_v41 = vadd.f32 %v9175_v31, %v9174_v25  ;;  %v3341_v31 = vadd.f32 %v9133_v22, %v11121_v44 }
 0x655   :  { %v9177_v43 = vpop.f32.mrf.mxu0 }
 0x656   :  { %v3467_v47 = vpack.c.bf16 %v3454_v40, %v3453_v29  ;;  %v3411_v51 = vadd.f32 %v9176_v41, %v3314_v46  ;;  %v9138_v40 = vpop.f32.mrf.mxu1 }
 0x657   :  { %v9178_v48 = vpop.f32.mrf.mxu0 }
 0x658   :  { %v9179_v54 = vadd.f32 %v9178_v48, %v9177_v43  ;;  %3622 = vmatmul.mubr.bf16.gmra.mxu1 %v3467_v47  ;;  %3991 = vmatmul.mubr.bf16.gmra.mxu0 %v3467_v47  ;;  %v3455_v60 = vmax.f32 %v3411_v51, 0.0  ;;  %v9136_v43 = vadd.f32 %v9135_v59, %v9134_v10  ;;  %v9139_v48 = vadd.f32 %v9138_v40, %v9137_v11 }
 0x659   :  { %v9180_v32 = vpop.f32.mrf.mxu0  ;;  %3631 = vmatprep.mubr.bf16.mxu1 %v10115_v53  ;;  %4000 = vmatprep.mubr.bf16.mxu0 %v10115_v53 }
 0x65a   :  { %v3414_v36 = vadd.f32 %v9179_v54, %v3317_v49 }
 0x65b   :  { %v9181_v55 = vpop.f32.mrf.mxu0 }
 0x65c   :  { %v3456_v57 = vmax.f32 %v3414_v36, 0.0  ;;  %v9182_v1 = vadd.f32 %v9181_v55, %v9180_v32  ;;  %v3346_v32 = vadd.f32 %v9136_v43, %v11121_v44  ;;  %v3349_v36 = vadd.f32 %v9139_v48, %v11121_v44  ;;  %v9851_v44 = vld [vmem:[%s11628_s8 + $0xc] ss:$16 sps:$4 sm:$0xff]  }
 0x65d   :  { %v9183_v63 = vpop.f32.mrf.mxu0 }
 0x65e   :  { %v3468_v39 = vpack.c.bf16 %v3456_v57, %v3455_v60  ;;  %v3419_v62 = vadd.f32 %v9182_v1, %v3322_v4 }
 0x65f   :  { %v9184_v56 = vpop.f32.mrf.mxu0 }
 0x660   :  { %v9185_v61 = vadd.f32 %v9184_v56, %v9183_v63  ;;  %3632 = vmatmul.mubr.bf16.gmra.mxu1 %v3468_v39  ;;  %4001 = vmatmul.mubr.bf16.gmra.mxu0 %v3468_v39  ;;  %v3457_v5 = vmax.f32 %v3419_v62, 0.0 }
 0x661   :  { %v9186_v38 = vpop.f32.mrf.mxu0  ;;  %3641 = vmatprep.mubr.bf16.mxu1 %v10115_v53  ;;  %4010 = vmatprep.mubr.bf16.mxu0 %v10115_v53 }
 0x662   :  { %v3422_v0 = vadd.f32 %v9185_v61, %v3325_v58 }
 0x663   :  { %v9187_v52 = vpop.f32.mrf.mxu0 }
 0x664   :  { %v3458_v7 = vmax.f32 %v3422_v0, 0.0  ;;  %v9188_v37 = vadd.f32 %v9187_v52, %v9186_v38 }
 0x665   :  { %v9189_v8 = vpop.f32.mrf.mxu0 }
 0x666   :  { %v3469_v13 = vpack.c.bf16 %v3458_v7, %v3457_v5  ;;  %v3427_v16 = vadd.f32 %v9188_v37, %v3330_v12 }
 0x667   :  { %v9190_v14 = vpop.f32.mrf.mxu0 }
 0x668   :  { %v9191_v17 = vadd.f32 %v9190_v14, %v9189_v8  ;;  %3642 = vmatmul.mubr.bf16.gmra.mxu1 %v3469_v13  ;;  %4011 = vmatmul.mubr.bf16.gmra.mxu0 %v3469_v13  ;;  %v3459_v21 = vmax.f32 %v3427_v16, 0.0 }
 0x669   :  { %v9192_v18 = vpop.f32.mrf.mxu0  ;;  %3651 = vmatprep.mubr.bf16.mxu1 %v10115_v53  ;;  %4020 = vmatprep.mubr.bf16.mxu0 %v10115_v53 }
 0x66a   :  { %v3430_v19 = vadd.f32 %v9191_v17, %v3333_v15 }
 0x66b   :  { %v9193_v20 = vpop.f32.mrf.mxu0 }
 0x66c   :  { %v3460_v23 = vmax.f32 %v3430_v19, 0.0  ;;  %v9194_v24 = vadd.f32 %v9193_v20, %v9192_v18 }
 0x66d   :  { %v9195_v25 = vpop.f32.mrf.mxu0 }
 0x66e   :  { %v3470_v27 = vpack.c.bf16 %v3460_v23, %v3459_v21  ;;  %v3435_v29 = vadd.f32 %v9194_v24, %v3338_v26 }
 0x66f   :  { %v9196_v28 = vpop.f32.mrf.mxu0 }
 0x670   :  { %v9197_v30 = vadd.f32 %v9196_v28, %v9195_v25  ;;  %3652 = vmatmul.mubr.bf16.gmra.mxu1 %v3470_v27  ;;  %4021 = vmatmul.mubr.bf16.gmra.mxu0 %v3470_v27  ;;  %v3461_v47 = vmax.f32 %v3435_v29, 0.0 }
 0x671   :  { %v9198_v41 = vpop.f32.mrf.mxu0  ;;  %3661 = vmatprep.mubr.bf16.mxu1 %v10115_v53  ;;  %4030 = vmatprep.mubr.bf16.mxu0 %v10115_v53 }
 0x672   :  { %v3438_v45 = vadd.f32 %v9197_v30, %v3341_v31 }
 0x673   :  { %v9199_v46 = vpop.f32.mrf.mxu0 }
 0x674   :  { %v3462_v49 = vmax.f32 %v3438_v45, 0.0  ;;  %v9200_v51 = vadd.f32 %v9199_v46, %v9198_v41 }
 0x675   :  { %v9201_v54 = vpop.f32.mrf.mxu0 }
 0x676   :  { %v3471_v33 = vpack.c.bf16 %v3462_v49, %v3461_v47  ;;  %v3443_v55 = vadd.f32 %v9200_v51, %v3346_v32 }
 0x677   :  { %v9202_v35 = vpop.f32.mrf.mxu0 }
 0x678   :  { %v9203_v60 = vadd.f32 %v9202_v35, %v9201_v54  ;;  %3662 = vmatmul.mubr.bf16.gmra.mxu1 %v3471_v33  ;;  %4031 = vmatmul.mubr.bf16.gmra.mxu0 %v3471_v33  ;;  %v3463_v57 = vmax.f32 %v3443_v55, 0.0 }
 0x679   :  { %3671 = vmatprep.mubr.bf16.mxu1 %v10115_v53  ;;  %4040 = vmatprep.mubr.bf16.mxu0 %v10115_v53 }
 0x67a   :  { %v3446_v2 = vadd.f32 %v9203_v60, %v3349_v36 }
 0x67c   :  { %v3464_v1 = vmax.f32 %v3446_v2, 0.0 }
 0x67e   :  { %v3472_v63 = vpack.c.bf16 %v3464_v1, %v3463_v57 }
 0x680   :  { %3672 = vmatmul.mubr.bf16.gmra.mxu1 %v3472_v63  ;;  %4041 = vmatmul.mubr.bf16.gmra.mxu0 %v3472_v63 }
 0x681   :  { %4695 = vmatprep.mubr.bf16.mxu1 %v9848_v3  ;;  %4792 = vmatprep.mubr.bf16.mxu0 %v9851_v44 }
 0x708   :  { %v3603_v4 = vpop.f32.mrf.mxu1  ;;  %v3972_v39 = vpop.f32.mrf.mxu0 }
 0x70a   :  { %v3605_v56 = vpop.f32.mrf.mxu1  ;;  %v3974_v58 = vpop.f32.mrf.mxu0 }
 0x70c   :  { %v3607_v62 = vpop.f32.mrf.mxu1  ;;  %v3976_v61 = vpop.f32.mrf.mxu0 }
 0x70d   :  { %v8416_v38 = vpack.c.bf16 %v3607_v62, %v3603_v4  ;;  %v8496_v42 = vpack.c.bf16 %v3976_v61, %v3972_v39 }
 0x70e   :  { %v3609_v50 = vpop.f32.mrf.mxu1  ;;  %v3978_v0 = vpop.f32.mrf.mxu0 }
 0x70f   :  { %8417 = vst [vmem:[#allocation2] sm:$0xff] %v8416_v38   ;;  %8906 = vst [vmem:[#allocation2 + $0x80] sm:$0xff] %v8496_v42   ;;  %v8456_v52 = vpack.c.bf16 %v3609_v50, %v3605_v56  ;;  %v8536_v5 = vpack.c.bf16 %v3978_v0, %v3974_v58 }
 0x710   :  { %v3613_v6 = vpop.f32.mrf.mxu1  ;;  %v3982_v7 = vpop.f32.mrf.mxu0 }
 0x711   :  { %8898 = vst [vmem:[#allocation2 + $0x40] sm:$0xff] %v8456_v52   ;;  %8914 = vst [vmem:[#allocation2 + $0xc0] sm:$0xff] %v8536_v5  }
 0x712   :  { %v3615_v37 = vpop.f32.mrf.mxu1  ;;  %v3984_v8 = vpop.f32.mrf.mxu0 }
 0x714   :  { %v3617_v10 = vpop.f32.mrf.mxu1  ;;  %v3986_v12 = vpop.f32.mrf.mxu0 }
 0x715   :  { %v8421_v13 = vpack.c.bf16 %v3617_v10, %v3613_v6  ;;  %v8501_v14 = vpack.c.bf16 %v3986_v12, %v3982_v7 }
 0x716   :  { %v3619_v15 = vpop.f32.mrf.mxu1  ;;  %v3988_v16 = vpop.f32.mrf.mxu0 }
 0x717   :  { %8891 = vst [vmem:[#allocation2 + $0x8] sm:$0xff] %v8421_v13   ;;  %8907 = vst [vmem:[#allocation2 + $0x88] sm:$0xff] %v8501_v14   ;;  %v8461_v17 = vpack.c.bf16 %v3619_v15, %v3615_v37  ;;  %v8541_v18 = vpack.c.bf16 %v3988_v16, %v3984_v8 }
 0x718   :  { %v3623_v59 = vpop.f32.mrf.mxu1  ;;  %v3992_v9 = vpop.f32.mrf.mxu0 }
 0x719   :  { %8899 = vst [vmem:[#allocation2 + $0x48] sm:$0xff] %v8461_v17   ;;  %8915 = vst [vmem:[#allocation2 + $0xc8] sm:$0xff] %v8541_v18  }
 0x71a   :  { %v3625_v19 = vpop.f32.mrf.mxu1  ;;  %v3994_v20 = vpop.f32.mrf.mxu0 }
 0x71c   :  { %v3627_v21 = vpop.f32.mrf.mxu1  ;;  %v3996_v22 = vpop.f32.mrf.mxu0 }
 0x71d   :  { %v8426_v23 = vpack.c.bf16 %v3627_v21, %v3623_v59  ;;  %v8506_v24 = vpack.c.bf16 %v3996_v22, %v3992_v9 }
 0x71e   :  { %v3629_v11 = vpop.f32.mrf.mxu1  ;;  %v3998_v25 = vpop.f32.mrf.mxu0 }
 0x71f   :  { %8892 = vst [vmem:[#allocation2 + $0x10] sm:$0xff] %v8426_v23   ;;  %8908 = vst [vmem:[#allocation2 + $0x90] sm:$0xff] %v8506_v24   ;;  %v8466_v26 = vpack.c.bf16 %v3629_v11, %v3625_v19  ;;  %v8546_v27 = vpack.c.bf16 %v3998_v25, %v3994_v20 }
 0x720   :  { %v3633_v28 = vpop.f32.mrf.mxu1  ;;  %v4002_v31 = vpop.f32.mrf.mxu0 }
 0x721   :  { %8900 = vst [vmem:[#allocation2 + $0x50] sm:$0xff] %v8466_v26   ;;  %8916 = vst [vmem:[#allocation2 + $0xd0] sm:$0xff] %v8546_v27  }
 0x722   :  { %v3635_v29 = vpop.f32.mrf.mxu1  ;;  %v4004_v30 = vpop.f32.mrf.mxu0 }
 0x724   :  { %v3637_v40 = vpop.f32.mrf.mxu1  ;;  %v4006_v41 = vpop.f32.mrf.mxu0 }
 0x725   :  { %v8431_v43 = vpack.c.bf16 %v3637_v40, %v3633_v28  ;;  %v8511_v45 = vpack.c.bf16 %v4006_v41, %v4002_v31 }
 0x726   :  { %v3639_v46 = vpop.f32.mrf.mxu1  ;;  %v4008_v47 = vpop.f32.mrf.mxu0 }
 0x727   :  { %8893 = vst [vmem:[#allocation2 + $0x18] sm:$0xff] %v8431_v43   ;;  %8909 = vst [vmem:[#allocation2 + $0x98] sm:$0xff] %v8511_v45   ;;  %v8471_v48 = vpack.c.bf16 %v3639_v46, %v3635_v29  ;;  %v8551_v49 = vpack.c.bf16 %v4008_v47, %v4004_v30 }
 0x728   :  { %v3643_v51 = vpop.f32.mrf.mxu1  ;;  %v4012_v54 = vpop.f32.mrf.mxu0 }
 0x729   :  { %8901 = vst [vmem:[#allocation2 + $0x58] sm:$0xff] %v8471_v48   ;;  %8917 = vst [vmem:[#allocation2 + $0xd8] sm:$0xff] %v8551_v49  }
 0x72a   :  { %v3645_v32 = vpop.f32.mrf.mxu1  ;;  %v4014_v33 = vpop.f32.mrf.mxu0 }
 0x72c   :  { %v3647_v35 = vpop.f32.mrf.mxu1  ;;  %v4016_v36 = vpop.f32.mrf.mxu0 }
 0x72d   :  { %v8436_v55 = vpack.c.bf16 %v3647_v35, %v3643_v51  ;;  %v8516_v60 = vpack.c.bf16 %v4016_v36, %v4012_v54 }
 0x72e   :  { %v3649_v2 = vpop.f32.mrf.mxu1  ;;  %v4018_v57 = vpop.f32.mrf.mxu0  ;;  %v9832_v35 = vld [vmem:[#allocation2 + $0x18] sm:$0xff]  }
 0x72f   :  { %8894 = vst [vmem:[#allocation2 + $0x20] sm:$0xff] %v8436_v55   ;;  %8910 = vst [vmem:[#allocation2 + $0xa0] sm:$0xff] %v8516_v60   ;;  %v8476_v1 = vpack.c.bf16 %v3649_v2, %v3645_v32  ;;  %v8556_v63 = vpack.c.bf16 %v4018_v57, %v4014_v33  ;;  %v9833_v36 = vld [vmem:[#allocation2 + $0x98] sm:$0xff]   ;;  %v9834_v55 = vld [vmem:[#allocation2 + $0x50] sm:$0xff]  }
 0x730   :  { %v3653_v3 = vpop.f32.mrf.mxu1  ;;  %v4022_v44 = vpop.f32.mrf.mxu0  ;;  %v9830_v32 = vld [vmem:[#allocation2 + $0x58] sm:$0xff]   ;;  %v9835_v60 = vld [vmem:[#allocation2 + $0xd0] sm:$0xff]  }
 0x731   :  { %8902 = vst [vmem:[#allocation2 + $0x60] sm:$0xff] %v8476_v1   ;;  %8918 = vst [vmem:[#allocation2 + $0xe0] sm:$0xff] %v8556_v63   ;;  %v9831_v33 = vld [vmem:[#allocation2 + $0xd8] sm:$0xff]   ;;  %v9836_v2 = vld [vmem:[#allocation2 + $0x10] sm:$0xff]  }
 0x732   :  { %v3655_v4 = vpop.f32.mrf.mxu1  ;;  %v4024_v39 = vpop.f32.mrf.mxu0  ;;  %v9837_v57 = vld [vmem:[#allocation2 + $0x90] sm:$0xff]   ;;  %v9838_v1 = vld [vmem:[#allocation2 + $0x48] sm:$0xff]  }
 0x733   :  { %v9839_v63 = vld [vmem:[#allocation2 + $0xc8] sm:$0xff]  }
 0x734   :  { %v3657_v56 = vpop.f32.mrf.mxu1  ;;  %v4026_v58 = vpop.f32.mrf.mxu0 }
 0x735   :  { %v8441_v62 = vpack.c.bf16 %v3657_v56, %v3653_v3  ;;  %v8521_v61 = vpack.c.bf16 %v4026_v58, %v4022_v44  ;;  %v9840_v3 = vld [vmem:[#allocation2 + $0x8] sm:$0xff]   ;;  %v9896_v56 = vld [vmem:[%s11629_s9 + $0xe4] ss:$16 sps:$4 sm:$0xff]  }
 0x736   :  { %v3659_v38 = vpop.f32.mrf.mxu1  ;;  %v4028_v42 = vpop.f32.mrf.mxu0  ;;  %v9828_v51 = vld [vmem:[#allocation2 + $0x20] sm:$0xff]   ;;  %v9841_v44 = vld [vmem:[#allocation2 + $0x88] sm:$0xff]  }
 0x737   :  { %8895 = vst [vmem:[#allocation2 + $0x28] sm:$0xff] %v8441_v62   ;;  %8911 = vst [vmem:[#allocation2 + $0xa8] sm:$0xff] %v8521_v61   ;;  %v8481_v50 = vpack.c.bf16 %v3659_v38, %v3655_v4  ;;  %v8561_v0 = vpack.c.bf16 %v4028_v42, %v4024_v39  ;;  %v9829_v54 = vld [vmem:[#allocation2 + $0xa0] sm:$0xff]   ;;  %v9899_v62 = vld [vmem:[%s11629_s9 + $0xec] ss:$16 sps:$4 sm:$0xff]  }
 0x738   :  { %v3663_v52 = vpop.f32.mrf.mxu1  ;;  %v4032_v5 = vpop.f32.mrf.mxu0  ;;  %v9826_v48 = vld [vmem:[#allocation2 + $0x60] sm:$0xff]   ;;  %v9849_v42 = vld [vmem:[%s11628_s8 + $0x8] ss:$16 sps:$4 sm:$0xff]  }
 0x739   :  { %8903 = vst [vmem:[#allocation2 + $0x68] sm:$0xff] %v8481_v50   ;;  %8919 = vst [vmem:[#allocation2 + $0xe8] sm:$0xff] %v8561_v0   ;;  %v9827_v49 = vld [vmem:[#allocation2 + $0xe0] sm:$0xff]   ;;  %v9857_v0 = vld [vmem:[%s11628_s8 + $0x2c] ss:$16 sps:$4 sm:$0xff]  }
 0x73a   :  { %v3665_v6 = vpop.f32.mrf.mxu1  ;;  %v4034_v7 = vpop.f32.mrf.mxu0  ;;  %v9842_v4 = vld [vmem:[#allocation2 + $0x40] sm:$0xff]  }
 0x73b   :  { %v9843_v39 = vld [vmem:[#allocation2 + $0xc0] sm:$0xff]  }
 0x73c   :  { %v3667_v37 = vpop.f32.mrf.mxu1  ;;  %v4036_v8 = vpop.f32.mrf.mxu0  ;;  %v9844_v58 = vld [vmem:[#allocation2] sm:$0xff]  }
 0x73d   :  { %v8446_v10 = vpack.c.bf16 %v3667_v37, %v3663_v52  ;;  %v8526_v12 = vpack.c.bf16 %v4036_v8, %v4032_v5  ;;  %v9845_v61 = vld [vmem:[#allocation2 + $0x80] sm:$0xff]   ;;  %v9897_v5 = vld [vmem:[%s11629_s9 + $0xe8] ss:$16 sps:$4 sm:$0xff]  }
 0x73e   :  { %v3669_v13 = vpop.f32.mrf.mxu1  ;;  %v4038_v14 = vpop.f32.mrf.mxu0  ;;  %v9824_v46 = vld [vmem:[#allocation2 + $0x28] sm:$0xff]   ;;  %v9846_v38 = vld [vmem:[%s11628_s8] ss:$16 sps:$4 sm:$0xff]   ;;  %v9854_v50 = vld [vmem:[%s11628_s8 + $0x24] ss:$16 sps:$4 sm:$0xff]  }
 0x73f   :  { %8896 = vst [vmem:[#allocation2 + $0x30] sm:$0xff] %v8446_v10   ;;  %8912 = vst [vmem:[#allocation2 + $0xb0] sm:$0xff] %v8526_v12   ;;  %v8486_v15 = vpack.c.bf16 %v3669_v13, %v3665_v6  ;;  %v8566_v16 = vpack.c.bf16 %v4038_v14, %v4034_v7  ;;  %v9825_v47 = vld [vmem:[#allocation2 + $0xa8] sm:$0xff]   ;;  %v9894_v52 = vld [vmem:[%s11629_s9 + $0xe0] ss:$16 sps:$4 sm:$0xff]  }
 0x740   :  { %v3673_v17 = vpop.f32.mrf.mxu1  ;;  %v4042_v18 = vpop.f32.mrf.mxu0  ;;  %v9822_v43 = vld [vmem:[#allocation2 + $0x68] sm:$0xff]   ;;  %v9902_v6 = vld [vmem:[%s11629_s9 + $0xc4] ss:$16 sps:$4 sm:$0xff]   ;;  %v9900_v37 = vld [vmem:[%s11629_s9 + $0xc0] ss:$16 sps:$4 sm:$0xff]  }
 0x741   :  { %8904 = vst [vmem:[#allocation2 + $0x70] sm:$0xff] %v8486_v15   ;;  %8920 = vst [vmem:[#allocation2 + $0xf0] sm:$0xff] %v8566_v16   ;;  %v9823_v45 = vld [vmem:[#allocation2 + $0xe8] sm:$0xff]   ;;  %v9908_v10 = vld [vmem:[%s11629_s9 + $0xa4] ss:$16 sps:$4 sm:$0xff]  }
 0x742   :  { %v3675_v59 = vpop.f32.mrf.mxu1  ;;  %v4044_v9 = vpop.f32.mrf.mxu0  ;;  %v9905_v7 = vld [vmem:[%s11629_s9 + $0xcc] ss:$16 sps:$4 sm:$0xff]   ;;  %v9903_v8 = vld [vmem:[%s11629_s9 + $0xc8] ss:$16 sps:$4 sm:$0xff]   ;;  %v9852_v12 = vld [vmem:[%s11628_s8 + $0x20] ss:$16 sps:$4 sm:$0xff]  }
 0x743   :  { %v9911_v13 = vld [vmem:[%s11629_s9 + $0xac] ss:$16 sps:$4 sm:$0xff]   ;;  %v9855_v14 = vld [vmem:[%s11628_s8 + $0x28] ss:$16 sps:$4 sm:$0xff]   ;;  %v9860_v15 = vld [vmem:[%s11628_s8 + $0x44] ss:$16 sps:$4 sm:$0xff]  }
 0x744   :  { %v3677_v19 = vpop.f32.mrf.mxu1  ;;  %v4046_v20 = vpop.f32.mrf.mxu0  ;;  %v9863_v16 = vld [vmem:[%s11628_s8 + $0x4c] ss:$16 sps:$4 sm:$0xff]  }
 0x745   :  { %v8451_v21 = vpack.c.bf16 %v3677_v19, %v3673_v17  ;;  %v8531_v22 = vpack.c.bf16 %v4046_v20, %v4042_v18  ;;  %v9906_v17 = vld [vmem:[%s11629_s9 + $0xa0] ss:$16 sps:$4 sm:$0xff]   ;;  %v9909_v18 = vld [vmem:[%s11629_s9 + $0xa8] ss:$16 sps:$4 sm:$0xff]  }
 0x746   :  { %v3679_v23 = vpop.f32.mrf.mxu1  ;;  %v4048_v24 = vpop.f32.mrf.mxu0  ;;  %v9820_v40 = vld [vmem:[#allocation2 + $0x30] sm:$0xff]   ;;  %v9915_v20 = vld [vmem:[%s11629_s9 + $0x88] ss:$16 sps:$4 sm:$0xff]  }
 0x747   :  { %8897 = vst [vmem:[#allocation2 + $0x38] sm:$0xff] %v8451_v21   ;;  %8913 = vst [vmem:[#allocation2 + $0xb8] sm:$0xff] %v8531_v22   ;;  %v8491_v11 = vpack.c.bf16 %v3679_v23, %v3675_v59  ;;  %v8571_v25 = vpack.c.bf16 %v4048_v24, %v4044_v9  ;;  %v9821_v41 = vld [vmem:[#allocation2 + $0xb0] sm:$0xff]   ;;  %v9917_v9 = vld [vmem:[%s11629_s9 + $0x8c] ss:$16 sps:$4 sm:$0xff]  }
 0x748   :  { %v9818_v29 = vld [vmem:[#allocation2 + $0x70] sm:$0xff]   ;;  %v9861_v22 = vld [vmem:[%s11628_s8 + $0x48] ss:$16 sps:$4 sm:$0xff]   ;;  %v9869_v24 = vld [vmem:[%s11628_s8 + $0x6c] ss:$16 sps:$4 sm:$0xff]  }
 0x749   :  { %8905 = vst [vmem:[#allocation2 + $0x78] sm:$0xff] %v8491_v11   ;;  %8921 = vst [vmem:[#allocation2 + $0xf8] sm:$0xff] %v8571_v25   ;;  %v9819_v30 = vld [vmem:[#allocation2 + $0xf0] sm:$0xff]   ;;  %v9867_v25 = vld [vmem:[%s11628_s8 + $0x68] ss:$16 sps:$4 sm:$0xff]  }
 0x74a   :  { %v9914_v59 = vld [vmem:[%s11629_s9 + $0x84] ss:$16 sps:$4 sm:$0xff]   ;;  %v9912_v19 = vld [vmem:[%s11629_s9 + $0x80] ss:$16 sps:$4 sm:$0xff]  }
 0x74b   :  { %v9858_v21 = vld [vmem:[%s11628_s8 + $0x40] ss:$16 sps:$4 sm:$0xff]   ;;  %v9866_v23 = vld [vmem:[%s11628_s8 + $0x64] ss:$16 sps:$4 sm:$0xff]  }
 0x74c   :  { %v9864_v11 = vld [vmem:[%s11628_s8 + $0x60] ss:$16 sps:$4 sm:$0xff]  }
 0x74e   :  { %v9816_v26 = vld [vmem:[#allocation2 + $0x38] sm:$0xff]  }
 0x74f   :  { %v9817_v31 = vld [vmem:[#allocation2 + $0xb8] sm:$0xff]  }
 0x750   :  { %v9814_v27 = vld [vmem:[#allocation2 + $0x78] sm:$0xff]  }
 0x751   :  { %v9815_v28 = vld [vmem:[#allocation2 + $0xf8] sm:$0xff]   ;;  %9204 = vmatprep.subr.bf16.mxu1 %v9814_v27 }
 0x752   :  { %9268 = vmatprep.subr.bf16.mxu0 %v9815_v28  ;;  %9205 = vmatpush3.bf16.msra.mxu1 %v9816_v26  ;;  %v9872_v26 = vld [vmem:[%s11628_s8 + $0x84] ss:$16 sps:$4 sm:$0xff]   ;;  %v9875_v27 = vld [vmem:[%s11628_s8 + $0x8c] ss:$16 sps:$4 sm:$0xff]   ;;  %v9870_v28 = vld [vmem:[%s11628_s8 + $0x80] ss:$16 sps:$4 sm:$0xff]  }
 0x753   :  { %9269 = vmatpush3.bf16.msra.mxu0 %v9817_v31  ;;  %9206 = vmatprep.subr.bf16.mxu1 %v9818_v29  ;;  %v9873_v31 = vld [vmem:[%s11628_s8 + $0x88] ss:$16 sps:$4 sm:$0xff]   ;;  %v9878_v29 = vld [vmem:[%s11628_s8 + $0xa4] ss:$16 sps:$4 sm:$0xff]  }
 0x754   :  { %9270 = vmatprep.subr.bf16.mxu0 %v9819_v30  ;;  %v9881_v30 = vld [vmem:[%s11628_s8 + $0xac] ss:$16 sps:$4 sm:$0xff]  }
 0x756   :  { %9207 = vmatpush3.bf16.msra.mxu1 %v9820_v40  ;;  %v9876_v40 = vld [vmem:[%s11628_s8 + $0xa0] ss:$16 sps:$4 sm:$0xff]  }
 0x757   :  { %9271 = vmatpush3.bf16.msra.mxu0 %v9821_v41  ;;  %9208 = vmatprep.subr.bf16.mxu1 %v9822_v43  ;;  %v9879_v41 = vld [vmem:[%s11628_s8 + $0xa8] ss:$16 sps:$4 sm:$0xff]   ;;  %v9884_v43 = vld [vmem:[%s11628_s8 + $0xc4] ss:$16 sps:$4 sm:$0xff]  }
 0x758   :  { %9272 = vmatprep.subr.bf16.mxu0 %v9823_v45  ;;  %v9887_v45 = vld [vmem:[%s11628_s8 + $0xcc] ss:$16 sps:$4 sm:$0xff]  }
 0x75a   :  { %9209 = vmatpush3.bf16.msra.mxu1 %v9824_v46  ;;  %v9882_v46 = vld [vmem:[%s11628_s8 + $0xc0] ss:$16 sps:$4 sm:$0xff]  }
 0x75b   :  { %9273 = vmatpush3.bf16.msra.mxu0 %v9825_v47  ;;  %9210 = vmatprep.subr.bf16.mxu1 %v9826_v48  ;;  %v9885_v47 = vld [vmem:[%s11628_s8 + $0xc8] ss:$16 sps:$4 sm:$0xff]   ;;  %v9890_v48 = vld [vmem:[%s11628_s8 + $0xe4] ss:$16 sps:$4 sm:$0xff]  }
 0x75c   :  { %9274 = vmatprep.subr.bf16.mxu0 %v9827_v49  ;;  %v9893_v49 = vld [vmem:[%s11628_s8 + $0xec] ss:$16 sps:$4 sm:$0xff]  }
 0x75e   :  { %9211 = vmatpush3.bf16.msra.mxu1 %v9828_v51  ;;  %v9888_v51 = vld [vmem:[%s11628_s8 + $0xe0] ss:$16 sps:$4 sm:$0xff]  }
 0x75f   :  { %9275 = vmatpush3.bf16.msra.mxu0 %v9829_v54  ;;  %9212 = vmatprep.subr.bf16.mxu1 %v9830_v32  ;;  %v9891_v54 = vld [vmem:[%s11628_s8 + $0xe8] ss:$16 sps:$4 sm:$0xff]   ;;  %v9920_v32 = vld [vmem:[%s11629_s9 + $0x64] ss:$16 sps:$4 sm:$0xff]  }
 0x760   :  { %9276 = vmatprep.subr.bf16.mxu0 %v9831_v33  ;;  %v9923_v33 = vld [vmem:[%s11629_s9 + $0x6c] ss:$16 sps:$4 sm:$0xff]  }
 0x762   :  { %9213 = vmatpush3.bf16.msra.mxu1 %v9832_v35  ;;  %v9918_v35 = vld [vmem:[%s11629_s9 + $0x60] ss:$16 sps:$4 sm:$0xff]  }
 0x763   :  { %9277 = vmatpush3.bf16.msra.mxu0 %v9833_v36  ;;  %9214 = vmatprep.subr.bf16.mxu1 %v9834_v55  ;;  %v9921_v36 = vld [vmem:[%s11629_s9 + $0x68] ss:$16 sps:$4 sm:$0xff]   ;;  %v9926_v55 = vld [vmem:[%s11629_s9 + $0x44] ss:$16 sps:$4 sm:$0xff]  }
 0x764   :  { %9278 = vmatprep.subr.bf16.mxu0 %v9835_v60  ;;  %v9929_v60 = vld [vmem:[%s11629_s9 + $0x4c] ss:$16 sps:$4 sm:$0xff]  }
 0x766   :  { %9215 = vmatpush3.bf16.msra.mxu1 %v9836_v2  ;;  %v9924_v2 = vld [vmem:[%s11629_s9 + $0x40] ss:$16 sps:$4 sm:$0xff]  }
 0x767   :  { %9279 = vmatpush3.bf16.msra.mxu0 %v9837_v57  ;;  %9216 = vmatprep.subr.bf16.mxu1 %v9838_v1  ;;  %v9927_v57 = vld [vmem:[%s11629_s9 + $0x48] ss:$16 sps:$4 sm:$0xff]   ;;  %v9932_v1 = vld [vmem:[%s11629_s9 + $0x24] ss:$16 sps:$4 sm:$0xff]  }
 0x768   :  { %9280 = vmatprep.subr.bf16.mxu0 %v9839_v63  ;;  %v9935_v63 = vld [vmem:[%s11629_s9 + $0x2c] ss:$16 sps:$4 sm:$0xff]  }
 0x76a   :  { %9217 = vmatpush3.bf16.msra.mxu1 %v9840_v3  ;;  %v9930_v3 = vld [vmem:[%s11629_s9 + $0x20] ss:$16 sps:$4 sm:$0xff]  }
 0x76b   :  { %9281 = vmatpush3.bf16.msra.mxu0 %v9841_v44  ;;  %9218 = vmatprep.subr.bf16.mxu1 %v9842_v4  ;;  %v9933_v44 = vld [vmem:[%s11629_s9 + $0x28] ss:$16 sps:$4 sm:$0xff]   ;;  %v9938_v4 = vld [vmem:[%s11629_s9 + $0x4] ss:$16 sps:$4 sm:$0xff]  }
 0x76c   :  { %9282 = vmatprep.subr.bf16.mxu0 %v9843_v39  ;;  %v9941_v39 = vld [vmem:[%s11629_s9 + $0xc] ss:$16 sps:$4 sm:$0xff]  }
 0x76e   :  { %9219 = vmatpush3.bf16.msra.mxu1 %v9844_v58  ;;  %v9939_v58 = vld [vmem:[%s11629_s9 + $0x8] ss:$16 sps:$4 sm:$0xff]  }
 0x76f   :  { %9283 = vmatpush3.bf16.msra.mxu0 %v9845_v61  ;;  %4977 = vmatprep.subr.bf16.mxu1 %v9896_v56  ;;  %v9936_v56 = vld [vmem:[%s11629_s9] ss:$16 sps:$4 sm:$0xff]  }
 0x770   :  { %5346 = vmatprep.subr.bf16.mxu0 %v9899_v62  ;;  %v4309_v62 = vsub.s32 4, %v10293_v34 }
 0x771   :  { %4696 = vmatmul.mubr.bf16.vlgmr.msra.gmra.mxu1 %v9846_v38 }
 0x772   :  { %4793 = vmatmul.mubr.bf16.vlgmr.msra.gmra.mxu0 %v9849_v42  ;;  %4703 = vmatprep.mubr.bf16.mxu1 %v9854_v50  ;;  %v10091_v42 = vld [vmem:[%s11633_s13] sm:$0xff] }
 0x773   :  { %4800 = vmatprep.mubr.bf16.mxu0 %v9857_v0  ;;  %4978 = vmatpush1.bf16.msra.mxu1 %v9894_v52  ;;  %v11369_v50 = vrot.slane %v10091_v42, %v4309_v62 }
 0x774   :  { %5347 = vmatpush1.bf16.msra.mxu0 %v9897_v5  ;;  %4979 = vmatprep.subr.bf16.mxu1 %v9902_v6 }
 0x775   :  { %5348 = vmatprep.subr.bf16.mxu0 %v9905_v7 }
 0x777   :  { %4980 = vmatpush1.bf16.msra.mxu1 %v9900_v37 }
 0x778   :  { %5349 = vmatpush1.bf16.msra.mxu0 %v9903_v8  ;;  %4981 = vmatprep.subr.bf16.mxu1 %v9908_v10 }
 0x779   :  { %4704 = vmatmul.mubr.bf16.gmra.mxu1 %v9852_v12  ;;  %5350 = vmatprep.subr.bf16.mxu0 %v9911_v13 }
 0x77a   :  { %4801 = vmatmul.mubr.bf16.gmra.mxu0 %v9855_v14  ;;  %4711 = vmatprep.mubr.bf16.mxu1 %v9860_v15 }
 0x77b   :  { %4808 = vmatprep.mubr.bf16.mxu0 %v9863_v16  ;;  %4982 = vmatpush1.bf16.msra.mxu1 %v9906_v17 }
 0x77c   :  { %5351 = vmatpush1.bf16.msra.mxu0 %v9909_v18  ;;  %4983 = vmatprep.subr.bf16.mxu1 %v9914_v59 }
 0x77d   :  { %5352 = vmatprep.subr.bf16.mxu0 %v9917_v9 }
 0x77f   :  { %4984 = vmatpush1.bf16.msra.mxu1 %v9912_v19 }
 0x780   :  { %5353 = vmatpush1.bf16.msra.mxu0 %v9915_v20  ;;  %4985 = vmatprep.subr.bf16.mxu1 %v9920_v32 }
 0x781   :  { %4712 = vmatmul.mubr.bf16.gmra.mxu1 %v9858_v21  ;;  %5354 = vmatprep.subr.bf16.mxu0 %v9923_v33 }
 0x782   :  { %4809 = vmatmul.mubr.bf16.gmra.mxu0 %v9861_v22  ;;  %4719 = vmatprep.mubr.bf16.mxu1 %v9866_v23 }
 0x783   :  { %4816 = vmatprep.mubr.bf16.mxu0 %v9869_v24  ;;  %4986 = vmatpush1.bf16.msra.mxu1 %v9918_v35 }
 0x784   :  { %5355 = vmatpush1.bf16.msra.mxu0 %v9921_v36  ;;  %4987 = vmatprep.subr.bf16.mxu1 %v9926_v55 }
 0x785   :  { %5356 = vmatprep.subr.bf16.mxu0 %v9929_v60 }
 0x787   :  { %4988 = vmatpush1.bf16.msra.mxu1 %v9924_v2 }
 0x788   :  { %5357 = vmatpush1.bf16.msra.mxu0 %v9927_v57  ;;  %4989 = vmatprep.subr.bf16.mxu1 %v9932_v1 }
 0x789   :  { %4720 = vmatmul.mubr.bf16.gmra.mxu1 %v9864_v11  ;;  %5358 = vmatprep.subr.bf16.mxu0 %v9935_v63 }
 0x78a   :  { %4817 = vmatmul.mubr.bf16.gmra.mxu0 %v9867_v25  ;;  %4727 = vmatprep.mubr.bf16.mxu1 %v9872_v26 }
 0x78b   :  { %4824 = vmatprep.mubr.bf16.mxu0 %v9875_v27  ;;  %4990 = vmatpush1.bf16.msra.mxu1 %v9930_v3 }
 0x78c   :  { %5359 = vmatpush1.bf16.msra.mxu0 %v9933_v44  ;;  %4991 = vmatprep.subr.bf16.mxu1 %v9938_v4 }
 0x78d   :  { %5360 = vmatprep.subr.bf16.mxu0 %v9941_v39 }
 0x78f   :  { %4992 = vmatpush1.bf16.msra.mxu1 %v9936_v56 }
 0x790   :  { %5361 = vmatpush1.bf16.msra.mxu0 %v9939_v58 }
 0x791   :  { %4728 = vmatmul.mubr.bf16.gmra.mxu1 %v9870_v28 }
 0x792   :  { %4825 = vmatmul.mubr.bf16.gmra.mxu0 %v9873_v31  ;;  %4735 = vmatprep.mubr.bf16.mxu1 %v9878_v29 }
 0x793   :  { %4832 = vmatprep.mubr.bf16.mxu0 %v9881_v30 }
 0x799   :  { %4736 = vmatmul.mubr.bf16.gmra.mxu1 %v9876_v40 }
 0x79a   :  { %4833 = vmatmul.mubr.bf16.gmra.mxu0 %v9879_v41  ;;  %4743 = vmatprep.mubr.bf16.mxu1 %v9884_v43 }
 0x79b   :  { %4840 = vmatprep.mubr.bf16.mxu0 %v9887_v45 }
 0x7a1   :  { %4744 = vmatmul.mubr.bf16.gmra.mxu1 %v9882_v46 }
 0x7a2   :  { %4841 = vmatmul.mubr.bf16.gmra.mxu0 %v9885_v47  ;;  %4751 = vmatprep.mubr.bf16.mxu1 %v9890_v48 }
 0x7a3   :  { %4848 = vmatprep.mubr.bf16.mxu0 %v9893_v49 }
 0x7a9   :  { %4752 = vmatmul.mubr.bf16.gmra.mxu1 %v9888_v51 }
 0x7aa   :  { %4849 = vmatmul.mubr.bf16.gmra.mxu0 %v9891_v54  ;;  %5009 = vmatprep.mubr.bf16.mxu1 %v10115_v53 }
 0x7ab   :  { %5378 = vmatprep.mubr.bf16.mxu0 %v10115_v53 }
 0x831   :  { %v9220_v61 = vpop.f32.mrf.mxu1 }
 0x832   :  { %v9284_v38 = vpop.f32.mrf.mxu0 }
 0x833   :  { %v9221_v0 = vpop.f32.mrf.mxu1 }
 0x834   :  { %v9222_v52 = vadd.f32 %v9221_v0, %v9220_v61  ;;  %v9285_v5 = vpop.f32.mrf.mxu0 }
 0x835   :  { %v9223_v6 = vpop.f32.mrf.mxu1  ;;  %v9286_v10 = vadd.f32 %v9285_v5, %v9284_v38 }
 0x836   :  { %v4698_v7 = vadd.f32 %v9222_v52, %v11369_v50  ;;  %v9287_v37 = vpop.f32.mrf.mxu0 }
 0x837   :  { %v9224_v8 = vpop.f32.mrf.mxu1 }
 0x838   :  { %v9225_v12 = vadd.f32 %v9224_v8, %v9223_v6  ;;  %v9288_v13 = vpop.f32.mrf.mxu0  ;;  %v4795_v15 = vadd.f32 %v9286_v10, %v4698_v7 }
 0x839   :  { %v9226_v14 = vpop.f32.mrf.mxu1  ;;  %v9289_v17 = vadd.f32 %v9288_v13, %v9287_v37 }
 0x83a   :  { %v4701_v16 = vadd.f32 %v9225_v12, %v11369_v50  ;;  %v9290_v18 = vpop.f32.mrf.mxu0  ;;  %v4857_v22 = vmax.f32 %v4795_v15, 0.0 }
 0x83b   :  { %v9227_v59 = vpop.f32.mrf.mxu1 }
 0x83c   :  { %v4798_v9 = vadd.f32 %v9289_v17, %v4701_v16  ;;  %v9228_v19 = vadd.f32 %v9227_v59, %v9226_v14  ;;  %v9291_v20 = vpop.f32.mrf.mxu0 }
 0x83d   :  { %v9229_v21 = vpop.f32.mrf.mxu1  ;;  %v9292_v27 = vadd.f32 %v9291_v20, %v9290_v18 }
 0x83e   :  { %v4858_v23 = vmax.f32 %v4798_v9, 0.0  ;;  %v4706_v24 = vadd.f32 %v9228_v19, %v11369_v50  ;;  %v9293_v11 = vpop.f32.mrf.mxu0 }
 0x83f   :  { %v9230_v25 = vpop.f32.mrf.mxu1 }
 0x840   :  { %v4873_v26 = vpack.c.bf16 %v4858_v23, %v4857_v22  ;;  %v9231_v28 = vadd.f32 %v9230_v25, %v9229_v21  ;;  %v9294_v31 = vpop.f32.mrf.mxu0  ;;  %v4803_v30 = vadd.f32 %v9292_v27, %v4706_v24 }
 0x841   :  { %v9232_v29 = vpop.f32.mrf.mxu1  ;;  %v9295_v41 = vadd.f32 %v9294_v31, %v9293_v11 }
 0x842   :  { %v4709_v40 = vadd.f32 %v9231_v28, %v11369_v50  ;;  %v9296_v43 = vpop.f32.mrf.mxu0  ;;  %5010 = vmatmul.mubr.bf16.vlgmr.msra.gmra.mxu1 %v4873_v26  ;;  %5379 = vmatmul.mubr.bf16.vlgmr.msra.gmra.mxu0 %v4873_v26  ;;  %v4859_v51 = vmax.f32 %v4803_v30, 0.0 }
 0x843   :  { %v9233_v45 = vpop.f32.mrf.mxu1  ;;  %5019 = vmatprep.mubr.bf16.mxu1 %v10115_v53  ;;  %5388 = vmatprep.mubr.bf16.mxu0 %v10115_v53 }
 0x844   :  { %v4806_v46 = vadd.f32 %v9295_v41, %v4709_v40  ;;  %v9234_v47 = vadd.f32 %v9233_v45, %v9232_v29  ;;  %v9297_v48 = vpop.f32.mrf.mxu0 }
 0x845   :  { %v9235_v49 = vpop.f32.mrf.mxu1  ;;  %v9298_v55 = vadd.f32 %v9297_v48, %v9296_v43 }
 0x846   :  { %v4860_v54 = vmax.f32 %v4806_v46, 0.0  ;;  %v4714_v32 = vadd.f32 %v9234_v47, %v11369_v50  ;;  %v9299_v33 = vpop.f32.mrf.mxu0 }
 0x847   :  { %v9236_v35 = vpop.f32.mrf.mxu1 }
 0x848   :  { %v4874_v36 = vpack.c.bf16 %v4860_v54, %v4859_v51  ;;  %v9237_v60 = vadd.f32 %v9236_v35, %v9235_v49  ;;  %v9300_v2 = vpop.f32.mrf.mxu0  ;;  %v4811_v1 = vadd.f32 %v9298_v55, %v4714_v32 }
 0x849   :  { %v9238_v57 = vpop.f32.mrf.mxu1  ;;  %v9301_v3 = vadd.f32 %v9300_v2, %v9299_v33 }
 0x84a   :  { %v4717_v63 = vadd.f32 %v9237_v60, %v11369_v50  ;;  %v9302_v44 = vpop.f32.mrf.mxu0  ;;  %5020 = vmatmul.mubr.bf16.gmra.mxu1 %v4874_v36  ;;  %5389 = vmatmul.mubr.bf16.gmra.mxu0 %v4874_v36  ;;  %v4861_v61 = vmax.f32 %v4811_v1, 0.0 }
 0x84b   :  { %v9239_v4 = vpop.f32.mrf.mxu1  ;;  %5029 = vmatprep.mubr.bf16.mxu1 %v10115_v53  ;;  %5398 = vmatprep.mubr.bf16.mxu0 %v10115_v53 }
 0x84c   :  { %v4814_v39 = vadd.f32 %v9301_v3, %v4717_v63  ;;  %v9240_v56 = vadd.f32 %v9239_v4, %v9238_v57  ;;  %v9303_v58 = vpop.f32.mrf.mxu0 }
 0x84d   :  { %v9241_v62 = vpop.f32.mrf.mxu1  ;;  %v9304_v6 = vadd.f32 %v9303_v58, %v9302_v44 }
 0x84e   :  { %v4862_v38 = vmax.f32 %v4814_v39, 0.0  ;;  %v4722_v42 = vadd.f32 %v9240_v56, %v11369_v50  ;;  %v9305_v0 = vpop.f32.mrf.mxu0 }
 0x84f   :  { %v9242_v52 = vpop.f32.mrf.mxu1 }
 0x850   :  { %v4875_v5 = vpack.c.bf16 %v4862_v38, %v4861_v61  ;;  %v9243_v7 = vadd.f32 %v9242_v52, %v9241_v62  ;;  %v9306_v37 = vpop.f32.mrf.mxu0  ;;  %v4819_v10 = vadd.f32 %v9304_v6, %v4722_v42 }
 0x851   :  { %v9244_v8 = vpop.f32.mrf.mxu1  ;;  %v9307_v13 = vadd.f32 %v9306_v37, %v9305_v0 }
 0x852   :  { %v4725_v12 = vadd.f32 %v9243_v7, %v11369_v50  ;;  %v9308_v14 = vpop.f32.mrf.mxu0  ;;  %5030 = vmatmul.mubr.bf16.gmra.mxu1 %v4875_v5  ;;  %5399 = vmatmul.mubr.bf16.gmra.mxu0 %v4875_v5  ;;  %v4863_v9 = vmax.f32 %v4819_v10, 0.0 }
 0x853   :  { %v9245_v15 = vpop.f32.mrf.mxu1  ;;  %5039 = vmatprep.mubr.bf16.mxu1 %v10115_v53  ;;  %5408 = vmatprep.mubr.bf16.mxu0 %v10115_v53 }
 0x854   :  { %v4822_v16 = vadd.f32 %v9307_v13, %v4725_v12  ;;  %v9246_v17 = vadd.f32 %v9245_v15, %v9244_v8  ;;  %v9309_v18 = vpop.f32.mrf.mxu0 }
 0x855   :  { %v9247_v59 = vpop.f32.mrf.mxu1  ;;  %v9310_v24 = vadd.f32 %v9309_v18, %v9308_v14 }
 0x856   :  { %v4864_v19 = vmax.f32 %v4822_v16, 0.0  ;;  %v4730_v20 = vadd.f32 %v9246_v17, %v11369_v50  ;;  %v9311_v21 = vpop.f32.mrf.mxu0 }
 0x857   :  { %v9248_v22 = vpop.f32.mrf.mxu1 }
 0x858   :  { %v4876_v23 = vpack.c.bf16 %v4864_v19, %v4863_v9  ;;  %v9249_v11 = vadd.f32 %v9248_v22, %v9247_v59  ;;  %v9312_v25 = vpop.f32.mrf.mxu0  ;;  %v4827_v27 = vadd.f32 %v9310_v24, %v4730_v20 }
 0x859   :  { %v9250_v26 = vpop.f32.mrf.mxu1  ;;  %v9313_v31 = vadd.f32 %v9312_v25, %v9311_v21 }
 0x85a   :  { %v4733_v28 = vadd.f32 %v9249_v11, %v11369_v50  ;;  %v9314_v29 = vpop.f32.mrf.mxu0  ;;  %5040 = vmatmul.mubr.bf16.gmra.mxu1 %v4876_v23  ;;  %5409 = vmatmul.mubr.bf16.gmra.mxu0 %v4876_v23  ;;  %v4865_v46 = vmax.f32 %v4827_v27, 0.0 }
 0x85b   :  { %v9251_v30 = vpop.f32.mrf.mxu1  ;;  %5049 = vmatprep.mubr.bf16.mxu1 %v10115_v53  ;;  %5418 = vmatprep.mubr.bf16.mxu0 %v10115_v53 }
 0x85c   :  { %v4830_v40 = vadd.f32 %v9313_v31, %v4733_v28  ;;  %v9252_v41 = vadd.f32 %v9251_v30, %v9250_v26  ;;  %v9315_v43 = vpop.f32.mrf.mxu0  ;;  %v9976_v31 = vld [vmem:[%s11630_s10 + $0x4] ss:$16 sps:$4 sm:$0xff]  }
 0x85d   :  { %v9253_v45 = vpop.f32.mrf.mxu1  ;;  %v9316_v32 = vadd.f32 %v9315_v43, %v9314_v29 }
 0x85e   :  { %v4866_v47 = vmax.f32 %v4830_v40, 0.0  ;;  %v4738_v48 = vadd.f32 %v9252_v41, %v11369_v50  ;;  %v9317_v49 = vpop.f32.mrf.mxu0 }
 0x85f   :  { %v9254_v51 = vpop.f32.mrf.mxu1 }
 0x860   :  { %v4877_v54 = vpack.c.bf16 %v4866_v47, %v4865_v46  ;;  %v9255_v33 = vadd.f32 %v9254_v51, %v9253_v45  ;;  %v9318_v35 = vpop.f32.mrf.mxu0  ;;  %v4835_v55 = vadd.f32 %v9316_v32, %v4738_v48 }
 0x861   :  { %v9256_v36 = vpop.f32.mrf.mxu1  ;;  %v9319_v2 = vadd.f32 %v9318_v35, %v9317_v49 }
 0x862   :  { %v4741_v60 = vadd.f32 %v9255_v33, %v11369_v50  ;;  %v9320_v57 = vpop.f32.mrf.mxu0  ;;  %5050 = vmatmul.mubr.bf16.gmra.mxu1 %v4877_v54  ;;  %5419 = vmatmul.mubr.bf16.gmra.mxu0 %v4877_v54  ;;  %v4867_v39 = vmax.f32 %v4835_v55, 0.0 }
 0x863   :  { %v9257_v1 = vpop.f32.mrf.mxu1  ;;  %5059 = vmatprep.mubr.bf16.mxu1 %v10115_v53  ;;  %5428 = vmatprep.mubr.bf16.mxu0 %v10115_v53 }
 0x864   :  { %v4838_v63 = vadd.f32 %v9319_v2, %v4741_v60  ;;  %v9258_v3 = vadd.f32 %v9257_v1, %v9256_v36  ;;  %v9321_v44 = vpop.f32.mrf.mxu0 }
 0x865   :  { %v9259_v4 = vpop.f32.mrf.mxu1  ;;  %v9322_v42 = vadd.f32 %v9321_v44, %v9320_v57 }
 0x866   :  { %v4868_v56 = vmax.f32 %v4838_v63, 0.0  ;;  %v4746_v58 = vadd.f32 %v9258_v3, %v11369_v50  ;;  %v9323_v62 = vpop.f32.mrf.mxu0 }
 0x867   :  { %v9260_v61 = vpop.f32.mrf.mxu1 }
 0x868   :  { %v4878_v38 = vpack.c.bf16 %v4868_v56, %v4867_v39  ;;  %v9261_v0 = vadd.f32 %v9260_v61, %v9259_v4  ;;  %v9324_v52 = vpop.f32.mrf.mxu0  ;;  %v4843_v6 = vadd.f32 %v9322_v42, %v4746_v58 }
 0x869   :  { %v9262_v5 = vpop.f32.mrf.mxu1  ;;  %v9325_v37 = vadd.f32 %v9324_v52, %v9323_v62 }
 0x86a   :  { %v4749_v7 = vadd.f32 %v9261_v0, %v11369_v50  ;;  %v9326_v8 = vpop.f32.mrf.mxu0  ;;  %5060 = vmatmul.mubr.bf16.gmra.mxu1 %v4878_v38  ;;  %5429 = vmatmul.mubr.bf16.gmra.mxu0 %v4878_v38  ;;  %v4869_v16 = vmax.f32 %v4843_v6, 0.0 }
 0x86b   :  { %v9263_v10 = vpop.f32.mrf.mxu1  ;;  %5069 = vmatprep.mubr.bf16.mxu1 %v10115_v53  ;;  %5438 = vmatprep.mubr.bf16.mxu0 %v10115_v53 }
 0x86c   :  { %v4846_v12 = vadd.f32 %v9325_v37, %v4749_v7  ;;  %v9264_v13 = vadd.f32 %v9263_v10, %v9262_v5  ;;  %v9327_v14 = vpop.f32.mrf.mxu0 }
 0x86d   :  { %v9265_v15 = vpop.f32.mrf.mxu1  ;;  %v9328_v20 = vadd.f32 %v9327_v14, %v9326_v8 }
 0x86e   :  { %v4870_v17 = vmax.f32 %v4846_v12, 0.0  ;;  %v4754_v18 = vadd.f32 %v9264_v13, %v11369_v50  ;;  %v9329_v59 = vpop.f32.mrf.mxu0 }
 0x86f   :  { %v9266_v9 = vpop.f32.mrf.mxu1 }
 0x870   :  { %v4879_v19 = vpack.c.bf16 %v4870_v17, %v4869_v16  ;;  %v9267_v21 = vadd.f32 %v9266_v9, %v9265_v15  ;;  %v9330_v22 = vpop.f32.mrf.mxu0  ;;  %v4851_v23 = vadd.f32 %v9328_v20, %v4754_v18 }
 0x871   :  { %v9331_v11 = vadd.f32 %v9330_v22, %v9329_v59 }
 0x872   :  { %v4757_v24 = vadd.f32 %v9267_v21, %v11369_v50  ;;  %5070 = vmatmul.mubr.bf16.gmra.mxu1 %v4879_v19  ;;  %5439 = vmatmul.mubr.bf16.gmra.mxu0 %v4879_v19  ;;  %v4871_v26 = vmax.f32 %v4851_v23, 0.0  ;;  %v9979_v50 = vld [vmem:[%s11630_s10 + $0xc] ss:$16 sps:$4 sm:$0xff]  }
 0x873   :  { %5079 = vmatprep.mubr.bf16.mxu1 %v10115_v53  ;;  %5448 = vmatprep.mubr.bf16.mxu0 %v10115_v53 }
 0x874   :  { %v4854_v25 = vadd.f32 %v9331_v11, %v4757_v24 }
 0x876   :  { %v4872_v27 = vmax.f32 %v4854_v25, 0.0 }
 0x878   :  { %v4880_v28 = vpack.c.bf16 %v4872_v27, %v4871_v26 }
 0x87a   :  { %5080 = vmatmul.mubr.bf16.gmra.mxu1 %v4880_v28  ;;  %5449 = vmatmul.mubr.bf16.gmra.mxu0 %v4880_v28 }
 0x87b   :  { %6055 = vmatprep.mubr.bf16.mxu1 %v9976_v31  ;;  %6136 = vmatprep.mubr.bf16.mxu0 %v9979_v50 }
 0x902   :  { %v5011_v29 = vpop.f32.mrf.mxu1  ;;  %v5380_v30 = vpop.f32.mrf.mxu0 }
 0x904   :  { %v5013_v40 = vpop.f32.mrf.mxu1  ;;  %v5382_v41 = vpop.f32.mrf.mxu0 }
 0x906   :  { %v5015_v43 = vpop.f32.mrf.mxu1  ;;  %v5384_v45 = vpop.f32.mrf.mxu0 }
 0x907   :  { %v8576_v46 = vpack.c.bf16 %v5015_v43, %v5011_v29  ;;  %v8656_v47 = vpack.c.bf16 %v5384_v45, %v5380_v30 }
 0x908   :  { %v5017_v48 = vpop.f32.mrf.mxu1  ;;  %v5386_v49 = vpop.f32.mrf.mxu0 }
 0x909   :  { %8577 = vst [vmem:[#allocation2] sm:$0xff] %v8576_v46   ;;  %8937 = vst [vmem:[#allocation2 + $0x80] sm:$0xff] %v8656_v47   ;;  %v8616_v51 = vpack.c.bf16 %v5017_v48, %v5013_v40  ;;  %v8696_v54 = vpack.c.bf16 %v5386_v49, %v5382_v41 }
 0x90a   :  { %v5021_v32 = vpop.f32.mrf.mxu1  ;;  %v5390_v33 = vpop.f32.mrf.mxu0 }
 0x90b   :  { %8929 = vst [vmem:[#allocation2 + $0x40] sm:$0xff] %v8616_v51   ;;  %8945 = vst [vmem:[#allocation2 + $0xc0] sm:$0xff] %v8696_v54  }
 0x90c   :  { %v5023_v35 = vpop.f32.mrf.mxu1  ;;  %v5392_v36 = vpop.f32.mrf.mxu0 }
 0x90e   :  { %v5025_v55 = vpop.f32.mrf.mxu1  ;;  %v5394_v60 = vpop.f32.mrf.mxu0 }
 0x90f   :  { %v8581_v2 = vpack.c.bf16 %v5025_v55, %v5021_v32  ;;  %v8661_v57 = vpack.c.bf16 %v5394_v60, %v5390_v33 }
 0x910   :  { %v5027_v1 = vpop.f32.mrf.mxu1  ;;  %v5396_v63 = vpop.f32.mrf.mxu0 }
 0x911   :  { %8922 = vst [vmem:[#allocation2 + $0x8] sm:$0xff] %v8581_v2   ;;  %8938 = vst [vmem:[#allocation2 + $0x88] sm:$0xff] %v8661_v57   ;;  %v8621_v3 = vpack.c.bf16 %v5027_v1, %v5023_v35  ;;  %v8701_v44 = vpack.c.bf16 %v5396_v63, %v5392_v36 }
 0x912   :  { %v5031_v4 = vpop.f32.mrf.mxu1  ;;  %v5400_v39 = vpop.f32.mrf.mxu0 }
 0x913   :  { %8930 = vst [vmem:[#allocation2 + $0x48] sm:$0xff] %v8621_v3   ;;  %8946 = vst [vmem:[#allocation2 + $0xc8] sm:$0xff] %v8701_v44  }
 0x914   :  { %v5033_v56 = vpop.f32.mrf.mxu1  ;;  %v5402_v58 = vpop.f32.mrf.mxu0 }
 0x916   :  { %v5035_v62 = vpop.f32.mrf.mxu1  ;;  %v5404_v61 = vpop.f32.mrf.mxu0 }
 0x917   :  { %v8586_v38 = vpack.c.bf16 %v5035_v62, %v5031_v4  ;;  %v8666_v42 = vpack.c.bf16 %v5404_v61, %v5400_v39 }
 0x918   :  { %v5037_v0 = vpop.f32.mrf.mxu1  ;;  %v5406_v52 = vpop.f32.mrf.mxu0 }
 0x919   :  { %8923 = vst [vmem:[#allocation2 + $0x10] sm:$0xff] %v8586_v38   ;;  %8939 = vst [vmem:[#allocation2 + $0x90] sm:$0xff] %v8666_v42   ;;  %v8626_v5 = vpack.c.bf16 %v5037_v0, %v5033_v56  ;;  %v8706_v6 = vpack.c.bf16 %v5406_v52, %v5402_v58 }
 0x91a   :  { %v5041_v7 = vpop.f32.mrf.mxu1  ;;  %v5410_v37 = vpop.f32.mrf.mxu0 }
 0x91b   :  { %8931 = vst [vmem:[#allocation2 + $0x50] sm:$0xff] %v8626_v5   ;;  %8947 = vst [vmem:[#allocation2 + $0xd0] sm:$0xff] %v8706_v6  }
 0x91c   :  { %v5043_v8 = vpop.f32.mrf.mxu1  ;;  %v5412_v10 = vpop.f32.mrf.mxu0 }
 0x91e   :  { %v5045_v12 = vpop.f32.mrf.mxu1  ;;  %v5414_v13 = vpop.f32.mrf.mxu0 }
 0x91f   :  { %v8591_v14 = vpack.c.bf16 %v5045_v12, %v5041_v7  ;;  %v8671_v15 = vpack.c.bf16 %v5414_v13, %v5410_v37 }
 0x920   :  { %v5047_v16 = vpop.f32.mrf.mxu1  ;;  %v5416_v17 = vpop.f32.mrf.mxu0 }
 0x921   :  { %8924 = vst [vmem:[#allocation2 + $0x18] sm:$0xff] %v8591_v14   ;;  %8940 = vst [vmem:[#allocation2 + $0x98] sm:$0xff] %v8671_v15   ;;  %v8631_v18 = vpack.c.bf16 %v5047_v16, %v5043_v8  ;;  %v8711_v59 = vpack.c.bf16 %v5416_v17, %v5412_v10 }
 0x922   :  { %v5051_v9 = vpop.f32.mrf.mxu1  ;;  %v5420_v19 = vpop.f32.mrf.mxu0 }
 0x923   :  { %8932 = vst [vmem:[#allocation2 + $0x58] sm:$0xff] %v8631_v18   ;;  %8948 = vst [vmem:[#allocation2 + $0xd8] sm:$0xff] %v8711_v59  }
 0x924   :  { %v5053_v20 = vpop.f32.mrf.mxu1  ;;  %v5422_v21 = vpop.f32.mrf.mxu0 }
 0x926   :  { %v5055_v22 = vpop.f32.mrf.mxu1  ;;  %v5424_v23 = vpop.f32.mrf.mxu0 }
 0x927   :  { %v8596_v24 = vpack.c.bf16 %v5055_v22, %v5051_v9  ;;  %v8676_v11 = vpack.c.bf16 %v5424_v23, %v5420_v19 }
 0x928   :  { %v5057_v25 = vpop.f32.mrf.mxu1  ;;  %v5426_v26 = vpop.f32.mrf.mxu0  ;;  %v9960_v22 = vld [vmem:[#allocation2 + $0x18] sm:$0xff]  }
 0x929   :  { %8925 = vst [vmem:[#allocation2 + $0x20] sm:$0xff] %v8596_v24   ;;  %8941 = vst [vmem:[#allocation2 + $0xa0] sm:$0xff] %v8676_v11   ;;  %v8636_v27 = vpack.c.bf16 %v5057_v25, %v5053_v20  ;;  %v8716_v28 = vpack.c.bf16 %v5426_v26, %v5422_v21  ;;  %v9961_v23 = vld [vmem:[#allocation2 + $0x98] sm:$0xff]   ;;  %v9962_v24 = vld [vmem:[#allocation2 + $0x50] sm:$0xff]  }
 0x92a   :  { %v5061_v31 = vpop.f32.mrf.mxu1  ;;  %v5430_v50 = vpop.f32.mrf.mxu0  ;;  %v9958_v20 = vld [vmem:[#allocation2 + $0x58] sm:$0xff]   ;;  %v9963_v11 = vld [vmem:[#allocation2 + $0xd0] sm:$0xff]  }
 0x92b   :  { %8933 = vst [vmem:[#allocation2 + $0x60] sm:$0xff] %v8636_v27   ;;  %8949 = vst [vmem:[#allocation2 + $0xe0] sm:$0xff] %v8716_v28   ;;  %v9959_v21 = vld [vmem:[#allocation2 + $0xd8] sm:$0xff]   ;;  %v9964_v25 = vld [vmem:[#allocation2 + $0x10] sm:$0xff]  }
 0x92c   :  { %v5063_v29 = vpop.f32.mrf.mxu1  ;;  %v5432_v30 = vpop.f32.mrf.mxu0  ;;  %v9965_v26 = vld [vmem:[#allocation2 + $0x90] sm:$0xff]   ;;  %v9966_v27 = vld [vmem:[#allocation2 + $0x48] sm:$0xff]  }
 0x92d   :  { %v9967_v28 = vld [vmem:[#allocation2 + $0xc8] sm:$0xff]  }
 0x92e   :  { %v5065_v40 = vpop.f32.mrf.mxu1  ;;  %v5434_v41 = vpop.f32.mrf.mxu0 }
 0x92f   :  { %v8601_v43 = vpack.c.bf16 %v5065_v40, %v5061_v31  ;;  %v8681_v45 = vpack.c.bf16 %v5434_v41, %v5430_v50  ;;  %v9968_v31 = vld [vmem:[#allocation2 + $0x8] sm:$0xff]   ;;  %v10012_v40 = vld [vmem:[%s11631_s11 + $0xe4] ss:$16 sps:$4 sm:$0xff]  }
 0x930   :  { %v5067_v46 = vpop.f32.mrf.mxu1  ;;  %v5436_v47 = vpop.f32.mrf.mxu0  ;;  %v9956_v9 = vld [vmem:[#allocation2 + $0x20] sm:$0xff]   ;;  %v9969_v50 = vld [vmem:[#allocation2 + $0x88] sm:$0xff]  }
 0x931   :  { %8926 = vst [vmem:[#allocation2 + $0x28] sm:$0xff] %v8601_v43   ;;  %8942 = vst [vmem:[#allocation2 + $0xa8] sm:$0xff] %v8681_v45   ;;  %v8641_v48 = vpack.c.bf16 %v5067_v46, %v5063_v29  ;;  %v8721_v49 = vpack.c.bf16 %v5436_v47, %v5432_v30  ;;  %v9957_v19 = vld [vmem:[#allocation2 + $0xa0] sm:$0xff]   ;;  %v10015_v43 = vld [vmem:[%s11631_s11 + $0xec] ss:$16 sps:$4 sm:$0xff]  }
 0x932   :  { %v5071_v51 = vpop.f32.mrf.mxu1  ;;  %v5440_v54 = vpop.f32.mrf.mxu0  ;;  %v9954_v18 = vld [vmem:[#allocation2 + $0x60] sm:$0xff]   ;;  %v9977_v47 = vld [vmem:[%s11630_s10 + $0x8] ss:$16 sps:$4 sm:$0xff]  }
 0x933   :  { %8934 = vst [vmem:[#allocation2 + $0x68] sm:$0xff] %v8641_v48   ;;  %8950 = vst [vmem:[#allocation2 + $0xe8] sm:$0xff] %v8721_v49   ;;  %v9955_v59 = vld [vmem:[#allocation2 + $0xe0] sm:$0xff]   ;;  %v9985_v49 = vld [vmem:[%s11630_s10 + $0x2c] ss:$16 sps:$4 sm:$0xff]  }
 0x934   :  { %v5073_v32 = vpop.f32.mrf.mxu1  ;;  %v5442_v33 = vpop.f32.mrf.mxu0  ;;  %v9970_v29 = vld [vmem:[#allocation2 + $0x40] sm:$0xff]  }
 0x935   :  { %v9971_v30 = vld [vmem:[#allocation2 + $0xc0] sm:$0xff]  }
 0x936   :  { %v5075_v35 = vpop.f32.mrf.mxu1  ;;  %v5444_v36 = vpop.f32.mrf.mxu0  ;;  %v9972_v41 = vld [vmem:[#allocation2] sm:$0xff]  }
 0x937   :  { %v8606_v55 = vpack.c.bf16 %v5075_v35, %v5071_v51  ;;  %v8686_v60 = vpack.c.bf16 %v5444_v36, %v5440_v54  ;;  %v9973_v45 = vld [vmem:[#allocation2 + $0x80] sm:$0xff]   ;;  %v10013_v54 = vld [vmem:[%s11631_s11 + $0xe8] ss:$16 sps:$4 sm:$0xff]  }
 0x938   :  { %v5077_v2 = vpop.f32.mrf.mxu1  ;;  %v5446_v57 = vpop.f32.mrf.mxu0  ;;  %v9952_v16 = vld [vmem:[#allocation2 + $0x28] sm:$0xff]   ;;  %v9974_v46 = vld [vmem:[%s11630_s10] ss:$16 sps:$4 sm:$0xff]   ;;  %v9982_v48 = vld [vmem:[%s11630_s10 + $0x24] ss:$16 sps:$4 sm:$0xff]  }
 0x939   :  { %8927 = vst [vmem:[#allocation2 + $0x30] sm:$0xff] %v8606_v55   ;;  %8943 = vst [vmem:[#allocation2 + $0xb0] sm:$0xff] %v8686_v60   ;;  %v8646_v1 = vpack.c.bf16 %v5077_v2, %v5073_v32  ;;  %v8726_v63 = vpack.c.bf16 %v5446_v57, %v5442_v33  ;;  %v9953_v17 = vld [vmem:[#allocation2 + $0xa8] sm:$0xff]   ;;  %v10010_v51 = vld [vmem:[%s11631_s11 + $0xe0] ss:$16 sps:$4 sm:$0xff]  }
 0x93a   :  { %v5081_v3 = vpop.f32.mrf.mxu1  ;;  %v5450_v44 = vpop.f32.mrf.mxu0  ;;  %v9950_v14 = vld [vmem:[#allocation2 + $0x68] sm:$0xff]   ;;  %v10018_v32 = vld [vmem:[%s11631_s11 + $0xc4] ss:$16 sps:$4 sm:$0xff]   ;;  %v10016_v35 = vld [vmem:[%s11631_s11 + $0xc0] ss:$16 sps:$4 sm:$0xff]  }
 0x93b   :  { %8935 = vst [vmem:[#allocation2 + $0x70] sm:$0xff] %v8646_v1   ;;  %8951 = vst [vmem:[#allocation2 + $0xf0] sm:$0xff] %v8726_v63   ;;  %v9951_v15 = vld [vmem:[#allocation2 + $0xe8] sm:$0xff]   ;;  %v10024_v55 = vld [vmem:[%s11631_s11 + $0xa4] ss:$16 sps:$4 sm:$0xff]  }
 0x93c   :  { %v5083_v4 = vpop.f32.mrf.mxu1  ;;  %v5452_v39 = vpop.f32.mrf.mxu0  ;;  %v10021_v33 = vld [vmem:[%s11631_s11 + $0xcc] ss:$16 sps:$4 sm:$0xff]   ;;  %v10019_v36 = vld [vmem:[%s11631_s11 + $0xc8] ss:$16 sps:$4 sm:$0xff]   ;;  %v9980_v60 = vld [vmem:[%s11630_s10 + $0x20] ss:$16 sps:$4 sm:$0xff]  }
 0x93d   :  { %v10027_v2 = vld [vmem:[%s11631_s11 + $0xac] ss:$16 sps:$4 sm:$0xff]   ;;  %v9983_v57 = vld [vmem:[%s11630_s10 + $0x28] ss:$16 sps:$4 sm:$0xff]   ;;  %v9988_v1 = vld [vmem:[%s11630_s10 + $0x44] ss:$16 sps:$4 sm:$0xff]  }
 0x93e   :  { %v5085_v56 = vpop.f32.mrf.mxu1  ;;  %v5454_v58 = vpop.f32.mrf.mxu0  ;;  %v9991_v63 = vld [vmem:[%s11630_s10 + $0x4c] ss:$16 sps:$4 sm:$0xff]  }
 0x93f   :  { %v8611_v62 = vpack.c.bf16 %v5085_v56, %v5081_v3  ;;  %v8691_v61 = vpack.c.bf16 %v5454_v58, %v5450_v44  ;;  %v10022_v3 = vld [vmem:[%s11631_s11 + $0xa0] ss:$16 sps:$4 sm:$0xff]   ;;  %v10025_v44 = vld [vmem:[%s11631_s11 + $0xa8] ss:$16 sps:$4 sm:$0xff]  }
 0x940   :  { %v5087_v38 = vpop.f32.mrf.mxu1  ;;  %v5456_v42 = vpop.f32.mrf.mxu0  ;;  %v9948_v12 = vld [vmem:[#allocation2 + $0x30] sm:$0xff]   ;;  %v10031_v58 = vld [vmem:[%s11631_s11 + $0x88] ss:$16 sps:$4 sm:$0xff]  }
 0x941   :  { %8928 = vst [vmem:[#allocation2 + $0x38] sm:$0xff] %v8611_v62   ;;  %8944 = vst [vmem:[#allocation2 + $0xb8] sm:$0xff] %v8691_v61   ;;  %v8651_v0 = vpack.c.bf16 %v5087_v38, %v5083_v4  ;;  %v8731_v52 = vpack.c.bf16 %v5456_v42, %v5452_v39  ;;  %v9949_v13 = vld [vmem:[#allocation2 + $0xb0] sm:$0xff]   ;;  %v10033_v39 = vld [vmem:[%s11631_s11 + $0x8c] ss:$16 sps:$4 sm:$0xff]  }
 0x942   :  { %v9946_v8 = vld [vmem:[#allocation2 + $0x70] sm:$0xff]   ;;  %v9989_v61 = vld [vmem:[%s11630_s10 + $0x48] ss:$16 sps:$4 sm:$0xff]   ;;  %v9997_v42 = vld [vmem:[%s11630_s10 + $0x6c] ss:$16 sps:$4 sm:$0xff]  }
 0x943   :  { %8936 = vst [vmem:[#allocation2 + $0x78] sm:$0xff] %v8651_v0   ;;  %8952 = vst [vmem:[#allocation2 + $0xf8] sm:$0xff] %v8731_v52   ;;  %v9947_v10 = vld [vmem:[#allocation2 + $0xf0] sm:$0xff]   ;;  %v9995_v52 = vld [vmem:[%s11630_s10 + $0x68] ss:$16 sps:$4 sm:$0xff]  }
 0x944   :  { %v10030_v4 = vld [vmem:[%s11631_s11 + $0x84] ss:$16 sps:$4 sm:$0xff]   ;;  %v10028_v56 = vld [vmem:[%s11631_s11 + $0x80] ss:$16 sps:$4 sm:$0xff]  }
 0x945   :  { %v9986_v62 = vld [vmem:[%s11630_s10 + $0x40] ss:$16 sps:$4 sm:$0xff]   ;;  %v9994_v38 = vld [vmem:[%s11630_s10 + $0x64] ss:$16 sps:$4 sm:$0xff]  }
 0x946   :  { %v9992_v0 = vld [vmem:[%s11630_s10 + $0x60] ss:$16 sps:$4 sm:$0xff]  }
 0x948   :  { %v9944_v5 = vld [vmem:[#allocation2 + $0x38] sm:$0xff]  }
 0x949   :  { %v9945_v37 = vld [vmem:[#allocation2 + $0xb8] sm:$0xff]  }
 0x94a   :  { %v9942_v6 = vld [vmem:[#allocation2 + $0x78] sm:$0xff]  }
 0x94b   :  { %v9943_v7 = vld [vmem:[#allocation2 + $0xf8] sm:$0xff]   ;;  %9332 = vmatprep.subr.bf16.mxu1 %v9942_v6 }
 0x94c   :  { %9384 = vmatprep.subr.bf16.mxu0 %v9943_v7  ;;  %9333 = vmatpush3.bf16.msra.mxu1 %v9944_v5  ;;  %v10000_v5 = vld [vmem:[%s11630_s10 + $0x84] ss:$16 sps:$4 sm:$0xff]   ;;  %v10003_v6 = vld [vmem:[%s11630_s10 + $0x8c] ss:$16 sps:$4 sm:$0xff]   ;;  %v9998_v7 = vld [vmem:[%s11630_s10 + $0x80] ss:$16 sps:$4 sm:$0xff]  }
 0x94d   :  { %9385 = vmatpush3.bf16.msra.mxu0 %v9945_v37  ;;  %9334 = vmatprep.subr.bf16.mxu1 %v9946_v8  ;;  %v10001_v37 = vld [vmem:[%s11630_s10 + $0x88] ss:$16 sps:$4 sm:$0xff]   ;;  %v10006_v8 = vld [vmem:[%s11630_s10 + $0xa4] ss:$16 sps:$4 sm:$0xff]  }
 0x94e   :  { %9386 = vmatprep.subr.bf16.mxu0 %v9947_v10  ;;  %v10009_v10 = vld [vmem:[%s11630_s10 + $0xac] ss:$16 sps:$4 sm:$0xff]  }
 0x950   :  { %9335 = vmatpush3.bf16.msra.mxu1 %v9948_v12  ;;  %v10004_v12 = vld [vmem:[%s11630_s10 + $0xa0] ss:$16 sps:$4 sm:$0xff]  }
 0x951   :  { %9387 = vmatpush3.bf16.msra.mxu0 %v9949_v13  ;;  %9336 = vmatprep.subr.bf16.mxu1 %v9950_v14  ;;  %v10007_v13 = vld [vmem:[%s11630_s10 + $0xa8] ss:$16 sps:$4 sm:$0xff]   ;;  %v10034_v14 = vld [vmem:[%s11631_s11 + $0x60] ss:$16 sps:$4 sm:$0xff]  }
 0x952   :  { %9388 = vmatprep.subr.bf16.mxu0 %v9951_v15  ;;  %v10036_v15 = vld [vmem:[%s11631_s11 + $0x64] ss:$16 sps:$4 sm:$0xff]  }
 0x954   :  { %9337 = vmatpush3.bf16.msra.mxu1 %v9952_v16  ;;  %v10037_v16 = vld [vmem:[%s11631_s11 + $0x68] ss:$16 sps:$4 sm:$0xff]  }
 0x955   :  { %9389 = vmatpush3.bf16.msra.mxu0 %v9953_v17  ;;  %9338 = vmatprep.subr.bf16.mxu1 %v9954_v18  ;;  %v10039_v17 = vld [vmem:[%s11631_s11 + $0x6c] ss:$16 sps:$4 sm:$0xff]   ;;  %v10042_v18 = vld [vmem:[%s11631_s11 + $0x44] ss:$16 sps:$4 sm:$0xff]  }
 0x956   :  { %9390 = vmatprep.subr.bf16.mxu0 %v9955_v59  ;;  %v10045_v59 = vld [vmem:[%s11631_s11 + $0x4c] ss:$16 sps:$4 sm:$0xff]  }
 0x958   :  { %9339 = vmatpush3.bf16.msra.mxu1 %v9956_v9  ;;  %v10040_v9 = vld [vmem:[%s11631_s11 + $0x40] ss:$16 sps:$4 sm:$0xff]  }
 0x959   :  { %9391 = vmatpush3.bf16.msra.mxu0 %v9957_v19  ;;  %9340 = vmatprep.subr.bf16.mxu1 %v9958_v20  ;;  %v10043_v19 = vld [vmem:[%s11631_s11 + $0x48] ss:$16 sps:$4 sm:$0xff]   ;;  %v10048_v20 = vld [vmem:[%s11631_s11 + $0x24] ss:$16 sps:$4 sm:$0xff]  }
 0x95a   :  { %9392 = vmatprep.subr.bf16.mxu0 %v9959_v21  ;;  %v10051_v21 = vld [vmem:[%s11631_s11 + $0x2c] ss:$16 sps:$4 sm:$0xff]  }
 0x95c   :  { %9341 = vmatpush3.bf16.msra.mxu1 %v9960_v22  ;;  %v10046_v22 = vld [vmem:[%s11631_s11 + $0x20] ss:$16 sps:$4 sm:$0xff]  }
 0x95d   :  { %9393 = vmatpush3.bf16.msra.mxu0 %v9961_v23  ;;  %9342 = vmatprep.subr.bf16.mxu1 %v9962_v24  ;;  %v10049_v23 = vld [vmem:[%s11631_s11 + $0x28] ss:$16 sps:$4 sm:$0xff]   ;;  %v10054_v24 = vld [vmem:[%s11631_s11 + $0x4] ss:$16 sps:$4 sm:$0xff]  }
 0x95e   :  { %9394 = vmatprep.subr.bf16.mxu0 %v9963_v11  ;;  %v10057_v11 = vld [vmem:[%s11631_s11 + $0xc] ss:$16 sps:$4 sm:$0xff]  }
 0x960   :  { %9343 = vmatpush3.bf16.msra.mxu1 %v9964_v25  ;;  %v10052_v25 = vld [vmem:[%s11631_s11] ss:$16 sps:$4 sm:$0xff]  }
 0x961   :  { %9395 = vmatpush3.bf16.msra.mxu0 %v9965_v26  ;;  %9344 = vmatprep.subr.bf16.mxu1 %v9966_v27  ;;  %v10055_v26 = vld [vmem:[%s11631_s11 + $0x8] ss:$16 sps:$4 sm:$0xff]   ;;  %v5709_v27 = vsub.s32 5, %v10293_v34 }
 0x962   :  { %9396 = vmatprep.subr.bf16.mxu0 %v9967_v28 }
 0x964   :  { %9345 = vmatpush3.bf16.msra.mxu1 %v9968_v31  ;;  %v10092_v31 = vld [vmem:[%s11633_s13] sm:$0xff] }
 0x965   :  { %9397 = vmatpush3.bf16.msra.mxu0 %v9969_v50  ;;  %9346 = vmatprep.subr.bf16.mxu1 %v9970_v29  ;;  %v11575_v50 = vrot.slane %v10092_v31, %v5709_v27 }
 0x966   :  { %9398 = vmatprep.subr.bf16.mxu0 %v9971_v30 }
 0x968   :  { %9347 = vmatpush3.bf16.msra.mxu1 %v9972_v41 }
 0x969   :  { %9399 = vmatpush3.bf16.msra.mxu0 %v9973_v45  ;;  %6299 = vmatprep.subr.bf16.mxu1 %v10012_v40 }
 0x96a   :  { %6608 = vmatprep.subr.bf16.mxu0 %v10015_v43 }
 0x96b   :  { %6056 = vmatmul.mubr.bf16.vlgmr.msra.gmra.mxu1 %v9974_v46 }
 0x96c   :  { %6137 = vmatmul.mubr.bf16.vlgmr.msra.gmra.mxu0 %v9977_v47  ;;  %6063 = vmatprep.mubr.bf16.mxu1 %v9982_v48 }
 0x96d   :  { %6144 = vmatprep.mubr.bf16.mxu0 %v9985_v49  ;;  %6300 = vmatpush1.bf16.msra.mxu1 %v10010_v51 }
 0x96e   :  { %6609 = vmatpush1.bf16.msra.mxu0 %v10013_v54  ;;  %6301 = vmatprep.subr.bf16.mxu1 %v10018_v32 }
 0x96f   :  { %6610 = vmatprep.subr.bf16.mxu0 %v10021_v33 }
 0x971   :  { %6302 = vmatpush1.bf16.msra.mxu1 %v10016_v35 }
 0x972   :  { %6611 = vmatpush1.bf16.msra.mxu0 %v10019_v36  ;;  %6303 = vmatprep.subr.bf16.mxu1 %v10024_v55 }
 0x973   :  { %6064 = vmatmul.mubr.bf16.gmra.mxu1 %v9980_v60  ;;  %6612 = vmatprep.subr.bf16.mxu0 %v10027_v2 }
 0x974   :  { %6145 = vmatmul.mubr.bf16.gmra.mxu0 %v9983_v57  ;;  %6071 = vmatprep.mubr.bf16.mxu1 %v9988_v1 }
 0x975   :  { %6152 = vmatprep.mubr.bf16.mxu0 %v9991_v63  ;;  %6304 = vmatpush1.bf16.msra.mxu1 %v10022_v3 }
 0x976   :  { %6613 = vmatpush1.bf16.msra.mxu0 %v10025_v44  ;;  %6305 = vmatprep.subr.bf16.mxu1 %v10030_v4 }
 0x977   :  { %6614 = vmatprep.subr.bf16.mxu0 %v10033_v39 }
 0x979   :  { %6306 = vmatpush1.bf16.msra.mxu1 %v10028_v56 }
 0x97a   :  { %6615 = vmatpush1.bf16.msra.mxu0 %v10031_v58  ;;  %6307 = vmatprep.subr.bf16.mxu1 %v10036_v15 }
 0x97b   :  { %6072 = vmatmul.mubr.bf16.gmra.mxu1 %v9986_v62  ;;  %6616 = vmatprep.subr.bf16.mxu0 %v10039_v17 }
 0x97c   :  { %6153 = vmatmul.mubr.bf16.gmra.mxu0 %v9989_v61  ;;  %6079 = vmatprep.mubr.bf16.mxu1 %v9994_v38 }
 0x97d   :  { %6160 = vmatprep.mubr.bf16.mxu0 %v9997_v42  ;;  %6308 = vmatpush1.bf16.msra.mxu1 %v10034_v14 }
 0x97e   :  { %6617 = vmatpush1.bf16.msra.mxu0 %v10037_v16  ;;  %6309 = vmatprep.subr.bf16.mxu1 %v10042_v18 }
 0x97f   :  { %6618 = vmatprep.subr.bf16.mxu0 %v10045_v59 }
 0x981   :  { %6310 = vmatpush1.bf16.msra.mxu1 %v10040_v9 }
 0x982   :  { %6619 = vmatpush1.bf16.msra.mxu0 %v10043_v19  ;;  %6311 = vmatprep.subr.bf16.mxu1 %v10048_v20 }
 0x983   :  { %6080 = vmatmul.mubr.bf16.gmra.mxu1 %v9992_v0  ;;  %6620 = vmatprep.subr.bf16.mxu0 %v10051_v21 }
 0x984   :  { %6161 = vmatmul.mubr.bf16.gmra.mxu0 %v9995_v52  ;;  %6087 = vmatprep.mubr.bf16.mxu1 %v10000_v5 }
 0x985   :  { %6168 = vmatprep.mubr.bf16.mxu0 %v10003_v6  ;;  %6312 = vmatpush1.bf16.msra.mxu1 %v10046_v22 }
 0x986   :  { %6621 = vmatpush1.bf16.msra.mxu0 %v10049_v23  ;;  %6313 = vmatprep.subr.bf16.mxu1 %v10054_v24 }
 0x987   :  { %6622 = vmatprep.subr.bf16.mxu0 %v10057_v11 }
 0x989   :  { %6314 = vmatpush1.bf16.msra.mxu1 %v10052_v25 }
 0x98a   :  { %6623 = vmatpush1.bf16.msra.mxu0 %v10055_v26 }
 0x98b   :  { %6088 = vmatmul.mubr.bf16.gmra.mxu1 %v9998_v7 }
 0x98c   :  { %6169 = vmatmul.mubr.bf16.gmra.mxu0 %v10001_v37  ;;  %6095 = vmatprep.mubr.bf16.mxu1 %v10006_v8 }
 0x98d   :  { %6176 = vmatprep.mubr.bf16.mxu0 %v10009_v10 }
 0x993   :  { %6096 = vmatmul.mubr.bf16.gmra.mxu1 %v10004_v12 }
 0x994   :  { %6177 = vmatmul.mubr.bf16.gmra.mxu0 %v10007_v13  ;;  %6331 = vmatprep.mubr.bf16.mxu1 %v10115_v53 }
 0x995   :  { %6640 = vmatprep.mubr.bf16.mxu0 %v10115_v53 }
 0xa2b   :  { %v9348_v28 = vpop.f32.mrf.mxu1 }
 0xa2c   :  { %v9400_v29 = vpop.f32.mrf.mxu0 }
 0xa2d   :  { %v9349_v30 = vpop.f32.mrf.mxu1 }
 0xa2e   :  { %v9350_v40 = vadd.f32 %v9349_v30, %v9348_v28  ;;  %v9401_v41 = vpop.f32.mrf.mxu0 }
 0xa2f   :  { %v9351_v43 = vpop.f32.mrf.mxu1  ;;  %v9402_v48 = vadd.f32 %v9401_v41, %v9400_v29 }
 0xa30   :  { %v6058_v45 = vadd.f32 %v9350_v40, %v11575_v50  ;;  %v9403_v46 = vpop.f32.mrf.mxu0 }
 0xa31   :  { %v9352_v47 = vpop.f32.mrf.mxu1 }
 0xa32   :  { %v9353_v49 = vadd.f32 %v9352_v47, %v9351_v43  ;;  %v9404_v51 = vpop.f32.mrf.mxu0  ;;  %v6139_v54 = vadd.f32 %v9402_v48, %v6058_v45 }
 0xa33   :  { %v9354_v34 = vpop.f32.mrf.mxu1  ;;  %v9405_v33 = vadd.f32 %v9404_v51, %v9403_v46 }
 0xa34   :  { %v6061_v32 = vadd.f32 %v9353_v49, %v11575_v50  ;;  %v9406_v35 = vpop.f32.mrf.mxu0  ;;  %v6185_v1 = vmax.f32 %v6139_v54, 0.0 }
 0xa35   :  { %v9355_v36 = vpop.f32.mrf.mxu1 }
 0xa36   :  { %v6142_v55 = vadd.f32 %v9405_v33, %v6061_v32  ;;  %v9356_v60 = vadd.f32 %v9355_v36, %v9354_v34  ;;  %v9407_v2 = vpop.f32.mrf.mxu0 }
 0xa37   :  { %v9357_v57 = vpop.f32.mrf.mxu1  ;;  %v9408_v56 = vadd.f32 %v9407_v2, %v9406_v35 }
 0xa38   :  { %v6186_v63 = vmax.f32 %v6142_v55, 0.0  ;;  %v6066_v3 = vadd.f32 %v9356_v60, %v11575_v50  ;;  %v9409_v44 = vpop.f32.mrf.mxu0 }
 0xa39   :  { %v9358_v4 = vpop.f32.mrf.mxu1 }
 0xa3a   :  { %v6197_v39 = vpack.c.bf16 %v6186_v63, %v6185_v1  ;;  %v9359_v58 = vadd.f32 %v9358_v4, %v9357_v57  ;;  %v9410_v62 = vpop.f32.mrf.mxu0  ;;  %v6147_v38 = vadd.f32 %v9408_v56, %v6066_v3 }
 0xa3b   :  { %v9360_v61 = vpop.f32.mrf.mxu1  ;;  %v9411_v0 = vadd.f32 %v9410_v62, %v9409_v44 }
 0xa3c   :  { %v6069_v42 = vadd.f32 %v9359_v58, %v11575_v50  ;;  %6332 = vmatmul.mubr.bf16.vlgmr.msra.gmra.mxu1 %v6197_v39  ;;  %6641 = vmatmul.mubr.bf16.vlgmr.msra.gmra.mxu0 %v6197_v39  ;;  %v9412_v52 = vpop.f32.mrf.mxu0  ;;  %v6187_v10 = vmax.f32 %v6147_v38, 0.0 }
 0xa3d   :  { %v9361_v5 = vpop.f32.mrf.mxu1  ;;  %6341 = vmatprep.mubr.bf16.mxu1 %v10115_v53  ;;  %6650 = vmatprep.mubr.bf16.mxu0 %v10115_v53 }
 0xa3e   :  { %v6150_v6 = vadd.f32 %v9411_v0, %v6069_v42  ;;  %v9362_v7 = vadd.f32 %v9361_v5, %v9360_v61  ;;  %v9413_v37 = vpop.f32.mrf.mxu0 }
 0xa3f   :  { %v9363_v8 = vpop.f32.mrf.mxu1  ;;  %v9414_v17 = vadd.f32 %v9413_v37, %v9412_v52 }
 0xa40   :  { %v6188_v12 = vmax.f32 %v6150_v6, 0.0  ;;  %v6074_v13 = vadd.f32 %v9362_v7, %v11575_v50  ;;  %v9415_v14 = vpop.f32.mrf.mxu0 }
 0xa41   :  { %v9364_v15 = vpop.f32.mrf.mxu1 }
 0xa42   :  { %v6198_v16 = vpack.c.bf16 %v6188_v12, %v6187_v10  ;;  %v9365_v18 = vadd.f32 %v9364_v15, %v9363_v8  ;;  %v9416_v59 = vpop.f32.mrf.mxu0  ;;  %v6155_v19 = vadd.f32 %v9414_v17, %v6074_v13 }
 0xa43   :  { %v9366_v9 = vpop.f32.mrf.mxu1  ;;  %v9417_v21 = vadd.f32 %v9416_v59, %v9415_v14 }
 0xa44   :  { %v6077_v20 = vadd.f32 %v9365_v18, %v11575_v50  ;;  %6342 = vmatmul.mubr.bf16.gmra.mxu1 %v6198_v16  ;;  %6651 = vmatmul.mubr.bf16.gmra.mxu0 %v6198_v16  ;;  %v9418_v22 = vpop.f32.mrf.mxu0  ;;  %v6189_v27 = vmax.f32 %v6155_v19, 0.0 }
 0xa45   :  { %v9367_v23 = vpop.f32.mrf.mxu1  ;;  %6351 = vmatprep.mubr.bf16.mxu1 %v10115_v53  ;;  %6660 = vmatprep.mubr.bf16.mxu0 %v10115_v53 }
 0xa46   :  { %v6158_v24 = vadd.f32 %v9417_v21, %v6077_v20  ;;  %v9368_v11 = vadd.f32 %v9367_v23, %v9366_v9  ;;  %v9419_v25 = vpop.f32.mrf.mxu0  ;;  %v10084_v20 = vld [vmem:[%s11632_s12 + $0x4] ss:$12 sps:$4 sm:$0xff]  }
 0xa47   :  { %v9369_v26 = vpop.f32.mrf.mxu1  ;;  %v9420_v41 = vadd.f32 %v9419_v25, %v9418_v22 }
 0xa48   :  { %v6190_v28 = vmax.f32 %v6158_v24, 0.0  ;;  %v6082_v31 = vadd.f32 %v9368_v11, %v11575_v50  ;;  %v9421_v29 = vpop.f32.mrf.mxu0 }
 0xa49   :  { %v9370_v30 = vpop.f32.mrf.mxu1 }
 0xa4a   :  { %v6199_v40 = vpack.c.bf16 %v6190_v28, %v6189_v27  ;;  %v9371_v43 = vadd.f32 %v9370_v30, %v9369_v26  ;;  %v9422_v45 = vpop.f32.mrf.mxu0  ;;  %v6163_v47 = vadd.f32 %v9420_v41, %v6082_v31 }
 0xa4b   :  { %v9372_v46 = vpop.f32.mrf.mxu1  ;;  %v9423_v49 = vadd.f32 %v9422_v45, %v9421_v29 }
 0xa4c   :  { %v6085_v48 = vadd.f32 %v9371_v43, %v11575_v50  ;;  %6352 = vmatmul.mubr.bf16.gmra.mxu1 %v6199_v40  ;;  %6661 = vmatmul.mubr.bf16.gmra.mxu0 %v6199_v40  ;;  %v9424_v51 = vpop.f32.mrf.mxu0  ;;  %v6191_v36 = vmax.f32 %v6163_v47, 0.0 }
 0xa4d   :  { %v9373_v34 = vpop.f32.mrf.mxu1  ;;  %6361 = vmatprep.mubr.bf16.mxu1 %v10115_v53  ;;  %6670 = vmatprep.mubr.bf16.mxu0 %v10115_v53 }
 0xa4e   :  { %v6166_v54 = vadd.f32 %v9423_v49, %v6085_v48  ;;  %v9374_v32 = vadd.f32 %v9373_v34, %v9372_v46  ;;  %v9425_v33 = vpop.f32.mrf.mxu0 }
 0xa4f   :  { %v9375_v35 = vpop.f32.mrf.mxu1  ;;  %v9426_v63 = vadd.f32 %v9425_v33, %v9424_v51 }
 0xa50   :  { %v6192_v55 = vmax.f32 %v6166_v54, 0.0  ;;  %v6090_v60 = vadd.f32 %v9374_v32, %v11575_v50  ;;  %v9427_v2 = vpop.f32.mrf.mxu0 }
 0xa51   :  { %v9376_v57 = vpop.f32.mrf.mxu1 }
 0xa52   :  { %v6200_v1 = vpack.c.bf16 %v6192_v55, %v6191_v36  ;;  %v9377_v3 = vadd.f32 %v9376_v57, %v9375_v35  ;;  %v9428_v44 = vpop.f32.mrf.mxu0  ;;  %v6171_v39 = vadd.f32 %v9426_v63, %v6090_v60 }
 0xa53   :  { %v9378_v4 = vpop.f32.mrf.mxu1  ;;  %v9429_v58 = vadd.f32 %v9428_v44, %v9427_v2 }
 0xa54   :  { %v6093_v56 = vadd.f32 %v9377_v3, %v11575_v50  ;;  %6362 = vmatmul.mubr.bf16.gmra.mxu1 %v6200_v1  ;;  %6671 = vmatmul.mubr.bf16.gmra.mxu0 %v6200_v1  ;;  %v9430_v62 = vpop.f32.mrf.mxu0  ;;  %v6193_v5 = vmax.f32 %v6171_v39, 0.0 }
 0xa55   :  { %v9379_v61 = vpop.f32.mrf.mxu1  ;;  %6371 = vmatprep.mubr.bf16.mxu1 %v10115_v53  ;;  %6680 = vmatprep.mubr.bf16.mxu0 %v10115_v53 }
 0xa56   :  { %v6174_v38 = vadd.f32 %v9429_v58, %v6093_v56  ;;  %v9380_v42 = vadd.f32 %v9379_v61, %v9378_v4  ;;  %v9431_v0 = vpop.f32.mrf.mxu0 }
 0xa57   :  { %v9381_v52 = vpop.f32.mrf.mxu1  ;;  %v9432_v12 = vadd.f32 %v9431_v0, %v9430_v62 }
 0xa58   :  { %v6194_v6 = vmax.f32 %v6174_v38, 0.0  ;;  %v6098_v7 = vadd.f32 %v9380_v42, %v11575_v50  ;;  %v9433_v37 = vpop.f32.mrf.mxu0 }
 0xa59   :  { %v9382_v8 = vpop.f32.mrf.mxu1 }
 0xa5a   :  { %v6201_v10 = vpack.c.bf16 %v6194_v6, %v6193_v5  ;;  %v9383_v13 = vadd.f32 %v9382_v8, %v9381_v52  ;;  %v9434_v14 = vpop.f32.mrf.mxu0  ;;  %v6179_v15 = vadd.f32 %v9432_v12, %v6098_v7 }
 0xa5b   :  { %v9435_v17 = vadd.f32 %v9434_v14, %v9433_v37 }
 0xa5c   :  { %v6101_v16 = vadd.f32 %v9383_v13, %v11575_v50  ;;  %6372 = vmatmul.mubr.bf16.gmra.mxu1 %v6201_v10  ;;  %6681 = vmatmul.mubr.bf16.gmra.mxu0 %v6201_v10  ;;  %v6195_v59 = vmax.f32 %v6179_v15, 0.0  ;;  %v10085_v50 = vld [vmem:[%s11632_s12 + $0x8] ss:$12 sps:$4 sm:$0xff]  }
 0xa5d   :  { %6381 = vmatprep.mubr.bf16.mxu1 %v10115_v53  ;;  %6690 = vmatprep.mubr.bf16.mxu0 %v10115_v53 }
 0xa5e   :  { %v6182_v18 = vadd.f32 %v9435_v17, %v6101_v16 }
 0xa60   :  { %v6196_v9 = vmax.f32 %v6182_v18, 0.0 }
 0xa62   :  { %v6202_v19 = vpack.c.bf16 %v6196_v9, %v6195_v59 }
 0xa64   :  { %6382 = vmatmul.mubr.bf16.gmra.mxu1 %v6202_v19  ;;  %6691 = vmatmul.mubr.bf16.gmra.mxu0 %v6202_v19 }
 0xa65   :  { %7085 = vmatprep.mubr.bf16.mxu1 %v10084_v20  ;;  %9562 = vmatprep.mubr.bf16.mxu0 %v10085_v50 }
 0xafc   :  { %v6333_v21 = vpop.f32.mrf.mxu1  ;;  %v6642_v22 = vpop.f32.mrf.mxu0 }
 0xafe   :  { %v6335_v23 = vpop.f32.mrf.mxu1  ;;  %v6644_v53 = vpop.f32.mrf.mxu0 }
 0xb00   :  { %v6337_v24 = vpop.f32.mrf.mxu1  ;;  %v6646_v11 = vpop.f32.mrf.mxu0 }
 0xb01   :  { %v8736_v25 = vpack.c.bf16 %v6337_v24, %v6333_v21  ;;  %v8796_v26 = vpack.c.bf16 %v6646_v11, %v6642_v22 }
 0xb02   :  { %v6339_v27 = vpop.f32.mrf.mxu1  ;;  %v6648_v28 = vpop.f32.mrf.mxu0 }
 0xb03   :  { %8737 = vst [vmem:[#allocation2] sm:$0xff] %v8736_v25   ;;  %8964 = vst [vmem:[#allocation2 + $0x60] sm:$0xff] %v8796_v26   ;;  %v8766_v31 = vpack.c.bf16 %v6339_v27, %v6335_v23  ;;  %v8826_v29 = vpack.c.bf16 %v6648_v28, %v6644_v53 }
 0xb04   :  { %v6343_v30 = vpop.f32.mrf.mxu1  ;;  %v6652_v40 = vpop.f32.mrf.mxu0 }
 0xb05   :  { %8958 = vst [vmem:[#allocation2 + $0x30] sm:$0xff] %v8766_v31   ;;  %8970 = vst [vmem:[#allocation2 + $0x90] sm:$0xff] %v8826_v29  }
 0xb06   :  { %v6345_v41 = vpop.f32.mrf.mxu1  ;;  %v6654_v43 = vpop.f32.mrf.mxu0 }
 0xb08   :  { %v6347_v45 = vpop.f32.mrf.mxu1  ;;  %v6656_v46 = vpop.f32.mrf.mxu0 }
 0xb09   :  { %v8741_v47 = vpack.c.bf16 %v6347_v45, %v6343_v30  ;;  %v8801_v48 = vpack.c.bf16 %v6656_v46, %v6652_v40 }
 0xb0a   :  { %v6349_v49 = vpop.f32.mrf.mxu1  ;;  %v6658_v51 = vpop.f32.mrf.mxu0 }
 0xb0b   :  { %8953 = vst [vmem:[#allocation2 + $0x8] sm:$0xff] %v8741_v47   ;;  %8965 = vst [vmem:[#allocation2 + $0x68] sm:$0xff] %v8801_v48   ;;  %v8771_v34 = vpack.c.bf16 %v6349_v49, %v6345_v41  ;;  %v8831_v54 = vpack.c.bf16 %v6658_v51, %v6654_v43  ;;  %v10064_v41 = vld [vmem:[#allocation2 + $0x60] sm:$0xff]  }
 0xb0c   :  { %v6353_v32 = vpop.f32.mrf.mxu1  ;;  %v6662_v33 = vpop.f32.mrf.mxu0  ;;  %v10061_v53 = vld [vmem:[#allocation2 + $0x30] sm:$0xff]  }
 0xb0d   :  { %8959 = vst [vmem:[#allocation2 + $0x38] sm:$0xff] %v8771_v34   ;;  %8971 = vst [vmem:[#allocation2 + $0x98] sm:$0xff] %v8831_v54  }
 0xb0e   :  { %v6355_v35 = vpop.f32.mrf.mxu1  ;;  %v6664_v36 = vpop.f32.mrf.mxu0 }
 0xb10   :  { %v6357_v55 = vpop.f32.mrf.mxu1  ;;  %v6666_v60 = vpop.f32.mrf.mxu0 }
 0xb11   :  { %v8746_v2 = vpack.c.bf16 %v6357_v55, %v6353_v32  ;;  %v8806_v57 = vpack.c.bf16 %v6666_v60, %v6662_v33  ;;  %v10078_v55 = vld [vmem:[#allocation2] sm:$0xff]   ;;  %v10079_v60 = vld [vmem:[#allocation2 + $0x90] sm:$0xff]  }
 0xb12   :  { %v6359_v1 = vpop.f32.mrf.mxu1  ;;  %v6668_v63 = vpop.f32.mrf.mxu0  ;;  %v10062_v25 = vld [vmem:[#allocation2 + $0x68] sm:$0xff]  }
 0xb13   :  { %8954 = vst [vmem:[#allocation2 + $0x10] sm:$0xff] %v8746_v2   ;;  %8966 = vst [vmem:[#allocation2 + $0x70] sm:$0xff] %v8806_v57   ;;  %v8776_v3 = vpack.c.bf16 %v6359_v1, %v6355_v35  ;;  %v8836_v44 = vpack.c.bf16 %v6668_v63, %v6664_v36  ;;  %v10075_v33 = vld [vmem:[#allocation2 + $0x8] sm:$0xff]  }
 0xb14   :  { %v6363_v4 = vpop.f32.mrf.mxu1  ;;  %v6672_v39 = vpop.f32.mrf.mxu0  ;;  %v10059_v19 = vld [vmem:[#allocation2 + $0x38] sm:$0xff]   ;;  %v10082_v2 = vld [vmem:[%s11632_s12] ss:$12 sps:$4 sm:$0xff]  }
 0xb15   :  { %8960 = vst [vmem:[#allocation2 + $0x40] sm:$0xff] %v8776_v3   ;;  %8972 = vst [vmem:[#allocation2 + $0xa0] sm:$0xff] %v8836_v44   ;;  %v10076_v35 = vld [vmem:[#allocation2 + $0x98] sm:$0xff]   ;;  %v10086_v44 = vld [vmem:[%s11632_s12 + $0x20] ss:$12 sps:$4 sm:$0xff]  }
 0xb16   :  { %v6365_v56 = vpop.f32.mrf.mxu1  ;;  %v6674_v58 = vpop.f32.mrf.mxu0  ;;  %v10089_v57 = vld [vmem:[%s11632_s12 + $0x1c] ss:$12 sps:$4 sm:$0xff]   ;;  %v10087_v3 = vld [vmem:[%s11632_s12 + $0x18] ss:$12 sps:$4 sm:$0xff]   ;;  %s10116_s12 = smov [#allocation3]  }
 0xb17   :  { %s7160_s1 = sshll.u32 %s10116_s12, 4  ;;  %s7161_s1 = int_to_ptr.vmem [resolvable:$true] %s7160_s1 }
 0xb18   :  { %v6367_v62 = vpop.f32.mrf.mxu1  ;;  %v6676_v61 = vpop.f32.mrf.mxu0  ;;  %s10093_s23 = scalar_lea.vmem %s7161_s1, 512  ;;  %p10098_p1 = scmp.lt.s32.totalorder %s7161_s1, %s7161_s1 }
 0xb19   :  { %v8751_v38 = vpack.c.bf16 %v6367_v62, %v6363_v4  ;;  %v8811_v42 = vpack.c.bf16 %v6676_v61, %v6672_v39  ;;  %p10094_p0 = scmp.ne.s32.totalorder %s7161_s1, %s10093_s23  ;;  %p10099_p2 = scmp.lt.s32.totalorder %s10093_s23, %s10093_s23 }
 0xb1a   :  { %v6369_v0 = vpop.f32.mrf.mxu1  ;;  %v6678_v52 = vpop.f32.mrf.mxu0  ;;  %v10060_v21 = vld [vmem:[#allocation2 + $0x70] sm:$0xff]  }
 0xb1b   :  { %8955 = vst [vmem:[#allocation2 + $0x18] sm:$0xff] %v8751_v38   ;;  %8967 = vst [vmem:[#allocation2 + $0x78] sm:$0xff] %v8811_v42   ;;  %v8781_v5 = vpack.c.bf16 %v6369_v0, %v6365_v56  ;;  %v8841_v6 = vpack.c.bf16 %v6678_v52, %v6674_v58  ;;  %v10072_v34 = vld [vmem:[#allocation2 + $0x10] sm:$0xff]   ;;  %p10100_p3 = por %p10099_p2, %p10098_p1 }
 0xb1c   :  { %v6373_v7 = vpop.f32.mrf.mxu1  ;;  %v6682_v37 = vpop.f32.mrf.mxu0  ;;  %v10073_v54 = vld [vmem:[#allocation2 + $0xa0] sm:$0xff]  }
 0xb1d   :  { %8961 = vst [vmem:[#allocation2 + $0x48] sm:$0xff] %v8781_v5   ;;  %8973 = vst [vmem:[#allocation2 + $0xa8] sm:$0xff] %v8841_v6   ;;  %v10077_v36 = vld [vmem:[#allocation2 + $0x40] sm:$0xff]   ;;  %p10101_p4 = pnand %p10100_p3, %p10094_p0 }
 0xb1e   :  { %v6375_v8 = vpop.f32.mrf.mxu1  ;;  %v6684_v10 = vpop.f32.mrf.mxu0 }
 0xb20   :  { %v6377_v12 = vpop.f32.mrf.mxu1  ;;  %v6686_v13 = vpop.f32.mrf.mxu0 }
 0xb21   :  { %v8756_v14 = vpack.c.bf16 %v6377_v12, %v6373_v7  ;;  %v8816_v15 = vpack.c.bf16 %v6686_v13, %v6682_v37 }
 0xb22   :  { %v6379_v16 = vpop.f32.mrf.mxu1  ;;  %v6688_v17 = vpop.f32.mrf.mxu0  ;;  %v10058_v18 = vld [vmem:[#allocation2 + $0x78] sm:$0xff]  }
 0xb23   :  { %8956 = vst [vmem:[#allocation2 + $0x20] sm:$0xff] %v8756_v14   ;;  %8968 = vst [vmem:[#allocation2 + $0x80] sm:$0xff] %v8816_v15   ;;  %v8786_v59 = vpack.c.bf16 %v6379_v16, %v6375_v8  ;;  %v8846_v9 = vpack.c.bf16 %v6688_v17, %v6684_v10  ;;  %9436 = vmatprep.subr.bf16.mxu1 %v10058_v18  ;;  %v10069_v48 = vld [vmem:[#allocation2 + $0x18] sm:$0xff]  }
 0xb24   :  { %v6383_v20 = vpop.f32.mrf.mxu1  ;;  %v6692_v50 = vpop.f32.mrf.mxu0  ;;  %9437 = vmatpush3.bf16.msra.mxu1 %v10059_v19  ;;  %v10070_v49 = vld [vmem:[#allocation2 + $0xa8] sm:$0xff]  }
 0xb25   :  { %8962 = vst [vmem:[#allocation2 + $0x50] sm:$0xff] %v8786_v59   ;;  %8974 = vst [vmem:[#allocation2 + $0xb0] sm:$0xff] %v8846_v9   ;;  %9438 = vmatprep.subr.bf16.mxu1 %v10060_v21  ;;  %v10074_v32 = vld [vmem:[#allocation2 + $0x48] sm:$0xff]  }
 0xb26   :  { %v6385_v22 = vpop.f32.mrf.mxu1  ;;  %v6694_v23 = vpop.f32.mrf.mxu0 }
 0xb28   :  { %v6387_v24 = vpop.f32.mrf.mxu1  ;;  %v6696_v11 = vpop.f32.mrf.mxu0  ;;  %9439 = vmatpush3.bf16.msra.mxu1 %v10061_v53 }
 0xb29   :  { %v8761_v26 = vpack.c.bf16 %v6387_v24, %v6383_v20  ;;  %v8821_v27 = vpack.c.bf16 %v6696_v11, %v6692_v50  ;;  %9440 = vmatprep.subr.bf16.mxu1 %v10062_v25 }
 0xb2a   :  { %v6698_v28 = vpop.f32.mrf.mxu0  ;;  %v6389_v31 = vpop.f32.mrf.mxu1  ;;  %v10066_v45 = vld [vmem:[#allocation2 + $0x20] sm:$0xff]  }
 0xb2b   :  { %8957 = vst [vmem:[#allocation2 + $0x28] sm:$0xff] %v8761_v26   ;;  %8969 = vst [vmem:[#allocation2 + $0x88] sm:$0xff] %v8821_v27   ;;  %v8851_v29 = vpack.c.bf16 %v6698_v28, %v6694_v23  ;;  %v8791_v30 = vpack.c.bf16 %v6389_v31, %v6385_v22  ;;  %v10081_v63 = vld [vmem:[#allocation2 + $0x80] sm:$0xff]  }
 0xb2c   :  { %v10067_v46 = vld [vmem:[#allocation2 + $0xb0] sm:$0xff]  }
 0xb2d   :  { %8975 = vst [vmem:[#allocation2 + $0xb8] sm:$0xff] %v8851_v29   ;;  %8963 = vst [vmem:[#allocation2 + $0x58] sm:$0xff] %v8791_v30   ;;  %v10071_v51 = vld [vmem:[#allocation2 + $0x50] sm:$0xff]  }
 0xb32   :  { %v10063_v40 = vld [vmem:[#allocation2 + $0x28] sm:$0xff]  }
 0xb33   :  { %9441 = vmatpush3.bf16.msra.mxu1 %v10063_v40  ;;  %v10080_v1 = vld [vmem:[#allocation2 + $0x88] sm:$0xff]  }
 0xb34   :  { %v10065_v43 = vld [vmem:[#allocation2 + $0xb8] sm:$0xff]   ;;  %9442 = vmatprep.subr.bf16.mxu1 %v10064_v41 }
 0xb35   :  { %9546 = vmatprep.subr.bf16.mxu0 %v10065_v43  ;;  %v10068_v47 = vld [vmem:[#allocation2 + $0x58] sm:$0xff]  }
 0xb36   :  { %9547 = vmatpush3.bf16.msra.mxu0 %v10065_v43 }
 0xb37   :  { %9443 = vmatpush3.bf16.msra.mxu1 %v10066_v45  ;;  %9548 = vmatprep.subr.bf16.mxu0 %v10067_v46 }
 0xb38   :  { %9444 = vmatprep.subr.bf16.mxu1 %v10068_v47 }
 0xb3a   :  { %9549 = vmatpush3.bf16.msra.mxu0 %v10067_v46 }
 0xb3b   :  { %9445 = vmatpush3.bf16.msra.mxu1 %v10069_v48  ;;  %9550 = vmatprep.subr.bf16.mxu0 %v10070_v49 }
 0xb3c   :  { %9446 = vmatprep.subr.bf16.mxu1 %v10071_v51 }
 0xb3e   :  { %9551 = vmatpush3.bf16.msra.mxu0 %v10070_v49 }
 0xb3f   :  { %9447 = vmatpush3.bf16.msra.mxu1 %v10072_v34  ;;  %9552 = vmatprep.subr.bf16.mxu0 %v10073_v54 }
 0xb40   :  { %9448 = vmatprep.subr.bf16.mxu1 %v10074_v32 }
 0xb42   :  { %9553 = vmatpush3.bf16.msra.mxu0 %v10073_v54 }
 0xb43   :  { %9449 = vmatpush3.bf16.msra.mxu1 %v10075_v33  ;;  %9554 = vmatprep.subr.bf16.mxu0 %v10076_v35 }
 0xb44   :  { %9450 = vmatprep.subr.bf16.mxu1 %v10077_v36 }
 0xb46   :  { %9555 = vmatpush3.bf16.msra.mxu0 %v10076_v35 }
 0xb47   :  { %9451 = vmatpush3.bf16.msra.mxu1 %v10078_v55  ;;  %9556 = vmatprep.subr.bf16.mxu0 %v10079_v60 }
 0xb4a   :  { %9557 = vmatpush3.bf16.msra.mxu0 %v10079_v60  ;;  %7086 = vmatmul.mubr.bf16.vlgmr.msra.gmra.mxu1 %v10082_v2 }
 0xb4b   :  { %9558 = vmatprep.subr.bf16.mxu0 %v10080_v1  ;;  %7093 = vmatprep.mubr.bf16.mxu1 %v10089_v57 }
 0xb4e   :  { %9559 = vmatpush3.bf16.msra.mxu0 %v10080_v1 }
 0xb4f   :  { %9560 = vmatprep.subr.bf16.mxu0 %v10081_v63 }
 0xb52   :  { %9561 = vmatpush3.bf16.msra.mxu0 %v10081_v63  ;;  %7094 = vmatmul.mubr.bf16.gmra.mxu1 %v10087_v3 }
 0xb55   :  { %9563 = vmatmul.mubr.bf16.vlgmr.msra.gmra.mxu0 %v10086_v44 }
 0xc0a   :  { %v9452_v4 = vpop.f32.mrf.mxu1 }
 0xc0c   :  { %v9453_v39 = vpop.f32.mrf.mxu1 }
 0xc0d   :  { %v9454_v0 = vadd.f32 %v9453_v39, %v9452_v4 }
 0xc0e   :  { %v9455_v56 = vpop.f32.mrf.mxu1 }
 0xc10   :  { %v9456_v58 = vpop.f32.mrf.mxu1 }
 0xc11   :  { %v9457_v12 = vadd.f32 %v9456_v58, %v9455_v56 }
 0xc12   :  { %v9458_v62 = vpop.f32.mrf.mxu1 }
 0xc14   :  { %v9459_v61 = vpop.f32.mrf.mxu1 }
 0xc15   :  { %v9564_v38 = vpop.f32.mrf.mxu0  ;;  %v9460_v42 = vadd.f32 %v9459_v61, %v9458_v62 }
 0xc16   :  { %v9461_v52 = vpop.f32.mrf.mxu1 }
 0xc17   :  { %v7136_v5 = vpop.f32.mrf.mxu0  ;;  %v7145_v6 = vadd.f32 %v9564_v38, %v9460_v42 }
 0xc18   :  { %v7137_v7 = vadd.f32 %v9454_v0, %v7136_v5  ;;  %v9462_v37 = vpop.f32.mrf.mxu1 }
 0xc19   :  { %v9565_v8 = vpop.f32.mrf.mxu0  ;;  %7153 = vst [vmem:[#allocation3 + $0x10] sm:$0xff] %v7145_v6  ;;  %v9463_v10 = vadd.f32 %v9462_v37, %v9461_v52 }
 0xc1a   :  { %7151 = vst [vmem:[#allocation3] sm:$0xff] %v7137_v7 }
 0xc1b   :  { %v7139_v13 = vpop.f32.mrf.mxu0  ;;  %v7148_v14 = vadd.f32 %v9565_v8, %v9463_v10 }
 0xc1c   :  { %v7140_v15 = vadd.f32 %v9457_v12, %v7139_v13 }
 0xc1d   :  { %7154 = vst [vmem:[#allocation3 + $0x18] sm:$0xff] %v7148_v14 }
 0xc1e   :  { %7152 = vst [vmem:[#allocation3 + $0x8] sm:$0xff] %v7140_v15 }
 0xc1f   :  { %10104 = shalt.err (!%p10101_p4)
}
 0xc20   :  { %s10117_s24 = smov 128   ;;  %s10118_s5 = smov 8  }
 0xc21   :  { %7166 = dma.vmem_to_hbm [thread:$0]  %s7161_s1, 512, %s11634_s14, [#allocation4], %s10117_s24, %s10117_s24, %s10118_s5  }
 0xc22   :  { %10113 = dma.done.wait [#allocation4], 512  }
 0xc23   :  { %10114 = vsyncadd [#allocation4], 4294966784 }
 0xc24   :  { %7170 = vsyncpa [#allocation4], 1 }

</bundles_post_ra>
